<compile_context>
chip_gen: v6e
topology: v6e:2x2x1
jax: 0.10.0
libtpu: 0.0.40
codegen_flags: <defaults>
</compile_context>

<pallas_src>
from functools import partial

import jax
import jax.numpy as jnp
from jax.experimental import pallas as pl
from jax.experimental.pallas import tpu as pltpu

# 2x2 block-conv taps (dbh, dbw); order shared by the weight packer and kernel.
_TAPS = ((-1, -1), (-1, 0), (0, -1), (0, 0))

LANE_BATCH = 16   # images packed into the lane axis per grid step
                  # (v6e/v7x sweet spot; v5e may prefer 8)


def _kidx(d, p):
    """(block offset, parity) -> 3x3 kernel index along one axis, or None."""
    if d == -1:
        return 0 if p == 1 else None
    return 1 + p


# ---------------------------------------------------------------------------
# Single fused kernel: one grid step == LANE_BATCH images, all four layers.
# Orientation everywhere: channels/parities on sublanes, (image, block-grid
# position) on lanes, so every layer is  W_packed @ activation  on the MXU.
# ---------------------------------------------------------------------------
def _fused_autoencoder_kernel(x_ref, w1_ref, b1_ref, w2_ref, b2_ref,
                              w3_ref, b3_ref, w4_ref, b4_ref, o_ref):
    f32, bf16 = jnp.float32, jnp.bfloat16
    nb = x_ref.shape[-1]                                   # 16 * LANE_BATCH lanes

    # --- encoder conv1 (3->64, k3 s2 p1), folded block-diagonally over the
    #     four output parities so its result lands directly in space-to-depth
    #     form: rows = parity*64 + channel, lanes = (image, 4x4 block grid).
    r = jnp.dot(w1_ref[...], x_ref[0], preferred_element_type=f32)   # (256, nb)
    r = jnp.maximum(r + b1_ref[...], 0.0)                 # ReLU (Dropout2d = id)

    # --- encoder conv2 (64->128, k3 s2 p1) == 2x2 conv over the block grid:
    #     h2 = sum_t W2_t @ shift_t(r).  shift_t is a lane roll; the iota mask
    #     zeroes padding taps AND any lane that would wrap across an image
    #     boundary (those positions are exactly conv2's zero padding).
    lane = jax.lax.broadcasted_iota(jnp.int32, (1, nb), 1)
    m_h = (lane % 16) >= 4           # block row bh-1 in range
    m_w = (lane % 4) >= 1            # block col bw-1 in range

    def shifted(shift, mask):
        # rolls done on the f32 tensor (32-bit lane rotate), cast to bf16 for
        # the MXU operand afterwards.
        rt = pltpu.roll(r, shift, axis=1) if shift else r
        if mask is not None:
            rt = jnp.where(mask, rt, 0.0)
        return rt.astype(bf16)

    h2 = jnp.dot(w2_ref[3], shifted(0, None), preferred_element_type=f32)
    h2 = h2 + jnp.dot(w2_ref[2], shifted(1, m_w), preferred_element_type=f32)
    h2 = h2 + jnp.dot(w2_ref[1], shifted(4, m_h), preferred_element_type=f32)
    h2 = h2 + jnp.dot(w2_ref[0], shifted(5, m_h & m_w),
                      preferred_element_type=f32)
    h2 = jnp.maximum(h2 + b2_ref[...], 0.0).astype(bf16)              # (128, nb)

    # --- decoder convT1 (128->64, k2 s2): pure matmul; output already in
    #     space-to-depth form (rows = (a, b, cout), lanes = block grid x img).
    y3 = jnp.dot(w3_ref[...], h2, preferred_element_type=f32)         # (256, nb)
    y3 = jnp.maximum(y3 + b3_ref[...], 0.0).astype(bf16)

    # --- decoder convT2 (64->3, k2 s2) + sigmoid, folded block-diagonally over
    #     the (a, b) parities so no depth-to-space shuffle is needed.
    #     rows = (a, b, a2, b2, c) = 48, lanes = nb -> lane-dense bf16 store.
    y4 = jnp.dot(w4_ref[...], y3, preferred_element_type=f32)         # (48, nb)
    y4 = jax.nn.sigmoid(y4 + b4_ref[...])
    o_ref[0] = y4.astype(o_ref.dtype)


# ---------------------------------------------------------------------------
# One-time weight packing (outside the jitted forward).
# ---------------------------------------------------------------------------
def prepare_params(params):
    w1, b1 = params["enc_conv1"]   # (64, 3, 3, 3), (64,)
    w2, b2 = params["enc_conv2"]   # (128, 64, 3, 3), (128,)
    w3, b3 = params["dec_conv1"]   # (128, 64, 2, 2), (64,)
    w4, b4 = params["dec_conv2"]   # (64, 3, 2, 2), (3,)
    bf16, f32 = jnp.bfloat16, jnp.float32

    # conv1 folded block-diagonally over the 4 output parities.
    w1p = jnp.pad(w1.reshape(64, 27), ((0, 0), (0, 5)))               # (64, 32)
    w1bd = jnp.kron(jnp.eye(4, dtype=w1.dtype), w1p).astype(bf16)     # (256, 128)
    b1c = jnp.tile(b1, 4).reshape(256, 1).astype(f32)

    # conv2: one (128, 256) weight per 2x2 block tap; columns = (parity, cin),
    # zeroed where the tap/parity pair does not map to a 3x3 kernel position.
    tap_ws = []
    for (dh, dw) in _TAPS:
        cols = []
        for ph in range(2):
            for pw in range(2):
                kh, kw = _kidx(dh, ph), _kidx(dw, pw)
                if kh is None or kw is None:
                    cols.append(jnp.zeros((128, 64), w2.dtype))
                else:
                    cols.append(w2[:, :, kh, kw])
        tap_ws.append(jnp.concatenate(cols, axis=1))                  # (128, 256)
    w2t = jnp.stack(tap_ws, axis=0).astype(bf16)                      # (4, 128, 256)
    b2c = b2.reshape(128, 1).astype(f32)

    # convT1: rows = (a, b, cout), cols = cin.
    w3t = jnp.concatenate(
        [w3[:, :, a, b].T for a in range(2) for b in range(2)], axis=0
    ).astype(bf16)                                                    # (256, 128)
    b3c = jnp.tile(b3, 4).reshape(256, 1).astype(f32)

    # convT2 folded block-diagonally over the (a, b) parities of its input.
    w4s = w4.transpose(2, 3, 1, 0).reshape(12, 64)                    # (a2,b2,c) x cin
    w4bd = jnp.kron(jnp.eye(4, dtype=w4.dtype), w4s).astype(bf16)     # (48, 256)
    b4c = jnp.tile(b4, 16).reshape(48, 1).astype(f32)

    return (w1bd, b1c, w2t, b2c, w3t, b3c, w4bd, b4c)


# ---------------------------------------------------------------------------
# Host-side conv1 im2col: NCHW (N,3,16,16) -> (N//B, 128, 16*B) bf16.
# Rows = parity*(K=27 padded to 32) + k, with parity = (ho%2)*2 + (wo%2) and
# k = (cin, kh, kw).  Lanes = img_local*16 + (ho//2)*4 + (wo//2).
# TODO(synk): at large resolutions move this (Cin=3) im2col in-kernel too.
# ---------------------------------------------------------------------------
def _build_conv1_cols(x, lane_batch):
    n = x.shape[0]
    g = n // lane_batch
    x = x.astype(jnp.bfloat16)
    xp = jnp.pad(x, ((0, 0), (0, 0), (1, 1), (1, 1)))
    pats = [xp[:, :, kh:kh + 16:2, kw:kw + 16:2]
            for kh in range(3) for kw in range(3)]                    # 9x(N,3,8,8)
    cols = jnp.stack(pats, axis=2)                                    # (N,3,9,8,8)
    cols = cols.reshape(n, 3, 9, 4, 2, 4, 2)                          # ci,k9,bh,ph,bw,pw
    cols = cols.transpose(0, 4, 6, 1, 2, 3, 5)                        # n,ph,pw,ci,k9,bh,bw
    cols = cols.reshape(g, lane_batch, 4, 27, 16)
    cols = jnp.pad(cols, ((0, 0), (0, 0), (0, 0), (0, 5), (0, 0)))    # K 27 -> 32
    cols = cols.transpose(0, 2, 3, 1, 4)                              # g,parity,k,img,blk
    return cols.reshape(g, 128, 16 * lane_batch)


# ---------------------------------------------------------------------------
# Forward wrapper: cheap layout conversion, ONE pallas_call, conversion back.
# ---------------------------------------------------------------------------
@partial(jax.jit, static_argnames=("lane_batch",))
def autoencoder_forward(prep, x, lane_batch=LANE_BATCH):
    """x: (N, 3, 16, 16) NCHW float32 -> (N, 3, 16, 16) in [0, 1]."""
    n = x.shape[0]
    assert x.shape[1:] == (3, 16, 16), x.shape
    b = lane_batch
    g = -(-n // b)
    n_pad = g * b
    if n_pad != n:
        x = jnp.pad(x, ((0, n_pad - n), (0, 0), (0, 0), (0, 0)))
    nb = 16 * b

    xcols = _build_conv1_cols(x, b)                                   # (g, 128, nb)

    flops_per_step = nb * (2 * 256 * 128 + 4 * 2 * 128 * 256
                           + 2 * 256 * 128 + 2 * 48 * 256)
    weight_bytes = (256 * 128 + 4 * 128 * 256 + 256 * 128 + 48 * 256) * 2 \
        + (256 + 128 + 256 + 48) * 4
    cost = pl.CostEstimate(
        flops=g * flops_per_step,
        transcendentals=g * 48 * nb,
        bytes_accessed=g * (128 * nb * 2 + 48 * nb * 2) + weight_bytes)

    out = pl.pallas_call(
        _fused_autoencoder_kernel,
        out_shape=jax.ShapeDtypeStruct((g, 48, nb), jnp.bfloat16),
        grid=(g,),
        in_specs=[
            pl.BlockSpec((1, 128, nb), lambda i: (i, 0, 0)),   # per-step im2col slab
            pl.BlockSpec((256, 128), lambda i: (0, 0)),        # conv1 W (resident)
            pl.BlockSpec((256, 1), lambda i: (0, 0)),
            pl.BlockSpec((4, 128, 256), lambda i: (0, 0, 0)),  # conv2 tap Ws
            pl.BlockSpec((128, 1), lambda i: (0, 0)),
            pl.BlockSpec((256, 128), lambda i: (0, 0)),        # convT1 W
            pl.BlockSpec((256, 1), lambda i: (0, 0)),
            pl.BlockSpec((48, 256), lambda i: (0, 0)),         # convT2 W
            pl.BlockSpec((48, 1), lambda i: (0, 0)),
        ],
        out_specs=pl.BlockSpec((1, 48, nb), lambda i: (i, 0, 0)),
        compiler_params=pltpu.CompilerParams(
            dimension_semantics=("parallel",),   # v7x: shard steps over both TCs
        ),
        cost_estimate=cost,
    )(xcols, *prep)

    # Un-scramble the space-to-depth / lane-batched layout back to NCHW.
    # rows = (a, b, a2, b2, c); lanes = (img, bh, bw);
    # pixel (h, w) = (4*bh + 2*a + a2, 4*bw + 2*b + b2).
    o = out.reshape(g, 2, 2, 2, 2, 3, b, 4, 4)
    o = o.transpose(0, 6, 5, 7, 1, 3, 8, 2, 4)       # (g, img, c, bh, a, a2, bw, b, b2)
    o = o.reshape(n_pad, 3, 16, 16).astype(jnp.float32)
    return o[:n]


# ---------------------------------------------------------------------------
# Deterministic PyTorch-style parameter init.
# ---------------------------------------------------------------------------
def _init_conv(key, cout, cin, kh, kw):
    k1, k2 = jax.random.split(key)
    bound = 1.0 / jnp.sqrt(cin * kh * kw)
    w = jax.random.uniform(k1, (cout, cin, kh, kw), jnp.float32, -bound, bound)
    b = jax.random.uniform(k2, (cout,), jnp.float32, -bound, bound)
    return w, b


def _init_convT(key, cin, cout, kh, kw):
    k1, k2 = jax.random.split(key)
    bound = 1.0 / jnp.sqrt(cout * kh * kw)   # PyTorch uses weight.size(1)*k*k
    w = jax.random.uniform(k1, (cin, cout, kh, kw), jnp.float32, -bound, bound)
    b = jax.random.uniform(k2, (cout,), jnp.float32, -bound, bound)
    return w, b


def init_params(key):
    k1, k2, k3, k4 = jax.random.split(key, 4)
    return {
        "enc_conv1": _init_conv(k1, 64, 3, 3, 3),
        "enc_conv2": _init_conv(k2, 128, 64, 3, 3),
        "dec_conv1": _init_convT(k3, 128, 64, 2, 2),
        "dec_conv2": _init_convT(k4, 64, 3, 2, 2),
    }


# ---------------------------------------------------------------------------
# Pure-JAX f32 reference (eval semantics) for a tolerance check.
# ---------------------------------------------------------------------------
def _ref_conv(x, w, b, act):
    n, cin, h, wd = x.shape
    cout = w.shape[0]
    ho, wo = h // 2, wd // 2
    xp = jnp.pad(x, ((0, 0), (0, 0), (1, 1), (1, 1)))
    pats = [xp[:, :, kh:kh + 2 * ho:2, kw:kw + 2 * wo:2]
            for kh in range(3) for kw in range(3)]
    cols = jnp.stack(pats, axis=2)                                  # (n,cin,9,ho,wo)
    cols = cols.transpose(0, 3, 4, 1, 2).reshape(n * ho * wo, cin * 9)
    out = cols @ w.reshape(cout, cin * 9).T + b
    if act == "relu":
        out = jnp.maximum(out, 0.0)
    return out.reshape(n, ho, wo, cout).transpose(0, 3, 1, 2)


def _ref_convT(x, w, b, act):
    n, cin, h, wd = x.shape
    cout = w.shape[1]
    xf = x.transpose(0, 2, 3, 1).reshape(n * h * wd, cin)
    out = xf @ w.reshape(cin, cout * 4) + jnp.repeat(b, 4)
    out = jnp.maximum(out, 0.0) if act == "relu" else jax.nn.sigmoid(out)
    out = out.reshape(n, h, wd, cout, 2, 2).transpose(0, 3, 1, 4, 2, 5)
    return out.reshape(n, cout, 2 * h, 2 * wd)


def reference_forward(params, x):
    h = _ref_conv(x, *params["enc_conv1"], act="relu")
    h = _ref_conv(h, *params["enc_conv2"], act="relu")
    h = _ref_convT(h, *params["dec_conv1"], act="relu")
    return _ref_convT(h, *params["dec_conv2"], act="sigmoid")


if __name__ == "__main__":
    key = jax.random.PRNGKey(0)
    pkey, xkey = jax.random.split(key)
    params = init_params(pkey)
    prep = prepare_params(params)                      # one-time weight packing
    # 32 images: 2 grid steps of 16 lane-batched images (keeps both v7x TCs busy).
    x = jax.random.normal(xkey, (32, 3, 16, 16), dtype=jnp.float32)

    y = autoencoder_forward(prep, x)
    y = jax.block_until_ready(y)

    assert y.shape == (32, 3, 16, 16), y.shape
    assert bool(jnp.all(jnp.isfinite(y)))
    assert bool(jnp.all((y >= 0.0) & (y <= 1.0)))      # sigmoid output range

    # bf16-tolerance check against the pure-JAX f32 reference.
    y_ref = reference_forward(params, x)
    max_err = float(jnp.max(jnp.abs(y - y_ref)))
    assert max_err < 5e-2, f"max |kernel - reference| = {max_err}"

    print("KERNEL_OK")
</pallas_src>

<mosaic_0001>
module attributes {stable_mosaic.version = 11 : i64} {
  func.func @_fused_autoencoder_kernel(%arg0: i32, %arg1: memref<1x128x256xbf16, #tpu.memory_space<vmem>>, %arg2: memref<256x128xbf16, #tpu.memory_space<vmem>>, %arg3: memref<256x1xf32, #tpu.memory_space<vmem>>, %arg4: memref<4x128x256xbf16, #tpu.memory_space<vmem>>, %arg5: memref<128x1xf32, #tpu.memory_space<vmem>>, %arg6: memref<256x128xbf16, #tpu.memory_space<vmem>>, %arg7: memref<256x1xf32, #tpu.memory_space<vmem>>, %arg8: memref<48x256xbf16, #tpu.memory_space<vmem>>, %arg9: memref<48x1xf32, #tpu.memory_space<vmem>>, %arg10: memref<1x48x256xbf16, #tpu.memory_space<vmem>>) attributes {dimension_semantics = [#tpu.dimension_semantics<parallel>], iteration_bounds = array<i64: 2>, scalar_prefetch = 0 : i64, scratch_operands = 0 : i64, tpu.core_type = #tpu.core_type<tc>, window_params = [{transform_indices = @transform_0, window_bounds = array<i64: 1, 128, 256>}, {pipeline_mode = #tpu.pipeline_mode<synchronous>, transform_indices = @transform_1, window_bounds = array<i64: 256, 128>}, {pipeline_mode = #tpu.pipeline_mode<synchronous>, transform_indices = @transform_2, window_bounds = array<i64: 256, 1>}, {pipeline_mode = #tpu.pipeline_mode<synchronous>, transform_indices = @transform_3, window_bounds = array<i64: 4, 128, 256>}, {pipeline_mode = #tpu.pipeline_mode<synchronous>, transform_indices = @transform_4, window_bounds = array<i64: 128, 1>}, {pipeline_mode = #tpu.pipeline_mode<synchronous>, transform_indices = @transform_5, window_bounds = array<i64: 256, 128>}, {pipeline_mode = #tpu.pipeline_mode<synchronous>, transform_indices = @transform_6, window_bounds = array<i64: 256, 1>}, {pipeline_mode = #tpu.pipeline_mode<synchronous>, transform_indices = @transform_7, window_bounds = array<i64: 48, 256>}, {pipeline_mode = #tpu.pipeline_mode<synchronous>, transform_indices = @transform_8, window_bounds = array<i64: 48, 1>}, {transform_indices = @transform_9, window_bounds = array<i64: 1, 48, 256>}]} {
    %c0 = arith.constant 0 : index
    %c0_0 = arith.constant 0 : index
    %0 = vector.load %arg2[%c0, %c0_0] : memref<256x128xbf16, #tpu.memory_space<vmem>>, vector<256x128xbf16>
    %c0_1 = arith.constant 0 : index
    %c0_2 = arith.constant 0 : index
    %c0_3 = arith.constant 0 : index
    %1 = vector.load %arg1[%c0_1, %c0_2, %c0_3] : memref<1x128x256xbf16, #tpu.memory_space<vmem>>, vector<1x128x256xbf16>
    %2 = vector.shape_cast %1 : vector<1x128x256xbf16> to vector<128x256xbf16>
    %cst = arith.constant dense<0.000000e+00> : vector<256x256xf32>
    %3 = tpu.matmul %0, %2, %cst {dimension_numbers = #tpu.dot_dimension_numbers<[1], [0], [0], [1], [0, 0, 1, 1], [], []>} : vector<256x128xbf16>, vector<128x256xbf16>, vector<256x256xf32> -> vector<256x256xf32>
    %c0_4 = arith.constant 0 : index
    %c0_5 = arith.constant 0 : index
    %4 = vector.load %arg3[%c0_4, %c0_5] : memref<256x1xf32, #tpu.memory_space<vmem>>, vector<256x1xf32>
    %5 = vector.broadcast %4 : vector<256x1xf32> to vector<256x256xf32>
    %6 = arith.addf %3, %5 : vector<256x256xf32>
    %cst_6 = arith.constant 0.000000e+00 : f32
    %7 = vector.broadcast %cst_6 : f32 to vector<256x256xf32>
    %8 = arith.maximumf %6, %7 : vector<256x256xf32>
    %9 = tpu.iota {dimensions = array<i32: 1>} : vector<1x256xi32>
    %c16_i32 = arith.constant 16 : i32
    %c0_i32 = arith.constant 0 : i32
    %10 = arith.cmpi eq, %c16_i32, %c0_i32 : i32
    %c1_i32 = arith.constant 1 : i32
    %11 = arith.select %10, %c1_i32, %c16_i32 : i32
    %12 = vector.broadcast %11 : i32 to vector<1x256xi32>
    %13 = arith.remsi %9, %12 : vector<1x256xi32>
    %c0_i32_7 = arith.constant 0 : i32
    %14 = vector.broadcast %c0_i32_7 : i32 to vector<1x256xi32>
    %15 = arith.cmpi ne, %13, %14 : vector<1x256xi32>
    %c0_i32_8 = arith.constant 0 : i32
    %16 = vector.broadcast %c0_i32_8 : i32 to vector<1x256xi32>
    %17 = arith.cmpi slt, %13, %16 : vector<1x256xi32>
    %c0_i32_9 = arith.constant 0 : i32
    %18 = arith.cmpi slt, %11, %c0_i32_9 : i32
    %19 = vector.broadcast %18 : i1 to vector<1x256xi1>
    %20 = vector.broadcast %19 : vector<1x256xi1> to vector<1x256xi1>
    %21 = arith.xori %17, %20 : vector<1x256xi1>
    %22 = arith.andi %21, %15 : vector<1x256xi1>
    %23 = vector.broadcast %11 : i32 to vector<1x256xi32>
    %24 = arith.addi %13, %23 : vector<1x256xi32>
    %25 = arith.select %22, %24, %13 : vector<1x256xi1>, vector<1x256xi32>
    %c4_i32 = arith.constant 4 : i32
    %26 = vector.broadcast %c4_i32 : i32 to vector<1x256xi32>
    %27 = arith.cmpi sge, %25, %26 : vector<1x256xi32>
    %c4_i32_10 = arith.constant 4 : i32
    %c0_i32_11 = arith.constant 0 : i32
    %28 = arith.cmpi eq, %c4_i32_10, %c0_i32_11 : i32
    %c1_i32_12 = arith.constant 1 : i32
    %29 = arith.select %28, %c1_i32_12, %c4_i32_10 : i32
    %30 = vector.broadcast %29 : i32 to vector<1x256xi32>
    %31 = arith.remsi %9, %30 : vector<1x256xi32>
    %c0_i32_13 = arith.constant 0 : i32
    %32 = vector.broadcast %c0_i32_13 : i32 to vector<1x256xi32>
    %33 = arith.cmpi ne, %31, %32 : vector<1x256xi32>
    %c0_i32_14 = arith.constant 0 : i32
    %34 = vector.broadcast %c0_i32_14 : i32 to vector<1x256xi32>
    %35 = arith.cmpi slt, %31, %34 : vector<1x256xi32>
    %c0_i32_15 = arith.constant 0 : i32
    %36 = arith.cmpi slt, %29, %c0_i32_15 : i32
    %37 = vector.broadcast %36 : i1 to vector<1x256xi1>
    %38 = vector.broadcast %37 : vector<1x256xi1> to vector<1x256xi1>
    %39 = arith.xori %35, %38 : vector<1x256xi1>
    %40 = arith.andi %39, %33 : vector<1x256xi1>
    %41 = vector.broadcast %29 : i32 to vector<1x256xi32>
    %42 = arith.addi %31, %41 : vector<1x256xi32>
    %43 = arith.select %40, %42, %31 : vector<1x256xi1>, vector<1x256xi32>
    %c1_i32_16 = arith.constant 1 : i32
    %44 = vector.broadcast %c1_i32_16 : i32 to vector<1x256xi32>
    %45 = arith.cmpi sge, %43, %44 : vector<1x256xi32>
    %c3 = arith.constant 3 : index
    %c0_17 = arith.constant 0 : index
    %c0_18 = arith.constant 0 : index
    %46 = vector.load %arg4[%c3, %c0_17, %c0_18] : memref<4x128x256xbf16, #tpu.memory_space<vmem>>, vector<1x128x256xbf16>
    %47 = vector.shape_cast %46 : vector<1x128x256xbf16> to vector<128x256xbf16>
    %48 = arith.truncf %8 : vector<256x256xf32> to vector<256x256xbf16>
    %cst_19 = arith.constant dense<0.000000e+00> : vector<128x256xf32>
    %49 = tpu.matmul %47, %48, %cst_19 {dimension_numbers = #tpu.dot_dimension_numbers<[1], [0], [0], [1], [0, 0, 1, 1], [], []>} : vector<128x256xbf16>, vector<256x256xbf16>, vector<128x256xf32> -> vector<128x256xf32>
    %c2 = arith.constant 2 : index
    %c0_20 = arith.constant 0 : index
    %c0_21 = arith.constant 0 : index
    %50 = vector.load %arg4[%c2, %c0_20, %c0_21] : memref<4x128x256xbf16, #tpu.memory_space<vmem>>, vector<1x128x256xbf16>
    %51 = vector.shape_cast %50 : vector<1x128x256xbf16> to vector<128x256xbf16>
    %c1_i32_22 = arith.constant 1 : i32
    %52 = tpu.dynamic_rotate %8 by %c1_i32_22 dim 1 : vector<256x256xf32>, i32 -> vector<256x256xf32>
    %cst_23 = arith.constant 0.000000e+00 : f32
    %53 = vector.shape_cast %45 : vector<1x256xi1> to vector<1x256xi1>
    %54 = vector.broadcast %53 : vector<1x256xi1> to vector<256x256xi1>
    %55 = vector.broadcast %cst_23 : f32 to vector<256x256xf32>
    %56 = arith.select %54, %52, %55 : vector<256x256xi1>, vector<256x256xf32>
    %57 = arith.truncf %56 : vector<256x256xf32> to vector<256x256xbf16>
    %cst_24 = arith.constant dense<0.000000e+00> : vector<128x256xf32>
    %58 = tpu.matmul %51, %57, %cst_24 {dimension_numbers = #tpu.dot_dimension_numbers<[1], [0], [0], [1], [0, 0, 1, 1], [], []>} : vector<128x256xbf16>, vector<256x256xbf16>, vector<128x256xf32> -> vector<128x256xf32>
    %59 = arith.addf %49, %58 : vector<128x256xf32>
    %c1 = arith.constant 1 : index
    %c0_25 = arith.constant 0 : index
    %c0_26 = arith.constant 0 : index
    %60 = vector.load %arg4[%c1, %c0_25, %c0_26] : memref<4x128x256xbf16, #tpu.memory_space<vmem>>, vector<1x128x256xbf16>
    %61 = vector.shape_cast %60 : vector<1x128x256xbf16> to vector<128x256xbf16>
    %c4_i32_27 = arith.constant 4 : i32
    %62 = tpu.dynamic_rotate %8 by %c4_i32_27 dim 1 : vector<256x256xf32>, i32 -> vector<256x256xf32>
    %cst_28 = arith.constant 0.000000e+00 : f32
    %63 = vector.shape_cast %27 : vector<1x256xi1> to vector<1x256xi1>
    %64 = vector.broadcast %63 : vector<1x256xi1> to vector<256x256xi1>
    %65 = vector.broadcast %cst_28 : f32 to vector<256x256xf32>
    %66 = arith.select %64, %62, %65 : vector<256x256xi1>, vector<256x256xf32>
    %67 = arith.truncf %66 : vector<256x256xf32> to vector<256x256xbf16>
    %cst_29 = arith.constant dense<0.000000e+00> : vector<128x256xf32>
    %68 = tpu.matmul %61, %67, %cst_29 {dimension_numbers = #tpu.dot_dimension_numbers<[1], [0], [0], [1], [0, 0, 1, 1], [], []>} : vector<128x256xbf16>, vector<256x256xbf16>, vector<128x256xf32> -> vector<128x256xf32>
    %69 = arith.addf %59, %68 : vector<128x256xf32>
    %c0_30 = arith.constant 0 : index
    %c0_31 = arith.constant 0 : index
    %c0_32 = arith.constant 0 : index
    %70 = vector.load %arg4[%c0_30, %c0_31, %c0_32] : memref<4x128x256xbf16, #tpu.memory_space<vmem>>, vector<1x128x256xbf16>
    %71 = vector.shape_cast %70 : vector<1x128x256xbf16> to vector<128x256xbf16>
    %72 = arith.andi %27, %45 : vector<1x256xi1>
    %c5_i32 = arith.constant 5 : i32
    %73 = tpu.dynamic_rotate %8 by %c5_i32 dim 1 : vector<256x256xf32>, i32 -> vector<256x256xf32>
    %cst_33 = arith.constant 0.000000e+00 : f32
    %74 = vector.shape_cast %72 : vector<1x256xi1> to vector<1x256xi1>
    %75 = vector.broadcast %74 : vector<1x256xi1> to vector<256x256xi1>
    %76 = vector.broadcast %cst_33 : f32 to vector<256x256xf32>
    %77 = arith.select %75, %73, %76 : vector<256x256xi1>, vector<256x256xf32>
    %78 = arith.truncf %77 : vector<256x256xf32> to vector<256x256xbf16>
    %cst_34 = arith.constant dense<0.000000e+00> : vector<128x256xf32>
    %79 = tpu.matmul %71, %78, %cst_34 {dimension_numbers = #tpu.dot_dimension_numbers<[1], [0], [0], [1], [0, 0, 1, 1], [], []>} : vector<128x256xbf16>, vector<256x256xbf16>, vector<128x256xf32> -> vector<128x256xf32>
    %80 = arith.addf %69, %79 : vector<128x256xf32>
    %c0_35 = arith.constant 0 : index
    %c0_36 = arith.constant 0 : index
    %81 = vector.load %arg5[%c0_35, %c0_36] : memref<128x1xf32, #tpu.memory_space<vmem>>, vector<128x1xf32>
    %82 = vector.broadcast %81 : vector<128x1xf32> to vector<128x256xf32>
    %83 = arith.addf %80, %82 : vector<128x256xf32>
    %cst_37 = arith.constant 0.000000e+00 : f32
    %84 = vector.broadcast %cst_37 : f32 to vector<128x256xf32>
    %85 = arith.maximumf %83, %84 : vector<128x256xf32>
    %86 = arith.truncf %85 : vector<128x256xf32> to vector<128x256xbf16>
    %c0_38 = arith.constant 0 : index
    %c0_39 = arith.constant 0 : index
    %87 = vector.load %arg6[%c0_38, %c0_39] : memref<256x128xbf16, #tpu.memory_space<vmem>>, vector<256x128xbf16>
    %cst_40 = arith.constant dense<0.000000e+00> : vector<256x256xf32>
    %88 = tpu.matmul %87, %86, %cst_40 {dimension_numbers = #tpu.dot_dimension_numbers<[1], [0], [0], [1], [0, 0, 1, 1], [], []>} : vector<256x128xbf16>, vector<128x256xbf16>, vector<256x256xf32> -> vector<256x256xf32>
    %c0_41 = arith.constant 0 : index
    %c0_42 = arith.constant 0 : index
    %89 = vector.load %arg7[%c0_41, %c0_42] : memref<256x1xf32, #tpu.memory_space<vmem>>, vector<256x1xf32>
    %90 = vector.broadcast %89 : vector<256x1xf32> to vector<256x256xf32>
    %91 = arith.addf %88, %90 : vector<256x256xf32>
    %cst_43 = arith.constant 0.000000e+00 : f32
    %92 = vector.broadcast %cst_43 : f32 to vector<256x256xf32>
    %93 = arith.maximumf %91, %92 : vector<256x256xf32>
    %94 = arith.truncf %93 : vector<256x256xf32> to vector<256x256xbf16>
    %c0_44 = arith.constant 0 : index
    %c0_45 = arith.constant 0 : index
    %95 = vector.load %arg8[%c0_44, %c0_45] : memref<48x256xbf16, #tpu.memory_space<vmem>>, vector<48x256xbf16>
    %cst_46 = arith.constant dense<0.000000e+00> : vector<48x256xf32>
    %96 = tpu.matmul %95, %94, %cst_46 {dimension_numbers = #tpu.dot_dimension_numbers<[1], [0], [0], [1], [0, 0, 1, 1], [], []>} : vector<48x256xbf16>, vector<256x256xbf16>, vector<48x256xf32> -> vector<48x256xf32>
    %c0_47 = arith.constant 0 : index
    %c0_48 = arith.constant 0 : index
    %97 = vector.load %arg9[%c0_47, %c0_48] : memref<48x1xf32, #tpu.memory_space<vmem>>, vector<48x1xf32>
    %98 = vector.broadcast %97 : vector<48x1xf32> to vector<48x256xf32>
    %99 = arith.addf %96, %98 : vector<48x256xf32>
    %100 = arith.negf %99 : vector<48x256xf32>
    %101 = math.exp %100 : vector<48x256xf32>
    %cst_49 = arith.constant 1.000000e+00 : f32
    %102 = vector.broadcast %cst_49 : f32 to vector<48x256xf32>
    %103 = arith.addf %102, %101 : vector<48x256xf32>
    %104 = arith.divf %102, %103 : vector<48x256xf32>
    %105 = arith.truncf %104 : vector<48x256xf32> to vector<48x256xbf16>
    %c0_50 = arith.constant 0 : index
    %c0_51 = arith.constant 0 : index
    %c0_52 = arith.constant 0 : index
    %106 = vector.load %arg10[%c0_50, %c0_51, %c0_52] : memref<1x48x256xbf16, #tpu.memory_space<vmem>>, vector<1x48x256xbf16>
    %107 = vector.shape_cast %106 : vector<1x48x256xbf16> to vector<48x256xbf16>
    %108 = vector.shape_cast %105 : vector<48x256xbf16> to vector<1x48x256xbf16>
    tpu.vector_store %arg10[%c0_50, %c0_51, %c0_52], %108 {strides = array<i32>} : memref<1x48x256xbf16, #tpu.memory_space<vmem>>, vector<1x48x256xbf16>,
    return
  }
  func.func @transform_0(%arg0: i32) -> (i32, i32, i32) {
    %c0_i32 = arith.constant 0 : i32
    %c0_i32_0 = arith.constant 0 : i32
    %c0_i32_1 = arith.constant 0 : i32
    return %arg0, %c0_i32, %c0_i32_0 : i32, i32, i32
  }
  func.func @transform_1(%arg0: i32) -> (i32, i32) {
    %c0_i32 = arith.constant 0 : i32
    %c0_i32_0 = arith.constant 0 : i32
    %c0_i32_1 = arith.constant 0 : i32
    return %c0_i32, %c0_i32_0 : i32, i32
  }
  func.func @transform_2(%arg0: i32) -> (i32, i32) {
    %c0_i32 = arith.constant 0 : i32
    %c0_i32_0 = arith.constant 0 : i32
    %c0_i32_1 = arith.constant 0 : i32
    return %c0_i32, %c0_i32_0 : i32, i32
  }
  func.func @transform_3(%arg0: i32) -> (i32, i32, i32) {
    %c0_i32 = arith.constant 0 : i32
    %c0_i32_0 = arith.constant 0 : i32
    %c0_i32_1 = arith.constant 0 : i32
    %c0_i32_2 = arith.constant 0 : i32
    return %c0_i32, %c0_i32_0, %c0_i32_1 : i32, i32, i32
  }
  func.func @transform_4(%arg0: i32) -> (i32, i32) {
    %c0_i32 = arith.constant 0 : i32
    %c0_i32_0 = arith.constant 0 : i32
    %c0_i32_1 = arith.constant 0 : i32
    return %c0_i32, %c0_i32_0 : i32, i32
  }
  func.func @transform_5(%arg0: i32) -> (i32, i32) {
    %c0_i32 = arith.constant 0 : i32
    %c0_i32_0 = arith.constant 0 : i32
    %c0_i32_1 = arith.constant 0 : i32
    return %c0_i32, %c0_i32_0 : i32, i32
  }
  func.func @transform_6(%arg0: i32) -> (i32, i32) {
    %c0_i32 = arith.constant 0 : i32
    %c0_i32_0 = arith.constant 0 : i32
    %c0_i32_1 = arith.constant 0 : i32
    return %c0_i32, %c0_i32_0 : i32, i32
  }
  func.func @transform_7(%arg0: i32) -> (i32, i32) {
    %c0_i32 = arith.constant 0 : i32
    %c0_i32_0 = arith.constant 0 : i32
    %c0_i32_1 = arith.constant 0 : i32
    return %c0_i32, %c0_i32_0 : i32, i32
  }
  func.func @transform_8(%arg0: i32) -> (i32, i32) {
    %c0_i32 = arith.constant 0 : i32
    %c0_i32_0 = arith.constant 0 : i32
    %c0_i32_1 = arith.constant 0 : i32
    return %c0_i32, %c0_i32_0 : i32, i32
  }
  func.func @transform_9(%arg0: i32) -> (i32, i32, i32) {
    %c0_i32 = arith.constant 0 : i32
    %c0_i32_0 = arith.constant 0 : i32
    %c0_i32_1 = arith.constant 0 : i32
    return %arg0, %c0_i32, %c0_i32_0 : i32, i32, i32
  }
}

</mosaic_0001>

<bundles_post_ra>
// kernel: autoencoder_forward.1
= control target key start
LH: loop header
LB: loop body
LE: loop exit
PB: predicated region body
PF: predicated region fallthrough
CT: control target
= control target key end

     0   :  { %s5270_s30 = smov 0   ;;  %s8020_s0 = inlined_call_operand.vmem [shape: bf16[2,128,256], index: 0, kind: input, shape index: {}]   ;;  %s8021_s1 = inlined_call_operand.vmem [shape: bf16[256,128], index: 1, kind: input, shape index: {}]   ;;  %s8022_s2 = inlined_call_operand.vmem [shape: f32[256,1], index: 2, kind: input, shape index: {}]   ;;  %s8023_s3 = inlined_call_operand.vmem [shape: bf16[4,128,256], index: 3, kind: input, shape index: {}]   ;;  %s8024_s4 = inlined_call_operand.vmem [shape: f32[128,1], index: 4, kind: input, shape index: {}]   ;;  %s8025_s5 = inlined_call_operand.vmem [shape: bf16[256,128], index: 5, kind: input, shape index: {}]   ;;  %s8026_s6 = inlined_call_operand.vmem [shape: f32[256,1], index: 6, kind: input, shape index: {}]   ;;  %s8027_s7 = inlined_call_operand.vmem [shape: bf16[48,256], index: 7, kind: input, shape index: {}]   ;;  %s8028_s8 = inlined_call_operand.vmem [shape: f32[48,1], index: 8, kind: input, shape index: {}]   ;;  %s8029_s9 = inlined_call_operand.vmem [shape: bf16[2,48,256], index: 9, kind: output, shape index: {}]  }
   0x1 LB: > { %s3967_s10 = sadd.s32 4294967295, %s5214_s30   ;;  %p3971_p0 = scmp.ge.s32.totalorder %s5214_s30, 1  ;;  %s5214_s30 = sphi %s5270_s30, %s19_s30  }
   0x2   : > { %p287_p1 = scmp.lt.s32.totalorder %s5214_s30, 3 }
   0x4   : > { %p288_p2 = pnand %p3971_p0, %p287_p1 }
   0x6   : > { %291 = sbr.rel (%p288_p2) target bundleno = 1525 (0x5f5), region = 56 }
   0xb   : > { %p323_p3 = scmp.lt.s32.totalorder %s3967_s10, 1  ;;  %v8030_v0 = vmov 0   ;;  %v396_v13 = vld [vmem:[%s8022_s2 + $0x70] sm:$0xff]  ;;  %v394_v14 = vld [vmem:[%s8022_s2 + $0x60] sm:$0xff]  ;;  %v397_v15 = vld [vmem:[%s8022_s2 + $0x78] sm:$0xff]  ;;  %s5218_s19 = smov 4  }
   0xc   : > { %782 = vmatprep.mubr.bf16.mxu0 %v8030_v0  ;;  %862 = vmatprep.mubr.bf16.mxu1 %v8030_v0  ;;  %v395_v16 = vld [vmem:[%s8022_s2 + $0x68] sm:$0xff]  ;;  %v393_v19 = vld [vmem:[%s8022_s2 + $0x58] sm:$0xff]  ;;  %v392_v20 = vld [vmem:[%s8022_s2 + $0x50] sm:$0xff]  ;;  %s5219_s20 = smov 5  }
   0xd   : > { %s8212_s10 = smov (!%p323_p3, %s3967_s10), 1  ;;  %4518 = vset.pattern.permute.xlu1 %v8030_v0  ;;  %4517 = vset.pattern.permute.xlu0 %v8030_v0  ;;  %v391_v23 = vld [vmem:[%s8022_s2 + $0x48] sm:$0xff]  ;;  %v390_v24 = vld [vmem:[%s8022_s2 + $0x40] sm:$0xff]  ;;  %v389_v27 = vld [vmem:[%s8022_s2 + $0x38] sm:$0xff] }
   0xe   : > { %s4449_s11 = sshll.u32 %s8212_s10, 7  ;;  %486 = vperm.xlu0 %4517, %v396_v13   ;;  %476 = vperm.xlu1 %4518, %v394_v14   ;;  %v5023_v25 = vld [vmem:[%s8021_s1] sm:$0xff]   ;;  %v388_v28 = vld [vmem:[%s8022_s2 + $0x30] sm:$0xff]  ;;  %v387_v29 = vld [vmem:[%s8022_s2 + $0x28] sm:$0xff]  ;;  %s4504_s15 = smul.u32 48, %s8212_s10 }
   0xf   : > { %s5288_s14 = scalar_lea.vmem %s8020_s0, %s4449_s11  ;;  %v5024_v26 = vld [vmem:[%s8021_s1 + $0x40] sm:$0xff]   ;;  %v5025_v31 = vld [vmem:[%s8021_s1 + $0x8] sm:$0xff]   ;;  %v385_v33 = vld [vmem:[%s8022_s2 + $0x18] sm:$0xff] }
  0x10   : > { %v4999_v1 = vld [vmem:[%s5288_s14 + $0x74] ss:$8 sps:$4 sm:$0xff]   ;;  %v5001_v2 = vld [vmem:[%s5288_s14 + $0x70] ss:$8 sps:$4 sm:$0xff]   ;;  %v5002_v3 = vld [vmem:[%s5288_s14 + $0x64] ss:$8 sps:$4 sm:$0xff]   ;;  %s332_s17 = scalar_lea.vmem %s8029_s9, %s4504_s15 }
  0x11   : > { %750 = vmatprep.subr.bf16.mxu0 %v4999_v1  ;;  %4456 = vmatprep.subr.bf16.mxu1 %v4999_v1  ;;  %v5004_v4 = vld [vmem:[%s5288_s14 + $0x60] ss:$8 sps:$4 sm:$0xff]   ;;  %v5005_v5 = vld [vmem:[%s5288_s14 + $0x54] ss:$8 sps:$4 sm:$0xff]   ;;  %v5007_v6 = vld [vmem:[%s5288_s14 + $0x50] ss:$8 sps:$4 sm:$0xff]  }
  0x12   : > { %751 = vmatpush1.bf16.msra.mxu0 %v5001_v2  ;;  %4464 = vmatpush1.bf16.msra.mxu1 %v5001_v2  ;;  %v5008_v7 = vld [vmem:[%s5288_s14 + $0x44] ss:$8 sps:$4 sm:$0xff]   ;;  %v5010_v8 = vld [vmem:[%s5288_s14 + $0x40] ss:$8 sps:$4 sm:$0xff]   ;;  %v5011_v9 = vld [vmem:[%s5288_s14 + $0x34] ss:$8 sps:$4 sm:$0xff]  }
  0x13   : > { %752 = vmatprep.subr.bf16.mxu0 %v5002_v3  ;;  %4457 = vmatprep.subr.bf16.mxu1 %v5002_v3  ;;  %v5013_v10 = vld [vmem:[%s5288_s14 + $0x30] ss:$8 sps:$4 sm:$0xff]   ;;  %v5014_v11 = vld [vmem:[%s5288_s14 + $0x24] ss:$8 sps:$4 sm:$0xff]   ;;  %v5016_v12 = vld [vmem:[%s5288_s14 + $0x20] ss:$8 sps:$4 sm:$0xff]  }
  0x14   : > { %v5017_v17 = vld [vmem:[%s5288_s14 + $0x14] ss:$8 sps:$4 sm:$0xff]   ;;  %v5019_v18 = vld [vmem:[%s5288_s14 + $0x10] ss:$8 sps:$4 sm:$0xff]   ;;  %491 = vperm.xlu0 %4517, %v397_v15   ;;  %481 = vperm.xlu1 %4518, %v395_v16   ;;  %v5020_v21 = vld [vmem:[%s5288_s14 + $0x4] ss:$8 sps:$4 sm:$0xff]  }
  0x15   : > { %v5022_v22 = vld [vmem:[%s5288_s14] ss:$8 sps:$4 sm:$0xff]   ;;  %v384_v34 = vld [vmem:[%s8022_s2 + $0x10] sm:$0xff]  ;;  %v413_v39 = vld [vmem:[%s8022_s2 + $0xf8] sm:$0xff]  ;;  %s5217_s14 = smov 1  }
  0x16   : > { %753 = vmatpush1.bf16.msra.mxu0 %v5004_v4  ;;  %4465 = vmatpush1.bf16.msra.mxu1 %v5004_v4  ;;  %v386_v30 = vld [vmem:[%s8022_s2 + $0x20] sm:$0xff]  ;;  %v5026_v32 = vld [vmem:[%s8021_s1 + $0x48] sm:$0xff]   ;;  %v5027_v37 = vld [vmem:[%s8021_s1 + $0x10] sm:$0xff]  }
  0x17   : > { %754 = vmatprep.subr.bf16.mxu0 %v5005_v5  ;;  %4458 = vmatprep.subr.bf16.mxu1 %v5005_v5  ;;  %v383_v35 = vld [vmem:[%s8022_s2 + $0x8] sm:$0xff]  ;;  %v382_v36 = vld [vmem:[%s8022_s2] sm:$0xff]  ;;  %v5028_v38 = vld [vmem:[%s8021_s1 + $0x50] sm:$0xff]  }
  0x18   : > { %471 = vperm.xlu1 %4518, %v393_v19   ;;  %466 = vperm.xlu0 %4517, %v392_v20   ;;  %v412_v40 = vld [vmem:[%s8022_s2 + $0xf0] sm:$0xff]  ;;  %v411_v41 = vld [vmem:[%s8022_s2 + $0xe8] sm:$0xff]  ;;  %v410_v42 = vld [vmem:[%s8022_s2 + $0xe0] sm:$0xff] }
  0x19   : > { %v5029_v43 = vld [vmem:[%s8021_s1 + $0x18] sm:$0xff]   ;;  %v408_v46 = vld [vmem:[%s8022_s2 + $0xd0] sm:$0xff]  ;;  %v407_v47 = vld [vmem:[%s8022_s2 + $0xc8] sm:$0xff] }
  0x1a   : > { %755 = vmatpush1.bf16.msra.mxu0 %v5007_v6  ;;  %4466 = vmatpush1.bf16.msra.mxu1 %v5007_v6  ;;  %v5030_v44 = vld [vmem:[%s8021_s1 + $0x58] sm:$0xff]   ;;  %v406_v48 = vld [vmem:[%s8022_s2 + $0xc0] sm:$0xff]  ;;  %v404_v52 = vld [vmem:[%s8022_s2 + $0xb0] sm:$0xff] }
  0x1b   : > { %756 = vmatprep.subr.bf16.mxu0 %v5008_v7  ;;  %4459 = vmatprep.subr.bf16.mxu1 %v5008_v7  ;;  %v409_v45 = vld [vmem:[%s8022_s2 + $0xd8] sm:$0xff]  ;;  %v5031_v49 = vld [vmem:[%s8021_s1 + $0x20] sm:$0xff]   ;;  %v403_v53 = vld [vmem:[%s8022_s2 + $0xa8] sm:$0xff] }
  0x1c   : > { %461 = vperm.xlu1 %4518, %v391_v23   ;;  %456 = vperm.xlu0 %4517, %v390_v24   ;;  %v5032_v50 = vld [vmem:[%s8021_s1 + $0x60] sm:$0xff]   ;;  %v405_v51 = vld [vmem:[%s8022_s2 + $0xb8] sm:$0xff]  ;;  %v5033_v55 = vld [vmem:[%s8021_s1 + $0x28] sm:$0xff]  }
  0x1d   : > { %v402_v54 = vld [vmem:[%s8022_s2 + $0xa0] sm:$0xff]  ;;  %v5034_v56 = vld [vmem:[%s8021_s1 + $0x68] sm:$0xff]   ;;  %v401_v57 = vld [vmem:[%s8022_s2 + $0x98] sm:$0xff] }
  0x1e   : > { %757 = vmatpush1.bf16.msra.mxu0 %v5010_v8  ;;  %4467 = vmatpush1.bf16.msra.mxu1 %v5010_v8  ;;  %v400_v58 = vld [vmem:[%s8022_s2 + $0x90] sm:$0xff]  ;;  %v399_v59 = vld [vmem:[%s8022_s2 + $0x88] sm:$0xff]  ;;  %v398_v60 = vld [vmem:[%s8022_s2 + $0x80] sm:$0xff] }
  0x1f   : > { %758 = vmatprep.subr.bf16.mxu0 %v5011_v9  ;;  %4460 = vmatprep.subr.bf16.mxu1 %v5011_v9  ;;  %v5035_v61 = vld [vmem:[%s8021_s1 + $0x30] sm:$0xff]   ;;  %v5037_v63 = vld [vmem:[%s8021_s1 + $0x38] sm:$0xff]  }
  0x20   : > { %451 = vperm.xlu1 %4518, %v389_v27   ;;  %446 = vperm.xlu0 %4517, %v388_v28   ;;  %v5036_v62 = vld [vmem:[%s8021_s1 + $0x70] sm:$0xff]   ;;  %v5038_v1 = vld [vmem:[%s8021_s1 + $0x78] sm:$0xff]  }
  0x22   : > { %759 = vmatpush1.bf16.msra.mxu0 %v5013_v10  ;;  %4468 = vmatpush1.bf16.msra.mxu1 %v5013_v10 }
  0x23   : > { %760 = vmatprep.subr.bf16.mxu0 %v5014_v11  ;;  %4461 = vmatprep.subr.bf16.mxu1 %v5014_v11 }
  0x24   : > { %441 = vperm.xlu1 %4518, %v387_v29   ;;  %436 = vperm.xlu0 %4517, %v386_v30  }
  0x26   : > { %761 = vmatpush1.bf16.msra.mxu0 %v5016_v12  ;;  %4469 = vmatpush1.bf16.msra.mxu1 %v5016_v12 }
  0x27   : > { %762 = vmatprep.subr.bf16.mxu0 %v5017_v17  ;;  %4462 = vmatprep.subr.bf16.mxu1 %v5017_v17 }
  0x28   : > { %431 = vperm.xlu1 %4518, %v385_v33   ;;  %426 = vperm.xlu0 %4517, %v384_v34  }
  0x2a   : > { %763 = vmatpush1.bf16.msra.mxu0 %v5019_v18  ;;  %4470 = vmatpush1.bf16.msra.mxu1 %v5019_v18 }
  0x2b   : > { %764 = vmatprep.subr.bf16.mxu0 %v5020_v21  ;;  %4463 = vmatprep.subr.bf16.mxu1 %v5020_v21 }
  0x2c   : > { %421 = vperm.xlu1 %4518, %v383_v35   ;;  %416 = vperm.xlu0 %4517, %v382_v36  }
  0x2e   : > { %765 = vmatpush1.bf16.msra.mxu0 %v5022_v22  ;;  %4471 = vmatpush1.bf16.msra.mxu1 %v5022_v22 }
  0x30   : > { %571 = vperm.xlu1 %4518, %v413_v39   ;;  %566 = vperm.xlu0 %4517, %v412_v40  }
  0x31   : > { %783 = vmatmul.mubr.bf16.vlgmr.msra.gmra.mxu0 %v5023_v25  ;;  %863 = vmatmul.mubr.bf16.vlgmr.msra.gmra.mxu1 %v5024_v26 }
  0x32   : > { %792 = vmatprep.mubr.bf16.mxu0 %v8030_v0  ;;  %872 = vmatprep.mubr.bf16.mxu1 %v8030_v0 }
  0x34   : > { %561 = vperm.xlu1 %4518, %v411_v41   ;;  %556 = vperm.xlu0 %4517, %v410_v42  }
  0x38   : > { %551 = vperm.xlu1 %4518, %v409_v45   ;;  %546 = vperm.xlu0 %4517, %v408_v46  }
  0x39   : > { %793 = vmatmul.mubr.bf16.gmra.mxu0 %v5025_v31  ;;  %873 = vmatmul.mubr.bf16.gmra.mxu1 %v5026_v32 }
  0x3a   : > { %802 = vmatprep.mubr.bf16.mxu0 %v8030_v0  ;;  %882 = vmatprep.mubr.bf16.mxu1 %v8030_v0 }
  0x3c   : > { %541 = vperm.xlu1 %4518, %v407_v47   ;;  %536 = vperm.xlu0 %4517, %v406_v48  }
  0x40   : > { %531 = vperm.xlu1 %4518, %v405_v51   ;;  %526 = vperm.xlu0 %4517, %v404_v52  }
  0x41   : > { %803 = vmatmul.mubr.bf16.gmra.mxu0 %v5027_v37  ;;  %883 = vmatmul.mubr.bf16.gmra.mxu1 %v5028_v38 }
  0x42   : > { %812 = vmatprep.mubr.bf16.mxu0 %v8030_v0  ;;  %892 = vmatprep.mubr.bf16.mxu1 %v8030_v0 }
  0x44   : > { %521 = vperm.xlu1 %4518, %v403_v53   ;;  %516 = vperm.xlu0 %4517, %v402_v54  }
  0x48   : > { %511 = vperm.xlu1 %4518, %v401_v57   ;;  %506 = vperm.xlu0 %4517, %v400_v58  }
  0x49   : > { %813 = vmatmul.mubr.bf16.gmra.mxu0 %v5029_v43  ;;  %893 = vmatmul.mubr.bf16.gmra.mxu1 %v5030_v44 }
  0x4a   : > { %822 = vmatprep.mubr.bf16.mxu0 %v8030_v0  ;;  %902 = vmatprep.mubr.bf16.mxu1 %v8030_v0 }
  0x4c   : > { %501 = vperm.xlu1 %4518, %v399_v59   ;;  %496 = vperm.xlu0 %4517, %v398_v60  }
  0x51   : > { %823 = vmatmul.mubr.bf16.gmra.mxu0 %v5031_v49  ;;  %903 = vmatmul.mubr.bf16.gmra.mxu1 %v5032_v50 }
  0x52   : > { %832 = vmatprep.mubr.bf16.mxu0 %v8030_v0  ;;  %912 = vmatprep.mubr.bf16.mxu1 %v8030_v0 }
  0x59   : > { %833 = vmatmul.mubr.bf16.gmra.mxu0 %v5033_v55  ;;  %913 = vmatmul.mubr.bf16.gmra.mxu1 %v5034_v56 }
  0x5a   : > { %842 = vmatprep.mubr.bf16.mxu0 %v8030_v0  ;;  %922 = vmatprep.mubr.bf16.mxu1 %v8030_v0 }
  0x61   : > { %843 = vmatmul.mubr.bf16.gmra.mxu0 %v5035_v61  ;;  %923 = vmatmul.mubr.bf16.gmra.mxu1 %v5036_v62 }
  0x62   : > { %852 = vmatprep.mubr.bf16.mxu0 %v8030_v0  ;;  %932 = vmatprep.mubr.bf16.mxu1 %v8030_v0 }
  0x69   : > { %853 = vmatmul.mubr.bf16.gmra.mxu0 %v5037_v63  ;;  %933 = vmatmul.mubr.bf16.gmra.mxu1 %v5038_v1 }
  0x89   : > { %v5464_v2 = vpop.permute.xlu0 %486  ;;  %v5466_v3 = vpop.permute.xlu1 %476 }
  0x8f   : > { %v5468_v4 = vpop.permute.xlu0 %491  ;;  %v5470_v5 = vpop.permute.xlu1 %481 }
  0x93   : > { %v5472_v6 = vpop.permute.xlu1 %471  ;;  %v5474_v7 = vpop.permute.xlu0 %466 }
  0x97   : > { %v5476_v8 = vpop.permute.xlu0 %456  ;;  %v5478_v9 = vpop.permute.xlu1 %461 }
  0x9b   : > { %v5480_v10 = vpop.permute.xlu0 %446  ;;  %v5482_v11 = vpop.permute.xlu1 %451 }
  0x9f   : > { %v5484_v12 = vpop.permute.xlu0 %436  ;;  %v5486_v13 = vpop.permute.xlu1 %441 }
  0xa3   : > { %v427_v14 = vpop.permute.xlu0 %426  ;;  %v5488_v15 = vpop.permute.xlu1 %431 }
  0xa7   : > { %v417_v16 = vpop.permute.xlu0 %416  ;;  %v422_v17 = vpop.permute.xlu1 %421 }
  0xab   : > { %v5490_v18 = vpop.permute.xlu0 %566  ;;  %v5492_v19 = vpop.permute.xlu1 %571 }
  0xaf   : > { %v5494_v20 = vpop.permute.xlu0 %556  ;;  %v5496_v21 = vpop.permute.xlu1 %561 }
  0xb3   : > { %v5498_v22 = vpop.permute.xlu0 %546  ;;  %v5500_v23 = vpop.permute.xlu1 %551 }
  0xb7   : > { %v5502_v24 = vpop.permute.xlu0 %536  ;;  %v5504_v25 = vpop.permute.xlu1 %541 }
  0xbb   : > { %v5506_v26 = vpop.permute.xlu0 %526  ;;  %v5508_v27 = vpop.permute.xlu1 %531 }
  0xbf   : > { %v5510_v28 = vpop.permute.xlu0 %516  ;;  %v5512_v29 = vpop.permute.xlu1 %521 }
  0xc3   : > { %v507_v30 = vpop.permute.xlu0 %506  ;;  %v512_v31 = vpop.permute.xlu1 %511 }
  0xc7   : > { %v497_v32 = vpop.permute.xlu0 %496  ;;  %v502_v35 = vpop.permute.xlu1 %501 }
  0xf1   : > { %v784_v33 = vpop.f32.mrf.mxu0  ;;  %v864_v34 = vpop.f32.mrf.mxu1 }
  0xf2   : > { %v865_v38 = vadd.f32 %v864_v34, %v497_v32  ;;  %v785_v39 = vadd.f32 %v784_v33, %v417_v16 }
  0xf3   : > { %v786_v36 = vpop.f32.mrf.mxu0  ;;  %v866_v37 = vpop.f32.mrf.mxu1 }
  0xf4   : > { %v787_v40 = vadd.f32 %v786_v36, %v417_v16  ;;  %v867_v43 = vadd.f32 %v866_v37, %v497_v32  ;;  %v975_v48 = vmax.f32 %v865_v38, 0.0  ;;  %v943_v53 = vmax.f32 %v785_v39, 0.0 }
  0xf5   : > { %v788_v41 = vpop.f32.mrf.mxu0  ;;  %v868_v42 = vpop.f32.mrf.mxu1 }
  0xf6   : > { %v789_v44 = vadd.f32 %v788_v41, %v422_v17  ;;  %v869_v45 = vadd.f32 %v868_v42, %v502_v35  ;;  %v944_v54 = vmax.f32 %v787_v40, 0.0  ;;  %v976_v57 = vmax.f32 %v867_v43, 0.0 }
  0xf7   : > { %v790_v46 = vpop.f32.mrf.mxu0  ;;  %v870_v47 = vpop.f32.mrf.mxu1 }
  0xf8   : > { %v945_v49 = vmax.f32 %v789_v44, 0.0  ;;  %v791_v50 = vadd.f32 %v790_v46, %v422_v17  ;;  %v871_v51 = vadd.f32 %v870_v47, %v502_v35  ;;  %v977_v52 = vmax.f32 %v869_v45, 0.0 }
  0xf9   : > { %v794_v55 = vpop.f32.mrf.mxu0  ;;  %v874_v56 = vpop.f32.mrf.mxu1 }
  0xfa   : > { %v946_v58 = vmax.f32 %v791_v50, 0.0  ;;  %v795_v59 = vadd.f32 %v794_v55, %v427_v14  ;;  %v875_v60 = vadd.f32 %v874_v56, %v507_v30  ;;  %v978_v61 = vmax.f32 %v871_v51, 0.0 }
  0xfb   : > { %v796_v62 = vpop.f32.mrf.mxu0  ;;  %v876_v63 = vpop.f32.mrf.mxu1  ;;  %v5514_v1 = vpack.i.bf16 %v945_v49, %v943_v53  ;;  %v5516_v16 = vpack.i.bf16 %v977_v52, %v975_v48  ;;  %v5526_v51 = vpack.c.bf16 %v945_v49, %v943_v53  ;;  %v5530_v56 = vpack.c.bf16 %v977_v52, %v975_v48 }
  0xfc   : > { %v947_v32 = vmax.f32 %v795_v59, 0.0  ;;  %v797_v33 = vadd.f32 %v796_v62, %v427_v14  ;;  %v5518_v35 = vpack.i.bf16 %v946_v58, %v944_v54  ;;  %v877_v38 = vadd.f32 %v876_v63, %v507_v30 }
  0xfd   : > { %v798_v17 = vpop.f32.mrf.mxu0  ;;  %v878_v34 = vpop.f32.mrf.mxu1  ;;  %v979_v39 = vmax.f32 %v875_v60, 0.0  ;;  %v5521_v42 = vpack.i.bf16 %v978_v61, %v976_v57  ;;  %v5524_v50 = vpack.c.bf16 %v946_v58, %v944_v54  ;;  %8055 = vst [vmem:[#allocation3_spill] sm:$0xff] %v5526_v51  ;;  %v5528_v55 = vpack.c.bf16 %v978_v61, %v976_v57  ;;  %8057 = vst [vmem:[#allocation5_spill] sm:$0xff] %v5530_v56 }
  0xfe   : > { %v799_v36 = vadd.f32 %v798_v17, %v5488_v15  ;;  %v879_v37 = vadd.f32 %v878_v34, %v512_v31  ;;  %v948_v30 = vmax.f32 %v797_v33, 0.0  ;;  %v980_v62 = vmax.f32 %v877_v38, 0.0 }
  0xff   : > { %v800_v40 = vpop.f32.mrf.mxu0  ;;  %v880_v41 = vpop.f32.mrf.mxu1  ;;  %8054 = vst [vmem:[#allocation2_spill] sm:$0xff] %v5524_v50  ;;  %8056 = vst [vmem:[#allocation4_spill] sm:$0xff] %v5528_v55 }
 0x100   : > { %v949_v43 = vmax.f32 %v799_v36, 0.0  ;;  %v801_v44 = vadd.f32 %v800_v40, %v5488_v15  ;;  %v881_v45 = vadd.f32 %v880_v41, %v512_v31  ;;  %v981_v46 = vmax.f32 %v879_v37, 0.0 }
 0x101   : > { %v804_v47 = vpop.f32.mrf.mxu0  ;;  %v884_v14 = vpop.f32.mrf.mxu1 }
 0x102   : > { %v950_v59 = vmax.f32 %v801_v44, 0.0  ;;  %v982_v60 = vmax.f32 %v881_v45, 0.0  ;;  %v5532_v34 = vpack.i.bf16 %v949_v43, %v947_v32  ;;  %v5534_v15 = vpack.i.bf16 %v981_v46, %v979_v39 }
 0x103   : > { %v806_v63 = vpop.f32.mrf.mxu0  ;;  %v886_v17 = vpop.f32.mrf.mxu1  ;;  %v805_v31 = vadd.f32 %v804_v47, %v5484_v12  ;;  %v885_v49 = vadd.f32 %v884_v14, %v5510_v28 }
 0x104   : > { %v5538_v53 = vpack.i.bf16 %v950_v59, %v948_v30  ;;  %v807_v48 = vadd.f32 %v806_v63, %v5484_v12  ;;  %v887_v61 = vadd.f32 %v886_v17, %v5510_v28  ;;  %v5544_v37 = vpack.i.bf16 %v982_v60, %v980_v62 }
 0x105   : > { %v808_v54 = vpop.f32.mrf.mxu0  ;;  %v888_v58 = vpop.f32.mrf.mxu1  ;;  %v951_v38 = vmax.f32 %v805_v31, 0.0  ;;  %v5548_v14 = vpack.c.bf16 %v950_v59, %v948_v30  ;;  %v5550_v12 = vpack.c.bf16 %v949_v43, %v947_v32  ;;  %v5552_v63 = vpack.c.bf16 %v982_v60, %v980_v62 }
 0x106   : > { %v809_v52 = vadd.f32 %v808_v54, %v5486_v13  ;;  %v889_v57 = vadd.f32 %v888_v58, %v5512_v29  ;;  %v5554_v54 = vpack.c.bf16 %v981_v46, %v979_v39  ;;  %v952_v28 = vmax.f32 %v807_v48, 0.0 }
 0x107   : > { %v810_v33 = vpop.f32.mrf.mxu0  ;;  %v890_v36 = vpop.f32.mrf.mxu1  ;;  %8058 = vst [vmem:[#allocation6_spill] sm:$0xff] %v5548_v14  ;;  %8059 = vst [vmem:[#allocation7_spill] sm:$0xff] %v5550_v12  ;;  %v983_v58 = vmax.f32 %v885_v49, 0.0  ;;  %v984_v0 = vmax.f32 %v887_v61, 0.0 }
 0x108   : > { %v953_v40 = vmax.f32 %v809_v52, 0.0  ;;  %v811_v41 = vadd.f32 %v810_v33, %v5486_v13  ;;  %v891_v44 = vadd.f32 %v890_v36, %v5512_v29  ;;  %8060 = vst [vmem:[#allocation8_spill] sm:$0xff] %v5552_v63  ;;  %8061 = vst [vmem:[#allocation9_spill] sm:$0xff] %v5554_v54  ;;  %v985_v31 = vmax.f32 %v889_v57, 0.0 }
 0x109   : > { %v814_v45 = vpop.f32.mrf.mxu0  ;;  %v894_v47 = vpop.f32.mrf.mxu1 }
 0x10a   : > { %v954_v17 = vmax.f32 %v811_v41, 0.0  ;;  %v986_v52 = vmax.f32 %v891_v44, 0.0  ;;  %v5556_v33 = vpack.i.bf16 %v953_v40, %v951_v38  ;;  %v815_v29 = vadd.f32 %v814_v45, %v5480_v10 }
 0x10b   : > { %v816_v56 = vpop.f32.mrf.mxu0  ;;  %v896_v13 = vpop.f32.mrf.mxu1  ;;  %v895_v30 = vadd.f32 %v894_v47, %v5506_v26  ;;  %v5566_v57 = vpack.i.bf16 %v985_v31, %v983_v58 }
 0x10c   : > { %v5560_v59 = vpack.i.bf16 %v954_v17, %v952_v28  ;;  %v817_v39 = vadd.f32 %v816_v56, %v5480_v10  ;;  %v897_v46 = vadd.f32 %v896_v13, %v5506_v26  ;;  %v5568_v61 = vpack.i.bf16 %v986_v52, %v984_v0 }
 0x10d   : > { %v818_v32 = vpop.f32.mrf.mxu0  ;;  %v898_v43 = vpop.f32.mrf.mxu1  ;;  %v955_v36 = vmax.f32 %v815_v29, 0.0  ;;  %v5572_v56 = vpack.c.bf16 %v954_v17, %v952_v28  ;;  %v5574_v26 = vpack.c.bf16 %v953_v40, %v951_v38  ;;  %v5576_v13 = vpack.c.bf16 %v986_v52, %v984_v0 }
 0x10e   : > { %v819_v60 = vadd.f32 %v818_v32, %v5482_v11  ;;  %v899_v62 = vadd.f32 %v898_v43, %v5508_v27  ;;  %v5578_v32 = vpack.c.bf16 %v985_v31, %v983_v58  ;;  %v987_v43 = vmax.f32 %v895_v30, 0.0 }
 0x10f   : > { %v820_v49 = vpop.f32.mrf.mxu0  ;;  %v900_v48 = vpop.f32.mrf.mxu1  ;;  %8062 = vst [vmem:[#allocation10_spill] sm:$0xff] %v5572_v56  ;;  %8063 = vst [vmem:[#allocation11_spill] sm:$0xff] %v5574_v26  ;;  %v956_v55 = vmax.f32 %v817_v39, 0.0  ;;  %v988_v54 = vmax.f32 %v897_v46, 0.0 }
 0x110   : > { %v957_v41 = vmax.f32 %v819_v60, 0.0  ;;  %v821_v44 = vadd.f32 %v820_v49, %v5482_v11  ;;  %v901_v45 = vadd.f32 %v900_v48, %v5508_v27  ;;  %8064 = vst [vmem:[#allocation12_spill] sm:$0xff] %v5576_v13  ;;  %8065 = vst [vmem:[#allocation13_spill] sm:$0xff] %v5578_v32  ;;  %v989_v29 = vmax.f32 %v899_v62, 0.0 }
 0x111   : > { %v824_v47 = vpop.f32.mrf.mxu0  ;;  %v904_v10 = vpop.f32.mrf.mxu1 }
 0x112   : > { %v958_v63 = vmax.f32 %v821_v44, 0.0  ;;  %v990_v60 = vmax.f32 %v901_v45, 0.0  ;;  %v5580_v49 = vpack.i.bf16 %v957_v41, %v955_v36  ;;  %v825_v27 = vadd.f32 %v824_v47, %v5476_v8 }
 0x113   : > { %v826_v51 = vpop.f32.mrf.mxu0  ;;  %v906_v11 = vpop.f32.mrf.mxu1  ;;  %v905_v28 = vadd.f32 %v904_v10, %v5502_v24  ;;  %v5592_v62 = vpack.i.bf16 %v989_v29, %v987_v43 }
 0x114   : > { %v5584_v0 = vpack.i.bf16 %v958_v63, %v956_v55  ;;  %v827_v17 = vadd.f32 %v826_v51, %v5476_v8  ;;  %v907_v58 = vadd.f32 %v906_v11, %v5502_v24  ;;  %v5590_v46 = vpack.i.bf16 %v990_v60, %v988_v54 }
 0x115   : > { %v828_v38 = vpop.f32.mrf.mxu0  ;;  %v908_v40 = vpop.f32.mrf.mxu1  ;;  %v959_v48 = vmax.f32 %v825_v27, 0.0  ;;  %v5596_v51 = vpack.c.bf16 %v958_v63, %v956_v55  ;;  %v5598_v24 = vpack.c.bf16 %v957_v41, %v955_v36  ;;  %v5600_v11 = vpack.c.bf16 %v990_v60, %v988_v54 }
 0x116   : > { %v829_v31 = vadd.f32 %v828_v38, %v5478_v9  ;;  %v909_v52 = vadd.f32 %v908_v40, %v5504_v25  ;;  %v5602_v38 = vpack.c.bf16 %v989_v29, %v987_v43  ;;  %v991_v40 = vmax.f32 %v905_v28, 0.0 }
 0x117   : > { %v830_v30 = vpop.f32.mrf.mxu0  ;;  %v910_v39 = vpop.f32.mrf.mxu1  ;;  %8066 = vst [vmem:[#allocation14_spill] sm:$0xff] %v5596_v51  ;;  %8067 = vst [vmem:[#allocation15_spill] sm:$0xff] %v5598_v24  ;;  %v960_v32 = vmax.f32 %v827_v17, 0.0  ;;  %v992_v13 = vmax.f32 %v907_v58, 0.0 }
 0x118   : > { %v961_v44 = vmax.f32 %v829_v31, 0.0  ;;  %v831_v45 = vadd.f32 %v830_v30, %v5478_v9  ;;  %v911_v47 = vadd.f32 %v910_v39, %v5504_v25  ;;  %8068 = vst [vmem:[#allocation16_spill] sm:$0xff] %v5600_v11  ;;  %8069 = vst [vmem:[#allocation17_spill] sm:$0xff] %v5602_v38  ;;  %v993_v27 = vmax.f32 %v909_v52, 0.0 }
 0x119   : > { %v834_v10 = vpop.f32.mrf.mxu0  ;;  %v914_v8 = vpop.f32.mrf.mxu1 }
 0x11a   : > { %v962_v50 = vmax.f32 %v831_v45, 0.0  ;;  %v994_v31 = vmax.f32 %v911_v47, 0.0  ;;  %v5604_v30 = vpack.i.bf16 %v961_v44, %v959_v48  ;;  %v835_v25 = vadd.f32 %v834_v10, %v5474_v7 }
 0x11b   : > { %v836_v12 = vpop.f32.mrf.mxu0  ;;  %v916_v9 = vpop.f32.mrf.mxu1  ;;  %v5608_v55 = vadd.f32 %v914_v8, %v5498_v22  ;;  %v5622_v52 = vpack.i.bf16 %v993_v27, %v991_v40  ;;  %v5630_v8 = vpack.c.bf16 %v961_v44, %v959_v48 }
 0x11c   : > { %v5610_v36 = vpack.i.bf16 %v962_v50, %v960_v32  ;;  %v837_v41 = vadd.f32 %v836_v12, %v5474_v7  ;;  %v5614_v43 = vadd.f32 %v916_v9, %v5498_v22  ;;  %v5620_v58 = vpack.i.bf16 %v994_v31, %v992_v13 }
 0x11d   : > { %v838_v63 = vpop.f32.mrf.mxu0  ;;  %v918_v54 = vpop.f32.mrf.mxu1  ;;  %v963_v39 = vmax.f32 %v835_v25, 0.0  ;;  %v5628_v10 = vpack.c.bf16 %v962_v50, %v960_v32  ;;  %8071 = vst [vmem:[#allocation19_spill] sm:$0xff] %v5630_v8  ;;  %v5632_v9 = vpack.c.bf16 %v994_v31, %v992_v13 }
 0x11e   : > { %v839_v29 = vadd.f32 %v838_v63, %v5472_v6  ;;  %v5618_v60 = vadd.f32 %v918_v54, %v5500_v23  ;;  %v5634_v63 = vpack.c.bf16 %v993_v27, %v991_v40  ;;  %v8034_v54 = vmax.f32 %v5608_v55, 0.0 }
 0x11f   : > { %v840_v28 = vpop.f32.mrf.mxu0  ;;  %v920_v17 = vpop.f32.mrf.mxu1  ;;  %8070 = vst [vmem:[#allocation18_spill] sm:$0xff] %v5628_v10  ;;  %8072 = vst [vmem:[#allocation20_spill] sm:$0xff] %v5632_v9  ;;  %v964_v38 = vmax.f32 %v837_v41, 0.0  ;;  %v8033_v25 = vmax.f32 %v5614_v43, 0.0 }
 0x120   : > { %v965_v45 = vmax.f32 %v839_v29, 0.0  ;;  %v841_v47 = vadd.f32 %v840_v28, %v5472_v6  ;;  %v5626_v7 = vadd.f32 %v920_v17, %v5500_v23  ;;  %8073 = vst [vmem:[#allocation21_spill] sm:$0xff] %v5634_v63 }
 0x121   : > { %v844_v22 = vpop.f32.mrf.mxu0  ;;  %v924_v12 = vpop.f32.mrf.mxu1 }
 0x122   : > { %v966_v29 = vmax.f32 %v841_v47, 0.0  ;;  %v8032_v23 = vmax.f32 %v5626_v7, 0.0  ;;  %v5640_v50 = vpack.i.bf16 %v965_v45, %v963_v39  ;;  %v5643_v32 = vadd.f32 %v844_v22, %v5466_v3 }
 0x123   : > { %v846_v28 = vpop.f32.mrf.mxu0  ;;  %v926_v17 = vpop.f32.mrf.mxu1  ;;  %v8074_v22 = vmax.f32 %v5618_v60, 0.0  ;;  %v5669_v26 = vpack.c.bf16 %v965_v45, %v963_v39 }
 0x124   : > { %v5645_v44 = vpack.i.bf16 %v966_v29, %v964_v38  ;;  %v847_v40 = vadd.f32 %v846_v28, %v5466_v3  ;;  %v5649_v27 = vadd.f32 %v926_v17, %v5494_v20  ;;  %v5656_v6 = vpack.i.bf16 %v8032_v23, %v8033_v25 }
 0x125   : > { %v848_v13 = vpop.f32.mrf.mxu0  ;;  %v928_v48 = vpop.f32.mrf.mxu1  ;;  %v5662_v11 = vpack.i.bf16 %v8074_v22, %v8034_v54  ;;  %v5667_v14 = vpack.c.bf16 %v966_v29, %v964_v38  ;;  %8075 = vst [vmem:[#allocation22_spill] sm:$0xff] %v5669_v26 }
 0x126   : > { %v849_v31 = vadd.f32 %v848_v13, %v5470_v5  ;;  %v967_v13 = vmax.f32 %v5643_v32, 0.0  ;;  %v968_v23 = vmax.f32 %v847_v40, 0.0  ;;  %v1000_v25 = vmax.f32 %v5649_v27, 0.0 }
 0x127   : > { %v850_v41 = vpop.f32.mrf.mxu0  ;;  %v930_v47 = vpop.f32.mrf.mxu1  ;;  %v929_v32 = vadd.f32 %v928_v48, %v5496_v21 }
 0x128   : > { %v969_v3 = vmax.f32 %v849_v31, 0.0  ;;  %v851_v28 = vadd.f32 %v850_v41, %v5470_v5  ;;  %v931_v17 = vadd.f32 %v930_v47, %v5496_v21  ;;  %v925_v41 = vadd.f32 %v924_v12, %v5494_v20 }
 0x129   : > { %v854_v63 = vpop.f32.mrf.mxu0  ;;  %v934_v9 = vpop.f32.mrf.mxu1  ;;  %v1001_v10 = vmax.f32 %v929_v32, 0.0 }
 0x12a   : > { %v970_v56 = vmax.f32 %v851_v28, 0.0  ;;  %v1002_v24 = vmax.f32 %v931_v17, 0.0  ;;  %v855_v22 = vadd.f32 %v854_v63, %v5464_v2  ;;  %v5673_v5 = vpack.i.bf16 %v969_v3, %v967_v13 }
 0x12b   : > { %v856_v31 = vpop.f32.mrf.mxu0  ;;  %v936_v54 = vpop.f32.mrf.mxu1  ;;  %v935_v38 = vadd.f32 %v934_v9, %v5490_v18  ;;  %v999_v8 = vmax.f32 %v925_v41, 0.0  ;;  %v5705_v32 = vpack.c.bf16 %v969_v3, %v967_v13 }
 0x12c   : > { %v5678_v45 = vpack.i.bf16 %v970_v56, %v968_v23  ;;  %v857_v40 = vadd.f32 %v856_v31, %v5464_v2  ;;  %v971_v47 = vmax.f32 %v855_v22, 0.0  ;;  %v937_v28 = vadd.f32 %v936_v54, %v5490_v18 }
 0x12d   : > { %v858_v29 = vpop.f32.mrf.mxu0  ;;  %v938_v39 = vpop.f32.mrf.mxu1  ;;  %v5684_v20 = vpack.i.bf16 %v1002_v24, %v1000_v25  ;;  %v1003_v2 = vmax.f32 %v935_v38, 0.0  ;;  %v5703_v41 = vpack.c.bf16 %v970_v56, %v968_v23  ;;  %v8078_v56 = vmax.f32 %v5608_v55, 0.0 }
 0x12e   : > { %v859_v27 = vadd.f32 %v858_v29, %v5468_v4  ;;  %v939_v63 = vadd.f32 %v938_v39, %v5492_v19  ;;  %v972_v31 = vmax.f32 %v857_v40, 0.0  ;;  %v1004_v18 = vmax.f32 %v937_v28, 0.0 }
 0x12f   : > { %v860_v17 = vpop.f32.mrf.mxu0  ;;  %v940_v51 = vpop.f32.mrf.mxu1  ;;  %v5715_v28 = vpack.c.bf16 %v1001_v10, %v999_v8  ;;  %v1007_v55 = vlaneseq }
 0x130   : > { %v973_v21 = vmax.f32 %v859_v27, 0.0  ;;  %v1005_v12 = vmax.f32 %v939_v63, 0.0  ;;  %v861_v9 = vadd.f32 %v860_v17, %v5468_v4  ;;  %v941_v48 = vadd.f32 %v940_v51, %v5492_v19 }
 0x131   : > { %v5693_v27 = vpack.i.bf16 %v1001_v10, %v999_v8  ;;  %v5713_v63 = vpack.c.bf16 %v1002_v24, %v1000_v25  ;;  %v8076_v17 = vmax.f32 %v5614_v43, 0.0  ;;  %v5041_v24 = vld [vmem:[%s8023_s3 + $0x104] ss:$8 sps:$4 sm:$0xff]  }
 0x132   : > { %v974_v29 = vmax.f32 %v861_v9, 0.0  ;;  %v1006_v26 = vmax.f32 %v941_v48, 0.0  ;;  %v4519_v39 = vpack.i.bf16 %v973_v21, %v971_v47  ;;  %v5688_v22 = vpack.i.bf16 %v1005_v12, %v1003_v2  ;;  %1533 = vmatprep.mubr.bf16.mxu1 %v5041_v24 }
 0x133   : > { %v5701_v51 = vpack.c.bf16 %v973_v21, %v971_v47  ;;  %v5709_v40 = vpack.c.bf16 %v1005_v12, %v1003_v2  ;;  %v8077_v47 = vmax.f32 %v5626_v7, 0.0 }
 0x134   : > { %4520 = vrot.lane.b32.xlu0 %v4519_v39, %s5217_s14  ;;  %v5691_v54 = vpack.i.bf16 %v974_v29, %v972_v31  ;;  %v5697_v4 = vpack.i.bf16 %v1006_v26, %v1004_v18  ;;  %v5699_v19 = vpack.c.bf16 %v974_v29, %v972_v31  ;;  %v5707_v38 = vpack.c.bf16 %v1006_v26, %v1004_v18 }
 0x135   : > { %v5721_v21 = vpack.c.bf16 %v8077_v47, %v8076_v17  ;;  %v8079_v26 = vmax.f32 %v5618_v60, 0.0 }
 0x136   : > { %4530 = vrot.lane.b32.xlu1 %v5691_v54, %s5217_s14 }
 0x137   : > { %v5727_v23 = vpack.c.bf16 %v8079_v26, %v8078_v56 }
 0x138   : > { %4525 = vrot.lane.b32.xlu0 %v5673_v5, %s5217_s14 }
 0x13a   : > { %4535 = vrot.lane.b32.xlu1 %v5678_v45, %s5217_s14 }
 0x13c   : > { %4540 = vrot.lane.b32.xlu0 %v5640_v50, %s5217_s14 }
 0x13e   : > { %4545 = vrot.lane.b32.xlu1 %v5645_v44, %s5217_s14 }
 0x140   : > { %4550 = vrot.lane.b32.xlu0 %v5604_v30, %s5217_s14 }
 0x142   : > { %4555 = vrot.lane.b32.xlu1 %v5610_v36, %s5217_s14 }
 0x144   : > { %4560 = vrot.lane.b32.xlu0 %v5580_v49, %s5217_s14 }
 0x146   : > { %4565 = vrot.lane.b32.xlu1 %v5584_v0, %s5217_s14 }
 0x148   : > { %4570 = vrot.lane.b32.xlu0 %v5556_v33, %s5217_s14 }
 0x14a   : > { %4575 = vrot.lane.b32.xlu1 %v5560_v59, %s5217_s14 }
 0x14c   : > { %4580 = vrot.lane.b32.xlu0 %v5532_v34, %s5217_s14 }
 0x14e   : > { %4585 = vrot.lane.b32.xlu1 %v5538_v53, %s5217_s14 }
 0x150   : > { %4590 = vrot.lane.b32.xlu0 %v5514_v1, %s5217_s14 }
 0x152   : > { %4595 = vrot.lane.b32.xlu1 %v5518_v35, %s5217_s14 }
 0x154   : > { %4600 = vrot.lane.b32.xlu0 %v5688_v22, %s5217_s14 }
 0x156   : > { %4610 = vrot.lane.b32.xlu1 %v5697_v4, %s5217_s14 }
 0x158   : > { %4605 = vrot.lane.b32.xlu0 %v5693_v27, %s5217_s14 }
 0x15a   : > { %4615 = vrot.lane.b32.xlu1 %v5684_v20, %s5217_s14 }
 0x15c   : > { %4620 = vrot.lane.b32.xlu0 %v5662_v11, %s5217_s14 }
 0x15e   : > { %4625 = vrot.lane.b32.xlu1 %v5656_v6, %s5217_s14 }
 0x160   : > { %4630 = vrot.lane.b32.xlu0 %v5622_v52, %s5217_s14 }
 0x162   : > { %4635 = vrot.lane.b32.xlu1 %v5620_v58, %s5217_s14 }
 0x164   : > { %4640 = vrot.lane.b32.xlu0 %v5592_v62, %s5217_s14 }
 0x166   : > { %4645 = vrot.lane.b32.xlu1 %v5590_v46, %s5217_s14 }
 0x168   : > { %4650 = vrot.lane.b32.xlu0 %v5566_v57, %s5217_s14 }
 0x16a   : > { %4655 = vrot.lane.b32.xlu1 %v5568_v61, %s5217_s14 }
 0x16c   : > { %4660 = vrot.lane.b32.xlu0 %v5534_v15, %s5217_s14 }
 0x16e   : > { %4665 = vrot.lane.b32.xlu1 %v5544_v37, %s5217_s14 }
 0x170   : > { %4670 = vrot.lane.b32.xlu0 %v5516_v16, %s5217_s14 }
 0x172   : > { %4675 = vrot.lane.b32.xlu1 %v5521_v42, %s5217_s14 }
 0x174   : > { %4680 = vrot.lane.b32.xlu0 %v4519_v39, %s5218_s19 }
 0x176   : > { %4695 = vrot.lane.b32.xlu1 %v5678_v45, %s5218_s19 }
 0x178   : > { %4685 = vrot.lane.b32.xlu0 %v4519_v39, %s5219_s20 }
 0x17a   : > { %4705 = vrot.lane.b32.xlu1 %v5678_v45, %s5219_s20 }
 0x17c   : > { %4690 = vrot.lane.b32.xlu0 %v5673_v5, %s5218_s19 }
 0x17e   : > { %4715 = vrot.lane.b32.xlu1 %v5645_v44, %s5218_s19 }
 0x180   : > { %4700 = vrot.lane.b32.xlu0 %v5673_v5, %s5219_s20 }
 0x182   : > { %4725 = vrot.lane.b32.xlu1 %v5645_v44, %s5219_s20 }
 0x184   : > { %4710 = vrot.lane.b32.xlu0 %v5640_v50, %s5218_s19 }
 0x186   : > { %4735 = vrot.lane.b32.xlu1 %v5610_v36, %s5218_s19 }
 0x188   : > { %4720 = vrot.lane.b32.xlu0 %v5640_v50, %s5219_s20 }
 0x18a   : > { %4745 = vrot.lane.b32.xlu1 %v5610_v36, %s5219_s20 }
 0x18c   : > { %4730 = vrot.lane.b32.xlu0 %v5604_v30, %s5218_s19 }
 0x18e   : > { %4755 = vrot.lane.b32.xlu1 %v5584_v0, %s5218_s19 }
 0x190   : > { %4740 = vrot.lane.b32.xlu0 %v5604_v30, %s5219_s20  ;;  %v5830_v30 = vand.u32 127, %v1007_v55 }
 0x192   : > { %4765 = vrot.lane.b32.xlu1 %v5584_v0, %s5219_s20  ;;  %v5837_v0 = vadd.s32 128, %v5830_v30  ;;  %vm1256_vm0 = vcmp.lt.s32.totalorder %v5830_v30, 1  ;;  %vm1952_vm5 = vcmp.lt.s32.totalorder %v5830_v30, 4  ;;  %vm2488_vm6 = vcmp.lt.s32.totalorder %v5830_v30, 5 }
 0x194   : > { %4750 = vrot.lane.b32.xlu0 %v5580_v49, %s5218_s19 }
 0x196   : > { %4775 = vrot.lane.b32.xlu1 %v5560_v59, %s5218_s19 }
 0x198   : > { %4760 = vrot.lane.b32.xlu0 %v5580_v49, %s5219_s20  ;;  %v1040_v49 = vand.u32 3, %v5830_v30 }
 0x19a   : > { %4785 = vrot.lane.b32.xlu1 %v5560_v59, %s5219_s20  ;;  %v1047_v59 = vand.u32 3, %v5837_v0  ;;  %vm5854_vm2 = vcmp.ge.s32.totalorder %v1040_v49, 1 }
 0x19b   : > { %vm5880_vm4 = vmpackc.low %vm5854_vm2, %vm5854_vm2 }
 0x19c   : > { %4770 = vrot.lane.b32.xlu0 %v5556_v33, %s5218_s19  ;;  %vm5850_vm1 = vcmp.ge.s32.totalorder %v1047_v59, 1 }
 0x19d   : > { %vm5871_vm3 = vmpackc.low %vm5850_vm1, %vm5850_vm1 }
 0x19e   : > { %4795 = vrot.lane.b32.xlu1 %v5538_v53, %s5218_s19 }
 0x1a0   : > { %4780 = vrot.lane.b32.xlu0 %v5556_v33, %s5219_s20 }
 0x1a2   : > { %4805 = vrot.lane.b32.xlu1 %v5538_v53, %s5219_s20  ;;  %v3086_v53 = vld [vmem:[%s8026_s6] sm:$0xff] }
 0x1a4   : > { %4790 = vrot.lane.b32.xlu0 %v5532_v34, %s5218_s19 }
 0x1a6   : > { %v4521_v36 = vpop.permute.xlu0 %4520  ;;  %4815 = vrot.lane.b32.xlu1 %v5518_v35, %s5218_s19 }
 0x1a7   : > { %v4523_v60 = vunpack.i.h.bf16 %v4521_v36  ;;  %v4522_v7 = vunpack.i.l.bf16 %v4521_v36 }
 0x1a8   : > { %v4531_v33 = vpop.permute.xlu1 %4530  ;;  %4800 = vrot.lane.b32.xlu0 %v5532_v34, %s5219_s20 }
 0x1a9   : > { %v4533_v10 = vunpack.i.h.bf16 %v4531_v33  ;;  %v4532_v8 = vunpack.i.l.bf16 %v4531_v33 }
 0x1aa   : > { %v4526_v25 = vpop.permute.xlu0 %4525  ;;  %4825 = vrot.lane.b32.xlu1 %v5518_v35, %s5219_s20 }
 0x1ab   : > { %v1271_v50 = vsel %vm1256_vm0, %v4522_v7, %v4532_v8  ;;  %v1272_v34 = vsel %vm1256_vm0, %v4523_v60, %v4533_v10  ;;  %v1303_v44 = vsel %vm1256_vm0, %v4532_v8, %v4522_v7  ;;  %v1304_v3 = vsel %vm1256_vm0, %v4533_v10, %v4523_v60 }
 0x1ac   : > { %v4059_v35 = vpack.c.bf16 %v1304_v3, %v1303_v44  ;;  %v4536_v5 = vpop.permute.xlu1 %4535  ;;  %4810 = vrot.lane.b32.xlu0 %v5514_v1, %s5218_s19  ;;  %v4056_v45 = vpack.c.bf16 %v1272_v34, %v1271_v50  ;;  %v4528_v9 = vunpack.i.h.bf16 %v4526_v25  ;;  %v4527_v48 = vunpack.i.l.bf16 %v4526_v25 }
 0x1ad   : > { %v4538_v2 = vunpack.i.h.bf16 %v4536_v5  ;;  %v4537_v31 = vunpack.i.l.bf16 %v4536_v5 }
 0x1ae   : > { %4057 = vmatprep.subr.msk.bf16.mxu1 %vm5871_vm3, %v4056_v45  ;;  %v4541_v29 = vpop.permute.xlu0 %4540  ;;  %4845 = vrot.lane.b32.xlu1 %v5684_v20, %s5218_s19 }
 0x1af   : > { %v1269_v39 = vsel %vm1256_vm0, %v4527_v48, %v4537_v31  ;;  %v1270_v18 = vsel %vm1256_vm0, %v4528_v9, %v4538_v2  ;;  %v1301_v17 = vsel %vm1256_vm0, %v4537_v31, %v4527_v48  ;;  %v1302_v47 = vsel %vm1256_vm0, %v4538_v2, %v4528_v9  ;;  %4060 = vmatpush1.bf16.msk.msra.mxu1 %vm5880_vm4, %v4059_v35 }
 0x1b0   : > { %v4065_v56 = vpack.c.bf16 %v1302_v47, %v1301_v17  ;;  %v4546_v26 = vpop.permute.xlu1 %4545  ;;  %4820 = vrot.lane.b32.xlu0 %v5514_v1, %s5219_s20  ;;  %v4062_v24 = vpack.c.bf16 %v1270_v18, %v1269_v39  ;;  %v4543_v55 = vunpack.i.h.bf16 %v4541_v29  ;;  %v4542_v59 = vunpack.i.l.bf16 %v4541_v29 }
 0x1b1   : > { %v4548_v49 = vunpack.i.h.bf16 %v4546_v26  ;;  %v4547_v36 = vunpack.i.l.bf16 %v4546_v26 }
 0x1b2   : > { %4063 = vmatprep.subr.msk.bf16.mxu1 %vm5871_vm3, %v4062_v24  ;;  %v4551_v33 = vpop.permute.xlu0 %4550  ;;  %4855 = vrot.lane.b32.xlu1 %v5691_v54, %s5218_s19 }
 0x1b3   : > { %v1267_v60 = vsel %vm1256_vm0, %v4542_v59, %v4547_v36  ;;  %v1268_v7 = vsel %vm1256_vm0, %v4543_v55, %v4548_v49  ;;  %v1299_v1 = vsel %vm1256_vm0, %v4547_v36, %v4542_v59  ;;  %v1300_v10 = vsel %vm1256_vm0, %v4548_v49, %v4543_v55  ;;  %4066 = vmatpush1.bf16.msk.msra.mxu1 %vm5880_vm4, %v4065_v56 }
 0x1b4   : > { %v4071_v8 = vpack.c.bf16 %v1300_v10, %v1299_v1  ;;  %v4556_v25 = vpop.permute.xlu1 %4555  ;;  %4830 = vrot.lane.b32.xlu0 %v5688_v22, %s5218_s19  ;;  %v4068_v50 = vpack.c.bf16 %v1268_v7, %v1267_v60  ;;  %v4553_v34 = vunpack.i.h.bf16 %v4551_v33  ;;  %v4552_v44 = vunpack.i.l.bf16 %v4551_v33 }
 0x1b5   : > { %v4558_v3 = vunpack.i.h.bf16 %v4556_v25  ;;  %v4557_v35 = vunpack.i.l.bf16 %v4556_v25 }
 0x1b6   : > { %4069 = vmatprep.subr.msk.bf16.mxu1 %vm5871_vm3, %v4068_v50  ;;  %v4561_v5 = vpop.permute.xlu0 %4560  ;;  %4860 = vrot.lane.b32.xlu1 %v5691_v54, %s5219_s20 }
 0x1b7   : > { %v1265_v45 = vsel %vm1256_vm0, %v4552_v44, %v4557_v35  ;;  %v1266_v9 = vsel %vm1256_vm0, %v4553_v34, %v4558_v3  ;;  %v1297_v48 = vsel %vm1256_vm0, %v4557_v35, %v4552_v44  ;;  %v1298_v2 = vsel %vm1256_vm0, %v4558_v3, %v4553_v34  ;;  %4072 = vmatpush1.bf16.msk.msra.mxu1 %vm5880_vm4, %v4071_v8 }
 0x1b8   : > { %v4077_v31 = vpack.c.bf16 %v1298_v2, %v1297_v48  ;;  %v4566_v29 = vpop.permute.xlu1 %4565  ;;  %4835 = vrot.lane.b32.xlu0 %v5688_v22, %s5219_s20  ;;  %v4074_v54 = vpack.c.bf16 %v1266_v9, %v1265_v45  ;;  %v4563_v39 = vunpack.i.h.bf16 %v4561_v5  ;;  %v4562_v18 = vunpack.i.l.bf16 %v4561_v5 }
 0x1b9   : > { %v4568_v17 = vunpack.i.h.bf16 %v4566_v29  ;;  %v4567_v47 = vunpack.i.l.bf16 %v4566_v29 }
 0x1ba   : > { %4075 = vmatprep.subr.msk.bf16.mxu1 %vm5871_vm3, %v4074_v54  ;;  %v4571_v56 = vpop.permute.xlu0 %4570  ;;  %4865 = vrot.lane.b32.xlu1 %v5684_v20, %s5219_s20 }
 0x1bb   : > { %v1263_v26 = vsel %vm1256_vm0, %v4562_v18, %v4567_v47  ;;  %v1264_v24 = vsel %vm1256_vm0, %v4563_v39, %v4568_v17  ;;  %v1295_v22 = vsel %vm1256_vm0, %v4567_v47, %v4562_v18  ;;  %v1296_v55 = vsel %vm1256_vm0, %v4568_v17, %v4563_v39  ;;  %4078 = vmatpush1.bf16.msk.msra.mxu1 %vm5880_vm4, %v4077_v31 }
 0x1bc   : > { %v4083_v59 = vpack.c.bf16 %v1296_v55, %v1295_v22  ;;  %v4576_v49 = vpop.permute.xlu1 %4575  ;;  %4840 = vrot.lane.b32.xlu0 %v5693_v27, %s5218_s19  ;;  %v4080_v20 = vpack.c.bf16 %v1264_v24, %v1263_v26  ;;  %v4573_v36 = vunpack.i.h.bf16 %v4571_v56  ;;  %v4572_v33 = vunpack.i.l.bf16 %v4571_v56 }
 0x1bd   : > { %v4578_v60 = vunpack.i.h.bf16 %v4576_v49  ;;  %v4577_v7 = vunpack.i.l.bf16 %v4576_v49 }
 0x1be   : > { %4081 = vmatprep.subr.msk.bf16.mxu1 %vm5871_vm3, %v4080_v20  ;;  %v4581_v1 = vpop.permute.xlu0 %4580  ;;  %4875 = vrot.lane.b32.xlu1 %v5656_v6, %s5218_s19 }
 0x1bf   : > { %v1261_v10 = vsel %vm1256_vm0, %v4572_v33, %v4577_v7  ;;  %v1262_v8 = vsel %vm1256_vm0, %v4573_v36, %v4578_v60  ;;  %v1293_v25 = vsel %vm1256_vm0, %v4577_v7, %v4572_v33  ;;  %v1294_v50 = vsel %vm1256_vm0, %v4578_v60, %v4573_v36  ;;  %4084 = vmatpush1.bf16.msk.msra.mxu1 %vm5880_vm4, %v4083_v59 }
 0x1c0   : > { %v4089_v34 = vpack.c.bf16 %v1294_v50, %v1293_v25  ;;  %v4586_v44 = vpop.permute.xlu1 %4585  ;;  %4850 = vrot.lane.b32.xlu0 %v5693_v27, %s5219_s20  ;;  %v4086_v3 = vpack.c.bf16 %v1262_v8, %v1261_v10  ;;  %v4583_v35 = vunpack.i.h.bf16 %v4581_v1  ;;  %v4582_v5 = vunpack.i.l.bf16 %v4581_v1 }
 0x1c1   : > { %v4588_v45 = vunpack.i.h.bf16 %v4586_v44  ;;  %v4587_v9 = vunpack.i.l.bf16 %v4586_v44 }
 0x1c2   : > { %4087 = vmatprep.subr.msk.bf16.mxu1 %vm5871_vm3, %v4086_v3  ;;  %4885 = vrot.lane.b32.xlu1 %v5656_v6, %s5219_s20  ;;  %v4591_v48 = vpop.permute.xlu0 %4590 }
 0x1c3   : > { %v1259_v2 = vsel %vm1256_vm0, %v4582_v5, %v4587_v9  ;;  %v1260_v31 = vsel %vm1256_vm0, %v4583_v35, %v4588_v45  ;;  %v1291_v27 = vsel %vm1256_vm0, %v4587_v9, %v4582_v5  ;;  %v1292_v29 = vsel %vm1256_vm0, %v4588_v45, %v4583_v35  ;;  %4090 = vmatpush1.bf16.msk.msra.mxu1 %vm5880_vm4, %v4089_v34 }
 0x1c4   : > { %v4095_v54 = vpack.c.bf16 %v1292_v29, %v1291_v27  ;;  %v4596_v39 = vpop.permute.xlu1 %4595  ;;  %4870 = vrot.lane.b32.xlu0 %v5662_v11, %s5218_s19  ;;  %v4092_v6 = vpack.c.bf16 %v1260_v31, %v1259_v2  ;;  %v4593_v18 = vunpack.i.h.bf16 %v4591_v48  ;;  %v4592_v17 = vunpack.i.l.bf16 %v4591_v48 }
 0x1c5   : > { %v4598_v47 = vunpack.i.h.bf16 %v4596_v39  ;;  %v4597_v56 = vunpack.i.l.bf16 %v4596_v39 }
 0x1c6   : > { %4093 = vmatprep.subr.msk.bf16.mxu1 %vm5871_vm3, %v4092_v6  ;;  %4895 = vrot.lane.b32.xlu1 %v5620_v58, %s5218_s19  ;;  %v4601_v26 = vpop.permute.xlu0 %4600 }
 0x1c7   : > { %v1257_v24 = vsel %vm1256_vm0, %v4592_v17, %v4597_v56  ;;  %v1258_v22 = vsel %vm1256_vm0, %v4593_v18, %v4598_v47  ;;  %v1289_v55 = vsel %vm1256_vm0, %v4597_v56, %v4592_v17  ;;  %v1290_v59 = vsel %vm1256_vm0, %v4598_v47, %v4593_v18  ;;  %4096 = vmatpush1.bf16.msk.msra.mxu1 %vm5880_vm4, %v4095_v54 }
 0x1c8   : > { %v4101_v49 = vpack.c.bf16 %v1290_v59, %v1289_v55  ;;  %v4611_v20 = vpop.permute.xlu1 %4610  ;;  %4880 = vrot.lane.b32.xlu0 %v5662_v11, %s5219_s20  ;;  %v4098_v36 = vpack.c.bf16 %v1258_v22, %v1257_v24  ;;  %v4603_v33 = vunpack.i.h.bf16 %v4601_v26  ;;  %v4602_v60 = vunpack.i.l.bf16 %v4601_v26 }
 0x1c9   : > { %v4613_v7 = vunpack.i.h.bf16 %v4611_v20  ;;  %v4612_v1 = vunpack.i.l.bf16 %v4611_v20 }
 0x1ca   : > { %4905 = vrot.lane.b32.xlu1 %v5620_v58, %s5219_s20  ;;  %v4606_v10 = vpop.permute.xlu0 %4605  ;;  %4099 = vmatprep.subr.msk.bf16.mxu1 %vm5871_vm3, %v4098_v36 }
 0x1cb   : > { %v1287_v8 = vsel %vm1256_vm0, %v4602_v60, %v4612_v1  ;;  %v1288_v25 = vsel %vm1256_vm0, %v4603_v33, %v4613_v7  ;;  %v1319_v11 = vsel %vm1256_vm0, %v4612_v1, %v4602_v60  ;;  %v1320_v50 = vsel %vm1256_vm0, %v4613_v7, %v4603_v33  ;;  %4102 = vmatpush1.bf16.msk.msra.mxu1 %vm5880_vm4, %v4101_v49 }
 0x1cc   : > { %v4107_v58 = vpack.c.bf16 %v1320_v50, %v1319_v11  ;;  %v4616_v34 = vpop.permute.xlu1 %4615  ;;  %4890 = vrot.lane.b32.xlu0 %v5622_v52, %s5218_s19  ;;  %v4104_v44 = vpack.c.bf16 %v1288_v25, %v1287_v8  ;;  %v4608_v3 = vunpack.i.h.bf16 %v4606_v10  ;;  %v4607_v35 = vunpack.i.l.bf16 %v4606_v10 }
 0x1cd   : > { %v4618_v5 = vunpack.i.h.bf16 %v4616_v34  ;;  %v4617_v45 = vunpack.i.l.bf16 %v4616_v34 }
 0x1ce   : > { %4915 = vrot.lane.b32.xlu1 %v5590_v46, %s5218_s19  ;;  %v4621_v9 = vpop.permute.xlu0 %4620  ;;  %4105 = vmatprep.subr.msk.bf16.mxu1 %vm5871_vm3, %v4104_v44 }
 0x1cf   : > { %v1285_v48 = vsel %vm1256_vm0, %v4607_v35, %v4617_v45  ;;  %v1286_v2 = vsel %vm1256_vm0, %v4608_v3, %v4618_v5  ;;  %v1317_v31 = vsel %vm1256_vm0, %v4617_v45, %v4607_v35  ;;  %v1318_v27 = vsel %vm1256_vm0, %v4618_v5, %v4608_v3  ;;  %4108 = vmatpush2.bf16.msk.msra.mxu1 %vm5880_vm4, %v4107_v58 }
 0x1d0   : > { %v4113_v29 = vpack.c.bf16 %v1318_v27, %v1317_v31  ;;  %v4626_v54 = vpop.permute.xlu1 %4625  ;;  %4900 = vrot.lane.b32.xlu0 %v5622_v52, %s5219_s20  ;;  %v4110_v39 = vpack.c.bf16 %v1286_v2, %v1285_v48  ;;  %v4623_v6 = vunpack.i.h.bf16 %v4621_v9  ;;  %v4622_v18 = vunpack.i.l.bf16 %v4621_v9 }
 0x1d1   : > { %v4628_v17 = vunpack.i.h.bf16 %v4626_v54  ;;  %v4627_v47 = vunpack.i.l.bf16 %v4626_v54 }
 0x1d2   : > { %4925 = vrot.lane.b32.xlu1 %v5697_v4, %s5218_s19  ;;  %v4631_v56 = vpop.permute.xlu0 %4630  ;;  %4111 = vmatprep.subr.msk.bf16.mxu1 %vm5871_vm3, %v4110_v39 }
 0x1d3   : > { %v1283_v26 = vsel %vm1256_vm0, %v4622_v18, %v4627_v47  ;;  %v1284_v24 = vsel %vm1256_vm0, %v4623_v6, %v4628_v17  ;;  %v1315_v52 = vsel %vm1256_vm0, %v4627_v47, %v4622_v18  ;;  %v1316_v22 = vsel %vm1256_vm0, %v4628_v17, %v4623_v6  ;;  %4114 = vmatpush2.bf16.msk.msra.mxu1 %vm5880_vm4, %v4113_v29 }
 0x1d4   : > { %v4119_v55 = vpack.c.bf16 %v1316_v22, %v1315_v52  ;;  %v4636_v59 = vpop.permute.xlu1 %4635  ;;  %4910 = vrot.lane.b32.xlu0 %v5592_v62, %s5218_s19  ;;  %v4116_v49 = vpack.c.bf16 %v1284_v24, %v1283_v26  ;;  %v4633_v20 = vunpack.i.h.bf16 %v4631_v56  ;;  %v4632_v36 = vunpack.i.l.bf16 %v4631_v56 }
 0x1d5   : > { %v4638_v33 = vunpack.i.h.bf16 %v4636_v59  ;;  %v4637_v60 = vunpack.i.l.bf16 %v4636_v59 }
 0x1d6   : > { %4930 = vrot.lane.b32.xlu1 %v5697_v4, %s5219_s20  ;;  %v4641_v7 = vpop.permute.xlu0 %4640  ;;  %4117 = vmatprep.subr.msk.bf16.mxu1 %vm5871_vm3, %v4116_v49 }
 0x1d7   : > { %v1281_v1 = vsel %vm1256_vm0, %v4632_v36, %v4637_v60  ;;  %v1282_v10 = vsel %vm1256_vm0, %v4633_v20, %v4638_v33  ;;  %v1313_v8 = vsel %vm1256_vm0, %v4637_v60, %v4632_v36  ;;  %v1314_v25 = vsel %vm1256_vm0, %v4638_v33, %v4633_v20  ;;  %4120 = vmatpush2.bf16.msk.msra.mxu1 %vm5880_vm4, %v4119_v55 }
 0x1d8   : > { %v4125_v4 = vpack.c.bf16 %v1314_v25, %v1313_v8  ;;  %v4646_v11 = vpop.permute.xlu1 %4645  ;;  %4920 = vrot.lane.b32.xlu0 %v5592_v62, %s5219_s20  ;;  %v4122_v50 = vpack.c.bf16 %v1282_v10, %v1281_v1  ;;  %v4643_v58 = vunpack.i.h.bf16 %v4641_v7  ;;  %v4642_v34 = vunpack.i.l.bf16 %v4641_v7 }
 0x1d9   : > { %v4648_v44 = vunpack.i.h.bf16 %v4646_v11  ;;  %v4647_v3 = vunpack.i.l.bf16 %v4646_v11 }
 0x1da   : > { %4935 = vrot.lane.b32.xlu1 %v5590_v46, %s5219_s20  ;;  %v4651_v35 = vpop.permute.xlu0 %4650  ;;  %4123 = vmatprep.subr.msk.bf16.mxu1 %vm5871_vm3, %v4122_v50 }
 0x1db   : > { %v1279_v5 = vsel %vm1256_vm0, %v4642_v34, %v4647_v3  ;;  %v1280_v45 = vsel %vm1256_vm0, %v4643_v58, %v4648_v44  ;;  %v1311_v62 = vsel %vm1256_vm0, %v4647_v3, %v4642_v34  ;;  %v1312_v9 = vsel %vm1256_vm0, %v4648_v44, %v4643_v58  ;;  %4126 = vmatpush2.bf16.msk.msra.mxu1 %vm5880_vm4, %v4125_v4 }
 0x1dc   : > { %v4131_v46 = vpack.c.bf16 %v1312_v9, %v1311_v62  ;;  %v4656_v48 = vpop.permute.xlu1 %4655  ;;  %4940 = vrot.lane.b32.xlu0 %v5566_v57, %s5218_s19  ;;  %v4128_v2 = vpack.c.bf16 %v1280_v45, %v1279_v5  ;;  %v4653_v31 = vunpack.i.h.bf16 %v4651_v35  ;;  %v4652_v27 = vunpack.i.l.bf16 %v4651_v35  ;;  %v5089_v5 = vld [vmem:[%s8023_s3 + $0x84] ss:$8 sps:$4 sm:$0xff]   ;;  %v5039_v62 = vld [vmem:[%s8023_s3 + $0x100] ss:$8 sps:$4 sm:$0xff]  }
 0x1dd   : > { %v4658_v29 = vunpack.i.h.bf16 %v4656_v48  ;;  %v4657_v54 = vunpack.i.l.bf16 %v4656_v48  ;;  %2229 = vmatprep.mubr.bf16.mxu0 %v5089_v5  ;;  %v5054_v5 = vld [vmem:[%s8023_s3 + $0x154] ss:$8 sps:$4 sm:$0xff]  }
 0x1de   : > { %4945 = vrot.lane.b32.xlu1 %v5568_v61, %s5218_s19  ;;  %v4661_v39 = vpop.permute.xlu0 %4660  ;;  %4129 = vmatprep.subr.msk.bf16.mxu1 %vm5871_vm3, %v4128_v2  ;;  %v2891_v2 = vld [vmem:[%s8024_s4 + $0x68] sm:$0xff] }
 0x1df   : > { %v1277_v6 = vsel %vm1256_vm0, %v4652_v27, %v4657_v54  ;;  %v1278_v18 = vsel %vm1256_vm0, %v4653_v31, %v4658_v29  ;;  %v1309_v17 = vsel %vm1256_vm0, %v4657_v54, %v4652_v27  ;;  %v1310_v47 = vsel %vm1256_vm0, %v4658_v29, %v4653_v31  ;;  %4132 = vmatpush2.bf16.msk.msra.mxu1 %vm5880_vm4, %v4131_v46  ;;  %v8089_v27 = vld [vmem:[#allocation18_spill] sm:$0xff] }
 0x1e0   : > { %v4137_v56 = vpack.c.bf16 %v1310_v47, %v1309_v17  ;;  %v4666_v26 = vpop.permute.xlu1 %4665  ;;  %4950 = vrot.lane.b32.xlu0 %v5566_v57, %s5219_s20  ;;  %v4134_v24 = vpack.c.bf16 %v1278_v18, %v1277_v6  ;;  %v4663_v52 = vunpack.i.h.bf16 %v4661_v39  ;;  %v4662_v22 = vunpack.i.l.bf16 %v4661_v39  ;;  %v5047_v54 = vld [vmem:[%s8023_s3 + $0x120] ss:$8 sps:$4 sm:$0xff]   ;;  %v2889_v6 = vld [vmem:[%s8024_s4 + $0x58] sm:$0xff] }
 0x1e1   : > { %v4668_v55 = vunpack.i.h.bf16 %v4666_v26  ;;  %v4667_v59 = vunpack.i.l.bf16 %v4666_v26  ;;  %v8090_v39 = vld [vmem:[#allocation19_spill] sm:$0xff]  ;;  %v5048_v18 = vld [vmem:[%s8023_s3 + $0x134] ss:$8 sps:$4 sm:$0xff]   ;;  %v8091_v47 = vld [vmem:[#allocation14_spill] sm:$0xff] }
 0x1e2   : > { %4955 = vrot.lane.b32.xlu1 %v5568_v61, %s5219_s20  ;;  %v4671_v49 = vpop.permute.xlu0 %4670  ;;  %4135 = vmatprep.subr.msk.bf16.mxu1 %vm5871_vm3, %v4134_v24  ;;  %v8092_v24 = vld [vmem:[#allocation15_spill] sm:$0xff] }
 0x1e3   : > { %v1275_v20 = vsel %vm1256_vm0, %v4662_v22, %v4667_v59  ;;  %v1276_v36 = vsel %vm1256_vm0, %v4663_v52, %v4668_v55  ;;  %v1307_v57 = vsel %vm1256_vm0, %v4667_v59, %v4662_v22  ;;  %v1308_v33 = vsel %vm1256_vm0, %v4668_v55, %v4663_v52  ;;  %4138 = vmatpush2.bf16.msk.msra.mxu1 %vm5880_vm4, %v4137_v56  ;;  %v2886_v56 = vld [vmem:[%s8024_s4 + $0x40] sm:$0xff]  ;;  %v2887_v52 = vld [vmem:[%s8024_s4 + $0x48] sm:$0xff]  ;;  %v2884_v59 = vld [vmem:[%s8024_s4 + $0x30] sm:$0xff] }
 0x1e4   : > { %v4143_v61 = vpack.c.bf16 %v1308_v33, %v1307_v57  ;;  %v4676_v60 = vpop.permute.xlu1 %4675  ;;  %4960 = vrot.lane.b32.xlu0 %v5534_v15, %s5218_s19  ;;  %v4140_v7 = vpack.c.bf16 %v1276_v36, %v1275_v20  ;;  %v4673_v1 = vunpack.i.h.bf16 %v4671_v49  ;;  %v4672_v10 = vunpack.i.l.bf16 %v4671_v49  ;;  %v8093_v55 = vld [vmem:[#allocation10_spill] sm:$0xff]  ;;  %v5050_v20 = vld [vmem:[%s8023_s3 + $0x130] ss:$8 sps:$4 sm:$0xff]   ;;  %v8094_v36 = vld [vmem:[#allocation11_spill] sm:$0xff] }
 0x1e5   : > { %v4678_v8 = vunpack.i.h.bf16 %v4676_v60  ;;  %v4677_v25 = vunpack.i.l.bf16 %v4676_v60  ;;  %v2885_v57 = vld [vmem:[%s8024_s4 + $0x38] sm:$0xff]  ;;  %v5051_v33 = vld [vmem:[%s8023_s3 + $0x144] ss:$8 sps:$4 sm:$0xff]  }
 0x1e6   : > { %4965 = vrot.lane.b32.xlu1 %v5544_v37, %s5218_s19  ;;  %v6110_v4 = vpop.permute.xlu0 %4680  ;;  %4141 = vmatprep.subr.msk.bf16.mxu1 %vm5871_vm3, %v4140_v7  ;;  %v8095_v60 = vld [vmem:[#allocation6_spill] sm:$0xff] }
 0x1e7   : > { %v1273_v11 = vsel %vm1256_vm0, %v4672_v10, %v4677_v25  ;;  %v1274_v50 = vsel %vm1256_vm0, %v4673_v1, %v4678_v8  ;;  %v1305_v58 = vsel %vm1256_vm0, %v4677_v25, %v4672_v10  ;;  %v1306_v34 = vsel %vm1256_vm0, %v4678_v8, %v4673_v1  ;;  %4144 = vmatpush2.bf16.msk.msra.mxu1 %vm5880_vm4, %v4143_v61  ;;  %v2882_v7 = vld [vmem:[%s8024_s4 + $0x20] sm:$0xff]  ;;  %v8096_v10 = vld [vmem:[#allocation7_spill] sm:$0xff] }
 0x1e8   : > { %v4149_v44 = vpack.c.bf16 %v1306_v34, %v1305_v58  ;;  %v6124_v3 = vpop.permute.xlu1 %4695  ;;  %4970 = vrot.lane.b32.xlu0 %v5534_v15, %s5219_s20  ;;  %v4146_v35 = vpack.c.bf16 %v1274_v50, %v1273_v11  ;;  %v5042_v15 = vld [vmem:[%s8023_s3 + $0x114] ss:$8 sps:$4 sm:$0xff]   ;;  %v2883_v8 = vld [vmem:[%s8024_s4 + $0x28] sm:$0xff]  ;;  %v8097_v11 = vld [vmem:[#allocation2_spill] sm:$0xff] }
 0x1e9   : > { %v2880_v50 = vld [vmem:[%s8024_s4 + $0x10] sm:$0xff]  ;;  %v5053_v34 = vld [vmem:[%s8023_s3 + $0x140] ss:$8 sps:$4 sm:$0xff]  }
 0x1ea   : > { %4975 = vrot.lane.b32.xlu1 %v5544_v37, %s5219_s20  ;;  %v6133_v45 = vpop.permute.xlu0 %4685  ;;  %4147 = vmatprep.subr.msk.bf16.mxu1 %vm5871_vm3, %v4146_v35  ;;  %v2881_v35 = vld [vmem:[%s8024_s4 + $0x18] sm:$0xff] }
 0x1eb   : > { %4150 = vmatpush2.bf16.msk.msra.mxu1 %vm5880_vm4, %v4149_v44  ;;  %v8098_v44 = vld [vmem:[#allocation3_spill] sm:$0xff] }
 0x1ec   : > { %v6145_v9 = vpop.permute.xlu1 %4705  ;;  %4980 = vrot.lane.b32.xlu0 %v5516_v16, %s5218_s19  ;;  %1694 = vmatprep.subr.bf16.mxu1 %v5699_v19  ;;  %v2892_v19 = vld [vmem:[%s8024_s4 + $0x70] sm:$0xff] }
 0x1ee   : > { %4985 = vrot.lane.b32.xlu1 %v5521_v42, %s5218_s19  ;;  %v6152_v37 = vpop.permute.xlu0 %4690  ;;  %1534 = vmatmul.mubr.bf16.vlgmr.msra.gmra.mxu1 %v5039_v62 }
 0x1ef   : > { %1695 = vmatpush1.bf16.msra.mxu1 %v5701_v51  ;;  %1543 = vmatprep.mubr.bf16.mxu1 %v5042_v15  ;;  %v5044_v51 = vld [vmem:[%s8023_s3 + $0x110] ss:$8 sps:$4 sm:$0xff]   ;;  %v2878_v15 = vld [vmem:[%s8024_s4] sm:$0xff] }
 0x1f0   : > { %v6155_v13 = vpop.permute.xlu1 %4715  ;;  %4990 = vrot.lane.b32.xlu0 %v5516_v16, %s5219_s20  ;;  %1696 = vmatprep.subr.bf16.mxu1 %v5703_v41  ;;  %v2893_v16 = vld [vmem:[%s8024_s4 + $0x78] sm:$0xff]  ;;  %v5045_v41 = vld [vmem:[%s8023_s3 + $0x124] ss:$8 sps:$4 sm:$0xff]  }
 0x1f2   : > { %4995 = vrot.lane.b32.xlu1 %v5521_v42, %s5219_s20  ;;  %v6165_v12 = vpop.permute.xlu0 %4700  ;;  %v2890_v42 = vld [vmem:[%s8024_s4 + $0x60] sm:$0xff] }
 0x1f3   : > { %1697 = vmatpush1.bf16.msra.mxu1 %v5705_v32  ;;  %v8088_v32 = vld [vmem:[#allocation22_spill] sm:$0xff] }
 0x1f4   : > { %v6177_v46 = vpop.permute.xlu1 %4725  ;;  %2966 = vperm.xlu0 %4517, %v2892_v19   ;;  %1698 = vmatprep.subr.bf16.mxu1 %v5667_v14  ;;  %v2888_v14 = vld [vmem:[%s8024_s4 + $0x50] sm:$0xff] }
 0x1f6   : > { %2971 = vperm.xlu1 %4518, %v2893_v16   ;;  %v6183_v48 = vpop.permute.xlu0 %4710  ;;  %1544 = vmatmul.mubr.bf16.gmra.mxu1 %v5044_v51  ;;  %v2879_v51 = vld [vmem:[%s8024_s4 + $0x8] sm:$0xff] }
 0x1f7   : > { %1699 = vmatpush1.bf16.msra.mxu1 %v8088_v32  ;;  %1553 = vmatprep.mubr.bf16.mxu1 %v5045_v41  ;;  %v4692_v32 = vunpack.i.l.bf16 %v6152_v37 }
 0x1f8   : > { %v6189_v31 = vpop.permute.xlu1 %4735  ;;  %2956 = vperm.xlu0 %4517, %v2890_v42   ;;  %1700 = vmatprep.subr.bf16.mxu1 %v8089_v27  ;;  %v4693_v42 = vunpack.i.h.bf16 %v6152_v37  ;;  %v4697_v37 = vunpack.i.l.bf16 %v6124_v3 }
 0x1fa   : > { %2961 = vperm.xlu1 %4518, %v2891_v2   ;;  %v6195_v29 = vpop.permute.xlu0 %4720  ;;  %v5057_v2 = vld [vmem:[%s8023_s3 + $0x164] ss:$8 sps:$4 sm:$0xff]  }
 0x1fb   : > { %1701 = vmatpush1.bf16.msra.mxu1 %v8090_v39  ;;  %v3098_v39 = vld [vmem:[%s8026_s6 + $0x60] sm:$0xff] }
 0x1fc   : > { %v6207_v17 = vpop.permute.xlu1 %4745  ;;  %2946 = vperm.xlu0 %4517, %v2888_v14   ;;  %1702 = vmatprep.subr.bf16.mxu1 %v8091_v47  ;;  %v4698_v14 = vunpack.i.h.bf16 %v6124_v3  ;;  %v1014_v3 = vand.u32 15, %v5830_v30  ;;  %v4708_v47 = vunpack.i.h.bf16 %v6145_v9  ;;  %v5090_v30 = vld [vmem:[%s8023_s3] ss:$8 sps:$4 sm:$0xff]  }
 0x1fe   : > { %2951 = vperm.xlu1 %4518, %v2889_v6   ;;  %v6213_v26 = vpop.permute.xlu0 %4730  ;;  %1554 = vmatmul.mubr.bf16.gmra.mxu1 %v5047_v54  ;;  %v4702_v54 = vunpack.i.l.bf16 %v6165_v12  ;;  %vm6421_vm8 = vcmp.ge.s32.totalorder %v1014_v3, 4  ;;  %v3095_v3 = vld [vmem:[%s8026_s6 + $0x48] sm:$0xff]  ;;  %v8115_v6 = vld [vmem:[#allocation8_spill] sm:$0xff] }
 0x1ff   : > { %1703 = vmatpush1.bf16.msra.mxu1 %v8092_v24  ;;  %1563 = vmatprep.mubr.bf16.mxu1 %v5048_v18  ;;  %v6324_v24 = vsel %vm1952_vm5, %v4697_v37, %v4692_v32  ;;  %vm6570_vm11 = vmpackc.low %vm6421_vm8, %vm6421_vm8 }
 0x200   : > { %v6219_v22 = vpop.permute.xlu1 %4755  ;;  %2936 = vperm.xlu0 %4517, %v2886_v56   ;;  %1704 = vmatprep.subr.bf16.mxu1 %v8093_v55  ;;  %v6320_v56 = vsel %vm1952_vm5, %v4698_v14, %v4693_v42  ;;  %vm2358_vm12 = vmand %vm6421_vm8, %vm5854_vm2 }
 0x201   : > { %vm6657_vm14 = vmpackc.low %vm2358_vm12, %vm2358_vm12 }
 0x202   : > { %2941 = vperm.xlu1 %4518, %v2887_v52   ;;  %v6225_v49 = vpop.permute.xlu0 %4740 }
 0x203   : > { %1705 = vmatpush1.bf16.msra.mxu1 %v8094_v36 }
 0x204   : > { %v6237_v61 = vpop.permute.xlu1 %4765  ;;  %2926 = vperm.xlu0 %4517, %v2884_v59   ;;  %1706 = vmatprep.subr.bf16.mxu1 %v8095_v60  ;;  %v6338_v59 = vsel %vm1952_vm5, %v4692_v32, %v4697_v37  ;;  %v4713_v60 = vunpack.i.h.bf16 %v6183_v48  ;;  %v4727_v32 = vunpack.i.l.bf16 %v6177_v46 }
 0x206   : > { %2931 = vperm.xlu1 %4518, %v2885_v57   ;;  %v6243_v1 = vpop.permute.xlu0 %4750  ;;  %1564 = vmatmul.mubr.bf16.gmra.mxu1 %v5050_v20 }
 0x207   : > { %1707 = vmatpush1.bf16.msra.mxu1 %v8096_v10  ;;  %1573 = vmatprep.mubr.bf16.mxu1 %v5051_v33 }
 0x208   : > { %v6249_v25 = vpop.permute.xlu1 %4775  ;;  %2916 = vperm.xlu0 %4517, %v2882_v7   ;;  %1708 = vmatprep.subr.bf16.mxu1 %v8097_v11  ;;  %v3096_v7 = vld [vmem:[%s8026_s6 + $0x50] sm:$0xff]  ;;  %v4717_v11 = vunpack.i.l.bf16 %v6155_v13 }
 0x209   : > { %v4778_v43 = vunpack.i.h.bf16 %v6249_v25 }
 0x20a   : > { %2921 = vperm.xlu1 %4518, %v2883_v8   ;;  %v6255_v58 = vpop.permute.xlu0 %4760  ;;  %v4718_v8 = vunpack.i.h.bf16 %v6155_v13  ;;  %v8100_v13 = vld [vmem:[#allocation21_spill] sm:$0xff] }
 0x20b   : > { %1709 = vmatpush1.bf16.msra.mxu1 %v8098_v44  ;;  %v5059_v44 = vld [vmem:[%s8023_s3 + $0x160] ss:$8 sps:$4 sm:$0xff]   ;;  %v4763_v52 = vunpack.i.h.bf16 %v6255_v58 }
 0x20c   : > { %v6267_v62 = vpop.permute.xlu1 %4785  ;;  %2906 = vperm.xlu0 %4517, %v2880_v50   ;;  %1710 = vmatprep.subr.bf16.mxu1 %v5707_v38  ;;  %v3100_v38 = vld [vmem:[%s8026_s6 + $0x70] sm:$0xff]  ;;  %v4712_v50 = vunpack.i.l.bf16 %v6183_v48  ;;  %v3097_v48 = vld [vmem:[%s8026_s6 + $0x58] sm:$0xff] }
 0x20e   : > { %2911 = vperm.xlu1 %4518, %v2881_v35   ;;  %v6273_v19 = vpop.permute.xlu0 %4770  ;;  %1574 = vmatmul.mubr.bf16.gmra.mxu1 %v5053_v34 }
 0x20f   : > { %1711 = vmatpush2.bf16.msra.mxu1 %v5709_v40  ;;  %1583 = vmatprep.mubr.bf16.mxu1 %v5054_v5  ;;  %v5056_v40 = vld [vmem:[%s8023_s3 + $0x150] ss:$8 sps:$4 sm:$0xff]  }
 0x210   : > { %v6279_v16 = vpop.permute.xlu1 %4795  ;;  %2896 = vperm.xlu0 %4517, %v2878_v15   ;;  %1712 = vmatprep.subr.bf16.mxu1 %v5713_v63  ;;  %v3101_v63 = vld [vmem:[%s8026_s6 + $0x78] sm:$0xff]  ;;  %v4723_v15 = vunpack.i.h.bf16 %v6195_v29 }
 0x212   : > { %2901 = vperm.xlu1 %4518, %v2879_v51   ;;  %v6285_v41 = vpop.permute.xlu0 %4780  ;;  %v5060_v51 = vld [vmem:[%s8023_s3 + $0x174] ss:$8 sps:$4 sm:$0xff]  }
 0x213   : > { %1713 = vmatpush2.bf16.msra.mxu1 %v5715_v28  ;;  %v4703_v28 = vunpack.i.h.bf16 %v6165_v12  ;;  %v4707_v12 = vunpack.i.l.bf16 %v6145_v9  ;;  %v6334_v9 = vsel %vm1952_vm5, %v4693_v42, %v4698_v14  ;;  %v4728_v42 = vunpack.i.h.bf16 %v6177_v46  ;;  %v8102_v14 = vld [vmem:[#allocation16_spill] sm:$0xff] }
 0x214   : > { %v6300_v27 = vpop.permute.xlu1 %4805  ;;  %3190 = vperm.xlu0 %4517, %v3100_v38   ;;  %1714 = vmatprep.subr.bf16.mxu1 %v5721_v21  ;;  %v1021_v21 = vand.u32 15, %v5837_v0  ;;  %v3099_v0 = vld [vmem:[%s8026_s6 + $0x68] sm:$0xff]  ;;  %v4733_v46 = vunpack.i.h.bf16 %v6213_v26  ;;  %v4758_v38 = vunpack.i.h.bf16 %v6219_v22 }
 0x215   : > { %v6346_v57 = vsel %vm2488_vm6, %v4708_v47, %v4703_v28  ;;  %v6350_v33 = vsel %vm2488_vm6, %v4707_v12, %v4702_v54  ;;  %v6368_v35 = vsel %vm2488_vm6, %v4703_v28, %v4708_v47  ;;  %v6372_v5 = vsel %vm2488_vm6, %v4702_v54, %v4707_v12 }
 0x216   : > { %3195 = vperm.xlu1 %4518, %v3101_v63   ;;  %v6312_v18 = vpop.permute.xlu0 %4790  ;;  %1584 = vmatmul.mubr.bf16.gmra.mxu1 %v5056_v40  ;;  %v4722_v63 = vunpack.i.l.bf16 %v6195_v29  ;;  %vm6392_vm7 = vcmp.ge.s32.totalorder %v1021_v21, 4  ;;  %v6398_v28 = vsel %vm1952_vm5, %v4713_v60, %v4718_v8  ;;  %v6402_v54 = vsel %vm1952_vm5, %v4718_v8, %v4713_v60 }
 0x217   : > { %1715 = vmatpush2.bf16.msra.mxu1 %v5727_v23  ;;  %1593 = vmatprep.mubr.bf16.mxu1 %v5057_v2  ;;  %v8099_v23 = vld [vmem:[#allocation20_spill] sm:$0xff]  ;;  %v4732_v29 = vunpack.i.l.bf16 %v6213_v26  ;;  %v6411_v21 = vsel %vm1952_vm5, %v4712_v50, %v4717_v11  ;;  %v6415_v47 = vsel %vm1952_vm5, %v4717_v11, %v4712_v50  ;;  %v4743_v12 = vunpack.i.h.bf16 %v6225_v49  ;;  %vm6540_vm9 = vmpackc.low %vm6392_vm7, %vm6392_vm7 }
 0x218   : > { %v6340_v20 = vpop.permute.xlu1 %4815  ;;  %3180 = vperm.xlu0 %4517, %v3098_v39   ;;  %1716 = vmatprep.subr.bf16.mxu1 %v8099_v23  ;;  %v3094_v39 = vld [vmem:[%s8026_s6 + $0x40] sm:$0xff]  ;;  %v4738_v60 = vunpack.i.h.bf16 %v6189_v31  ;;  %v6429_v8 = vsel %vm2488_vm6, %v4723_v15, %v4728_v42  ;;  %v6433_v11 = vsel %vm2488_vm6, %v4728_v42, %v4723_v15  ;;  %v6441_v50 = vsel %vm2488_vm6, %v4722_v63, %v4727_v32  ;;  %vm2359_vm10 = vmand %vm6392_vm7, %vm5850_vm1 }
 0x219   : > { %v4747_v15 = vunpack.i.l.bf16 %v6207_v17  ;;  %vm6623_vm13 = vmpackc.low %vm2359_vm10, %vm2359_vm10 }
 0x21a   : > { %3185 = vperm.xlu1 %4518, %v3099_v0   ;;  %v6361_v34 = vpop.permute.xlu0 %4800  ;;  %v4742_v0 = vunpack.i.l.bf16 %v6225_v49  ;;  %v8107_v49 = vld [vmem:[#allocation17_spill] sm:$0xff]  ;;  %v6456_v42 = vsel %vm1952_vm5, %v4738_v60, %v4733_v46 }
 0x21b   : > { %1717 = vmatpush2.bf16.msra.mxu1 %v8100_v13 }
 0x21c   : > { %v6389_v2 = vpop.permute.xlu1 %4825  ;;  %3170 = vperm.xlu0 %4517, %v3096_v7   ;;  %1718 = vmatprep.subr.bf16.mxu1 %v8102_v14  ;;  %v4737_v7 = vunpack.i.l.bf16 %v6189_v31  ;;  %v6445_v31 = vsel %vm2488_vm6, %v4727_v32, %v4722_v63  ;;  %v6469_v14 = vsel %vm1952_vm5, %v4733_v46, %v4738_v60  ;;  %v5062_v46 = vld [vmem:[%s8023_s3 + $0x170] ss:$8 sps:$4 sm:$0xff]   ;;  %v6511_v55 = vsel %vm2488_vm6, %v4742_v0, %v4747_v15 }
 0x21d   : > { %8101 = vst [vmem:[#allocation22_spill] sm:$0xff] %v6389_v2  ;;  %8114 = vst [vmem:[#allocation10_spill] sm:$0xff] %v6511_v55  ;;  %v4757_v63 = vunpack.i.l.bf16 %v6219_v22  ;;  %v4768_v60 = vunpack.i.h.bf16 %v6237_v61  ;;  %v8124_v2 = vld [vmem:[#allocation4_spill] sm:$0xff] }
 0x21e   : > { %3175 = vperm.xlu1 %4518, %v3097_v48   ;;  %v6419_v23 = vpop.permute.xlu0 %4810  ;;  %1594 = vmatmul.mubr.bf16.gmra.mxu1 %v5059_v44  ;;  %v4748_v44 = vunpack.i.h.bf16 %v6207_v17  ;;  %v8109_v48 = vld [vmem:[#allocation12_spill] sm:$0xff]  ;;  %v6460_v32 = vsel %vm1952_vm5, %v4737_v7, %v4732_v29 }
 0x21f   : > { %1719 = vmatpush2.bf16.msra.mxu1 %v8107_v49  ;;  %1603 = vmatprep.mubr.bf16.mxu1 %v5060_v51  ;;  %v3092_v17 = vld [vmem:[%s8026_s6 + $0x30] sm:$0xff]  ;;  %v3093_v51 = vld [vmem:[%s8026_s6 + $0x38] sm:$0xff] }
 0x220   : > { %v6449_v13 = vpop.permute.xlu1 %4845  ;;  %3160 = vperm.xlu0 %4517, %v3094_v39   ;;  %1720 = vmatprep.subr.bf16.mxu1 %v8109_v48  ;;  %v6473_v39 = vsel %vm1952_vm5, %v4732_v29, %v4737_v7  ;;  %v6477_v49 = vsel %vm2488_vm6, %v4748_v44, %v4743_v12  ;;  %v6481_v48 = vsel %vm2488_vm6, %v4747_v15, %v4742_v0  ;;  %v4753_v29 = vunpack.i.h.bf16 %v6243_v1  ;;  %v8112_v7 = vld [vmem:[#allocation13_spill] sm:$0xff] }
 0x221   : > { %8108 = vst [vmem:[#allocation18_spill] sm:$0xff] %v6449_v13  ;;  %8110 = vst [vmem:[#allocation19_spill] sm:$0xff] %v6477_v49  ;;  %v4767_v0 = vunpack.i.l.bf16 %v6237_v61  ;;  %v4752_v15 = vunpack.i.l.bf16 %v6243_v1  ;;  %v4762_v13 = vunpack.i.l.bf16 %v6255_v58  ;;  %v3091_v61 = vld [vmem:[%s8026_s6 + $0x28] sm:$0xff] }
 0x222   : > { %8111 = vst [vmem:[#allocation14_spill] sm:$0xff] %v6481_v48  ;;  %3165 = vperm.xlu1 %4518, %v3095_v3   ;;  %v6483_v40 = vpop.permute.xlu0 %4820  ;;  %v5065_v3 = vld [vmem:[%s8023_s3 + $0x184] ss:$8 sps:$4 sm:$0xff]   ;;  %v6529_v10 = vsel %vm1952_vm5, %v4753_v29, %v4758_v38  ;;  %v8117_v48 = vld [vmem:[#allocation9_spill] sm:$0xff]  ;;  %v5087_v1 = vld [vmem:[%s8023_s3 + $0x80] ss:$8 sps:$4 sm:$0xff]  }
 0x223   : > { %1721 = vmatpush2.bf16.msra.mxu1 %v8112_v7  ;;  %v6507_v7 = vsel %vm2488_vm6, %v4743_v12, %v4748_v44  ;;  %v3090_v12 = vld [vmem:[%s8026_s6 + $0x20] sm:$0xff] }
 0x224   : > { %8113 = vst [vmem:[#allocation15_spill] sm:$0xff] %v6507_v7  ;;  %v4856_v36 = vpop.permute.xlu1 %4855  ;;  %3150 = vperm.xlu0 %4517, %v3092_v17   ;;  %1722 = vmatprep.subr.bf16.mxu1 %v8115_v6 }
 0x225   : > { %v4858_v17 = vunpack.i.h.bf16 %v4856_v36  ;;  %v4857_v6 = vunpack.i.l.bf16 %v4856_v36 }
 0x226   : > { %3155 = vperm.xlu1 %4518, %v3093_v51   ;;  %v6525_v22 = vpop.permute.xlu0 %4830  ;;  %1604 = vmatmul.mubr.bf16.gmra.mxu1 %v5062_v46  ;;  %v8120_v51 = vunpack.i.l.bf16 %v6110_v4 }
 0x227   : > { %8116 = vst [vmem:[#allocation11_spill] sm:$0xff] %v6525_v22  ;;  %1723 = vmatpush2.bf16.msra.mxu1 %v8117_v48  ;;  %1726 = vmatprep.mubr.bf16.mxu1 %v5065_v3  ;;  %v8121_v48 = vunpack.i.h.bf16 %v6110_v4  ;;  %v5096_v4 = vld [vmem:[%s8023_s3 + $0x14] ss:$8 sps:$4 sm:$0xff]  }
 0x228   : > { %v1967_v58 = vsel %vm1952_vm5, %v8120_v51, %v4857_v6  ;;  %v8122_v44 = vmov %v8120_v51  ;;  %v4861_v49 = vpop.permute.xlu1 %4860  ;;  %3140 = vperm.xlu0 %4517, %v3090_v12   ;;  %1724 = vmatprep.subr.bf16.mxu1 %v8124_v2  ;;  %v6576_v12 = vsel %vm1952_vm5, %v4758_v38, %v4753_v29  ;;  %v8127_v38 = vunpack.i.l.bf16 %v6133_v45 }
 0x229   : > { %v1968_v46 = vsel %vm1952_vm5, %v8121_v48, %v4858_v17  ;;  %v1999_v22 = vsel %vm1952_vm5, %v4857_v6, %v8122_v44  ;;  %v8123_v3 = vmov %v8121_v48  ;;  %v4863_v48 = vunpack.i.h.bf16 %v4861_v49  ;;  %v3088_v6 = vld [vmem:[%s8026_s6 + $0x10] sm:$0xff] }
 0x22a   : > { %v2000_v36 = vsel %vm1952_vm5, %v4858_v17, %v8123_v3  ;;  %v4200_v51 = vpack.c.bf16 %v1968_v46, %v1967_v58  ;;  %v4862_v7 = vunpack.i.l.bf16 %v4861_v49  ;;  %v6580_v44 = vsel %vm1952_vm5, %v4757_v63, %v4752_v15  ;;  %3145 = vperm.xlu1 %4518, %v3091_v61   ;;  %v6584_v2 = vpop.permute.xlu0 %4835  ;;  %v5063_v3 = vld [vmem:[%s8023_s3 + $0x180] ss:$8 sps:$4 sm:$0xff]  }
 0x22b   : > { %v4203_v55 = vpack.c.bf16 %v2000_v36, %v1999_v22  ;;  %v4773_v17 = vunpack.i.h.bf16 %v6273_v19  ;;  %v4772_v49 = vunpack.i.l.bf16 %v6273_v19  ;;  %v8128_v22 = vunpack.i.h.bf16 %v6133_v45  ;;  %v5095_v45 = vld [vmem:[%s8023_s3 + $0x90] ss:$8 sps:$4 sm:$0xff]  }
 0x22c   : > { %v2503_v29 = vsel %vm2488_vm6, %v8127_v38, %v4862_v7  ;;  %v8129_v61 = vmov %v8127_v38  ;;  %4201 = vmatprep.subr.msk.bf16.mxu0 %vm6540_vm9, %v4200_v51  ;;  %v3089_v38 = vld [vmem:[%s8026_s6 + $0x18] sm:$0xff]  ;;  %v6634_v37 = vpop.permute.xlu1 %4865  ;;  %3130 = vperm.xlu0 %4517, %v3088_v6   ;;  %v6665_v6 = vsel %vm2488_vm6, %v4763_v52, %v4768_v60 }
 0x22d   : > { %v2504_v19 = vsel %vm2488_vm6, %v8128_v22, %v4863_v48  ;;  %v2535_v36 = vsel %vm2488_vm6, %v4862_v7, %v8129_v61  ;;  %v8130_v58 = vmov %v8128_v22  ;;  %v6629_v7 = vsel %vm1952_vm5, %v4752_v15, %v4757_v63  ;;  %v8133_v22 = vld [vmem:[#allocation5_spill] sm:$0xff]  ;;  %4204 = vmatpush1.bf16.msk.msra.mxu0 %vm6570_vm11, %v4203_v55 }
 0x22e   : > { %v2536_v46 = vsel %vm2488_vm6, %v4863_v48, %v8130_v58  ;;  %v4312_v51 = vpack.c.bf16 %v2504_v19, %v2503_v29  ;;  %1725 = vmatpush2.bf16.msra.mxu1 %v8133_v22  ;;  %v4777_v61 = vunpack.i.l.bf16 %v6249_v25  ;;  %v6640_v58 = vsel %vm2488_vm6, %v4768_v60, %v4763_v52  ;;  %3135 = vperm.xlu1 %4518, %v3089_v38   ;;  %v5098_v25 = vld [vmem:[%s8023_s3 + $0x10] ss:$8 sps:$4 sm:$0xff]  }
 0x22f   : > { %v4315_v48 = vpack.c.bf16 %v2536_v46, %v2535_v36  ;;  %v6644_v63 = vsel %vm2488_vm6, %v4767_v0, %v4762_v13  ;;  %v8134_v15 = vpack.c.bf16 %v6334_v9, %v6338_v59  ;;  %v4227_v55 = vpack.c.bf16 %v6576_v12, %v6580_v44  ;;  %v6671_v59 = vpop.permute.xlu0 %4840 }
 0x230   : > { %v6669_v9 = vsel %vm2488_vm6, %v4762_v13, %v4767_v0  ;;  %4313 = vmatprep.subr.msk.bf16.mxu1 %vm6623_vm13, %v4312_v51  ;;  %v6680_v26 = vsel %vm1952_vm5, %v4773_v17, %v4778_v43  ;;  %v6684_v52 = vsel %vm1952_vm5, %v4772_v49, %v4777_v61  ;;  %v4783_v13 = vunpack.i.h.bf16 %v6285_v41  ;;  %v5066_v0 = vld [vmem:[%s8023_s3 + $0x194] ss:$8 sps:$4 sm:$0xff]   ;;  %3120 = vperm.xlu0 %4517, %v3086_v53  }
 0x231   : > { %4207 = vmatprep.subr.msk.bf16.mxu0 %vm6540_vm9, %v8134_v15  ;;  %v4782_v60 = vunpack.i.l.bf16 %v6285_v41  ;;  %1727 = vmatmul.mubr.bf16.vlgmr.msra.gmra.mxu1 %v5063_v3  ;;  %v4339_v29 = vpack.c.bf16 %v6640_v58, %v6644_v63  ;;  %v4788_v19 = vunpack.i.h.bf16 %v6267_v62  ;;  %v4787_v36 = vunpack.i.l.bf16 %v6267_v62  ;;  %v6702_v41 = vpop.permute.xlu1 %4875  ;;  %v3087_v3 = vld [vmem:[%s8026_s6 + $0x8] sm:$0xff] }
 0x232   : > { %v8137_v46 = vpack.c.bf16 %v6320_v56, %v6324_v24  ;;  %4316 = vmatpush1.bf16.msk.msra.mxu1 %vm6657_vm14, %v4315_v48  ;;  %v4224_v38 = vpack.c.bf16 %v6529_v10, %v6629_v7  ;;  %v6711_v62 = vsel %vm1952_vm5, %v4778_v43, %v4773_v17  ;;  %v6715_v56 = vsel %vm1952_vm5, %v4777_v61, %v4772_v49  ;;  %v3116_v43 = vld [vmem:[%s8026_s6 + $0xf0] sm:$0xff] }
 0x233   : > { %v4793_v24 = vunpack.i.h.bf16 %v6312_v18  ;;  %v4792_v51 = vunpack.i.l.bf16 %v6312_v18  ;;  %v4230_v48 = vpack.c.bf16 %v6680_v26, %v6684_v52  ;;  %v4798_v22 = vunpack.i.h.bf16 %v6279_v16  ;;  %v6733_v18 = vpop.permute.xlu0 %4850  ;;  %3125 = vperm.xlu1 %4518, %v3087_v3   ;;  %1736 = vmatprep.mubr.bf16.mxu1 %v5066_v0  ;;  %v5068_v61 = vld [vmem:[%s8023_s3 + $0x190] ss:$8 sps:$4 sm:$0xff]  }
 0x234   : > { %4210 = vmatpush1.bf16.msk.msra.mxu0 %vm6570_vm11, %v8137_v46  ;;  %v4797_v15 = vunpack.i.l.bf16 %v6279_v16  ;;  %v8138_v17 = vpack.c.bf16 %v6398_v28, %v6411_v21  ;;  %v8139_v49 = vpack.c.bf16 %v6368_v35, %v6372_v5  ;;  %v4336_v16 = vpack.c.bf16 %v6665_v6, %v6669_v9  ;;  %3270 = vperm.xlu0 %4517, %v3116_v43   ;;  %v5072_v6 = vld [vmem:[%s8023_s3 + $0x1b4] ss:$8 sps:$4 sm:$0xff]  }
 0x235   : > { %v6742_v28 = vsel %vm2488_vm6, %v4783_v13, %v4788_v19  ;;  %v6746_v21 = vsel %vm2488_vm6, %v4782_v60, %v4787_v36  ;;  %v4803_v35 = vunpack.i.h.bf16 %v6361_v34  ;;  %v4802_v5 = vunpack.i.l.bf16 %v6361_v34  ;;  %v6773_v3 = vpop.permute.xlu1 %4885 }
 0x236   : > { %4213 = vmatprep.subr.msk.bf16.mxu0 %vm6540_vm9, %v8138_v17  ;;  %4319 = vmatprep.subr.msk.bf16.mxu1 %vm6623_vm13, %v8139_v49  ;;  %v4233_v53 = vpack.c.bf16 %v6711_v62, %v6715_v56  ;;  %v6757_v46 = vsel %vm2488_vm6, %v4788_v19, %v4783_v13  ;;  %v6761_v17 = vsel %vm2488_vm6, %v4787_v36, %v4782_v60  ;;  %v3117_v13 = vld [vmem:[%s8026_s6 + $0xf8] sm:$0xff]  ;;  %v4808_v60 = vunpack.i.h.bf16 %v6300_v27 }
 0x237   : > { %v8140_v34 = vpack.c.bf16 %v6402_v54, %v6415_v47  ;;  %v8141_v0 = vpack.c.bf16 %v6346_v57, %v6350_v33  ;;  %v4807_v19 = vunpack.i.l.bf16 %v6300_v27  ;;  %v6782_v54 = vsel %vm1952_vm5, %v4793_v24, %v4798_v22  ;;  %v6808_v43 = vpop.permute.xlu0 %4870  ;;  %3275 = vperm.xlu1 %4518, %v3117_v13   ;;  %v3115_v13 = vld [vmem:[%s8026_s6 + $0xe8] sm:$0xff] }
 0x238   : > { %v6786_v57 = vsel %vm1952_vm5, %v4792_v51, %v4797_v15  ;;  %v4342_v33 = vpack.c.bf16 %v6742_v28, %v6746_v21  ;;  %v6792_v47 = vsel %vm1952_vm5, %v4798_v22, %v4793_v24  ;;  %v6796_v36 = vsel %vm1952_vm5, %v4797_v15, %v4792_v51  ;;  %v3114_v24 = vld [vmem:[%s8026_s6 + $0xe0] sm:$0xff]  ;;  %v5074_v28 = vld [vmem:[%s8023_s3 + $0x1b0] ss:$8 sps:$4 sm:$0xff]  }
 0x239   : > { %4216 = vmatpush1.bf16.msk.msra.mxu0 %vm6570_vm11, %v8140_v34  ;;  %4322 = vmatpush1.bf16.msk.msra.mxu1 %vm6657_vm14, %v8141_v0  ;;  %v8142_v27 = vpack.c.bf16 %v6469_v14, %v6473_v39  ;;  %v8143_v49 = vpack.c.bf16 %v6429_v8, %v6441_v50  ;;  %v6815_v51 = vsel %vm2488_vm6, %v4803_v35, %v4808_v60  ;;  %v4813_v39 = vunpack.i.h.bf16 %v6419_v23  ;;  %v5069_v50 = vld [vmem:[%s8023_s3 + $0x1a4] ss:$8 sps:$4 sm:$0xff]  }
 0x23a   : > { %v6819_v14 = vsel %vm2488_vm6, %v4802_v5, %v4807_v19  ;;  %v4812_v8 = vunpack.i.l.bf16 %v6419_v23  ;;  %1737 = vmatmul.mubr.bf16.gmra.mxu1 %v5068_v61  ;;  %v4236_v15 = vpack.c.bf16 %v6782_v54, %v6786_v57  ;;  %v4823_v34 = vunpack.i.h.bf16 %v6483_v40  ;;  %v6842_v61 = vpop.permute.xlu1 %4895  ;;  %3260 = vperm.xlu0 %4517, %v3114_v24  }
 0x23b   : > { %4219 = vmatprep.subr.msk.bf16.mxu0 %vm6540_vm9, %v8142_v27  ;;  %4325 = vmatprep.subr.msk.bf16.mxu1 %vm6623_vm13, %v8143_v49  ;;  %v4822_v0 = vunpack.i.l.bf16 %v6483_v40  ;;  %v8144_v27 = vpack.c.bf16 %v6456_v42, %v6460_v32  ;;  %v8145_v23 = vpack.c.bf16 %v6433_v11, %v6445_v31  ;;  %v4239_v40 = vpack.c.bf16 %v6792_v47, %v6796_v36 }
 0x23c   : > { %v4818_v42 = vunpack.i.h.bf16 %v6340_v20  ;;  %v4817_v32 = vunpack.i.l.bf16 %v6340_v20  ;;  %v6853_v49 = vsel %vm2488_vm6, %v4808_v60, %v4803_v35  ;;  %v6857_v11 = vsel %vm2488_vm6, %v4807_v19, %v4802_v5  ;;  %v8147_v20 = vld [vmem:[#allocation15_spill] sm:$0xff]  ;;  %v8148_v35 = vld [vmem:[#allocation10_spill] sm:$0xff]  ;;  %v6873_v5 = vpop.permute.xlu0 %4880  ;;  %v3112_v19 = vld [vmem:[%s8026_s6 + $0xd0] sm:$0xff]  ;;  %3265 = vperm.xlu1 %4518, %v3115_v13   ;;  %1746 = vmatprep.mubr.bf16.mxu1 %v5069_v50 }
 0x23d   : > { %4222 = vmatpush1.bf16.msk.msra.mxu0 %vm6570_vm11, %v8144_v27  ;;  %4328 = vmatpush1.bf16.msk.msra.mxu1 %vm6657_vm14, %v8145_v23  ;;  %v8146_v27 = vld [vmem:[#allocation22_spill] sm:$0xff]  ;;  %v8149_v60 = vpack.c.bf16 %v8147_v20, %v8148_v35  ;;  %v8150_v50 = vld [vmem:[#allocation19_spill] sm:$0xff]  ;;  %v3113_v35 = vld [vmem:[%s8026_s6 + $0xd8] sm:$0xff]  ;;  %v4842_v44 = vunpack.i.l.bf16 %v6671_v59  ;;  %v4838_v54 = vunpack.i.h.bf16 %v6584_v2  ;;  %v4837_v57 = vunpack.i.l.bf16 %v6584_v2 }
 0x23e   : > { %v4828_v23 = vunpack.i.h.bf16 %v8146_v27  ;;  %v4827_v22 = vunpack.i.l.bf16 %v8146_v27  ;;  %4225 = vmatprep.subr.msk.bf16.mxu0 %vm6540_vm9, %v4224_v38  ;;  %v6880_v24 = vsel %vm1952_vm5, %v4813_v39, %v4818_v42  ;;  %v6884_v10 = vsel %vm1952_vm5, %v4818_v42, %v4813_v39  ;;  %v5071_v38 = vld [vmem:[%s8023_s3 + $0x1a0] ss:$8 sps:$4 sm:$0xff]   ;;  %3250 = vperm.xlu0 %4517, %v3112_v19  }
 0x23f   : > { %4331 = vmatprep.subr.msk.bf16.mxu1 %vm6623_vm13, %v8149_v60  ;;  %v6888_v7 = vsel %vm1952_vm5, %v4812_v8, %v4817_v32  ;;  %v6895_v27 = vsel %vm1952_vm5, %v4817_v32, %v4812_v8  ;;  %v4843_v42 = vunpack.i.h.bf16 %v6671_v59  ;;  %v8151_v13 = vld [vmem:[#allocation14_spill] sm:$0xff]  ;;  %v6916_v32 = vpop.permute.xlu1 %4905  ;;  %v3111_v19 = vld [vmem:[%s8026_s6 + $0xc8] sm:$0xff]  ;;  %v4888_v36 = vunpack.i.h.bf16 %v6773_v3 }
 0x240   : > { %v6899_v20 = vsel %vm2488_vm6, %v4823_v34, %v4828_v23  ;;  %v6903_v39 = vsel %vm2488_vm6, %v4822_v0, %v4827_v22  ;;  %v8152_v8 = vpack.c.bf16 %v8150_v50, %v8151_v13  ;;  %v6923_v60 = vsel %vm2488_vm6, %v4828_v23, %v4823_v34  ;;  %v6947_v59 = vpop.permute.xlu0 %4890  ;;  %3255 = vperm.xlu1 %4518, %v3113_v35  }
 0x241   : > { %4228 = vmatpush1.bf16.msk.msra.mxu0 %vm6570_vm11, %v4227_v55  ;;  %v6927_v12 = vsel %vm2488_vm6, %v4827_v22, %v4822_v0  ;;  %v4853_v55 = vunpack.i.h.bf16 %v6733_v18  ;;  %v4351_v50 = vpack.c.bf16 %v6853_v49, %v6857_v11  ;;  %v4242_v13 = vpack.c.bf16 %v6880_v24, %v6888_v7  ;;  %v3110_v22 = vld [vmem:[%s8026_s6 + $0xc0] sm:$0xff] }
 0x242   : > { %4334 = vmatpush1.bf16.msk.msra.mxu1 %vm6657_vm14, %v8152_v8  ;;  %v8153_v8 = vld [vmem:[#allocation18_spill] sm:$0xff]  ;;  %v4852_v34 = vunpack.i.l.bf16 %v6733_v18  ;;  %4231 = vmatprep.subr.msk.bf16.mxu0 %vm6540_vm9, %v4230_v48  ;;  %v4245_v18 = vpack.c.bf16 %v6884_v10, %v6895_v27  ;;  %v4354_v52 = vpack.c.bf16 %v6899_v20, %v6903_v39  ;;  %v4868_v48 = vunpack.i.h.bf16 %v6634_v37 }
 0x243   : > { %v4848_v31 = vunpack.i.h.bf16 %v8153_v8  ;;  %4337 = vmatprep.subr.msk.bf16.mxu1 %vm6623_vm13, %v4336_v16  ;;  %v4847_v26 = vunpack.i.l.bf16 %v8153_v8  ;;  %1747 = vmatmul.mubr.bf16.gmra.mxu1 %v5071_v38  ;;  %v4357_v9 = vpack.c.bf16 %v6923_v60, %v6927_v12  ;;  %v4867_v16 = vunpack.i.l.bf16 %v6634_v37  ;;  %v6982_v37 = vpop.permute.xlu1 %4915  ;;  %v3108_v38 = vld [vmem:[%s8026_s6 + $0xb0] sm:$0xff]  ;;  %v5075_v49 = vld [vmem:[%s8023_s3 + $0x1c4] ss:$8 sps:$4 sm:$0xff]  }
 0x244   : > { %v6997_v58 = vsel %vm2488_vm6, %v4853_v55, %v4868_v48  ;;  %v7001_v63 = vsel %vm2488_vm6, %v4868_v48, %v4853_v55  ;;  %3240 = vperm.xlu0 %4517, %v3110_v22   ;;  %v4872_v24 = vunpack.i.l.bf16 %v6808_v43  ;;  %v7023_v7 = vpop.permute.xlu0 %4900  ;;  %3245 = vperm.xlu1 %4518, %v3111_v19   ;;  %v8155_v55 = vpack.c.bf16 %v6757_v46, %v6761_v17 }
 0x245   : > { %v6966_v0 = vsel %vm1952_vm5, %v4843_v42, %v4848_v31  ;;  %v6970_v23 = vsel %vm1952_vm5, %v4848_v31, %v4843_v42  ;;  %4234 = vmatpush1.bf16.msk.msra.mxu0 %vm6570_vm11, %v4233_v53  ;;  %v6989_v31 = vsel %vm1952_vm5, %v4842_v44, %v4847_v26  ;;  %v6993_v62 = vsel %vm1952_vm5, %v4847_v26, %v4842_v44  ;;  %v8154_v42 = vld [vmem:[#allocation11_spill] sm:$0xff] }
 0x246   : > { %4340 = vmatpush1.bf16.msk.msra.mxu1 %vm6657_vm14, %v4339_v29  ;;  %v7005_v29 = vsel %vm2488_vm6, %v4852_v34, %v4867_v16  ;;  %v7009_v56 = vsel %vm2488_vm6, %v4867_v16, %v4852_v34  ;;  %v4873_v53 = vunpack.i.h.bf16 %v6808_v43  ;;  %4237 = vmatprep.subr.msk.bf16.mxu0 %vm6540_vm9, %v4236_v15  ;;  %v4833_v43 = vunpack.i.h.bf16 %v8154_v42  ;;  %v3109_v34 = vld [vmem:[%s8026_s6 + $0xb8] sm:$0xff] }
 0x247   : > { %4343 = vmatprep.subr.msk.bf16.mxu1 %vm6623_vm13, %v4342_v33  ;;  %v4832_v35 = vunpack.i.l.bf16 %v8154_v42  ;;  %1756 = vmatprep.mubr.bf16.mxu1 %v5072_v6  ;;  %v4254_v21 = vpack.c.bf16 %v6966_v0, %v6989_v31  ;;  %v4257_v33 = vpack.c.bf16 %v6970_v23, %v6993_v62  ;;  %v4878_v15 = vunpack.i.h.bf16 %v6702_v41  ;;  %v4926_v8 = vpop.permute.xlu1 %4925  ;;  %v3107_v42 = vld [vmem:[%s8026_s6 + $0xa8] sm:$0xff] }
 0x248   : > { %v4877_v44 = vunpack.i.l.bf16 %v6702_v41  ;;  %v4366_v41 = vpack.c.bf16 %v6997_v58, %v7005_v29  ;;  %v4369_v47 = vpack.c.bf16 %v7001_v63, %v7009_v56  ;;  %3230 = vperm.xlu0 %4517, %v3108_v38   ;;  %v4928_v22 = vunpack.i.h.bf16 %v4926_v8  ;;  %3235 = vperm.xlu1 %4518, %v3109_v34   ;;  %v5080_v29 = vld [vmem:[%s8023_s3 + $0x1d0] ss:$8 sps:$4 sm:$0xff]  }
 0x249   : > { %4240 = vmatpush1.bf16.msk.msra.mxu0 %vm6570_vm11, %v4239_v40  ;;  %v4887_v40 = vunpack.i.l.bf16 %v6773_v3  ;;  %v7062_v46 = vsel %vm1952_vm5, %v4873_v53, %v4878_v15  ;;  %v4927_v26 = vunpack.i.l.bf16 %v4926_v8  ;;  %v8156_v48 = vpack.c.bf16 %v6815_v51, %v6819_v14  ;;  %v7075_v3 = vpop.permute.xlu0 %4910  ;;  %v3106_v51 = vld [vmem:[%s8026_s6 + $0xa0] sm:$0xff] }
 0x24a   : > { %4346 = vmatpush1.bf16.msk.msra.mxu1 %vm6657_vm14, %v8155_v55  ;;  %v7066_v17 = vsel %vm1952_vm5, %v4872_v24, %v4877_v44  ;;  %4243 = vmatprep.subr.msk.bf16.mxu0 %vm6540_vm9, %v4242_v13  ;;  %v7079_v6 = vsel %vm1952_vm5, %v4878_v15, %v4873_v53  ;;  %v7083_v16 = vsel %vm1952_vm5, %v4877_v44, %v4872_v24  ;;  %v4883_v19 = vunpack.i.h.bf16 %v6873_v5 }
 0x24b   : > { %4349 = vmatprep.subr.msk.bf16.mxu1 %vm6623_vm13, %v8156_v48  ;;  %v4882_v13 = vunpack.i.l.bf16 %v6873_v5  ;;  %1757 = vmatmul.mubr.bf16.gmra.mxu1 %v5074_v28  ;;  %v1983_v14 = vsel %vm1952_vm5, %v4832_v35, %v4927_v26  ;;  %v1984_v53 = vsel %vm1952_vm5, %v4833_v43, %v4928_v22  ;;  %v2015_v24 = vsel %vm1952_vm5, %v4927_v26, %v4832_v35  ;;  %v4931_v5 = vpop.permute.xlu1 %4930  ;;  %v5077_v26 = vld [vmem:[%s8023_s3 + $0x1c0] ss:$8 sps:$4 sm:$0xff]  }
 0x24c   : > { %v2016_v38 = vsel %vm1952_vm5, %v4928_v22, %v4833_v43  ;;  %v4260_v28 = vpack.c.bf16 %v7062_v46, %v7066_v17  ;;  %v4898_v15 = vunpack.i.h.bf16 %v6842_v61  ;;  %v4248_v35 = vpack.c.bf16 %v1984_v53, %v1983_v14  ;;  %3220 = vperm.xlu0 %4517, %v3106_v51   ;;  %3225 = vperm.xlu1 %4518, %v3107_v42   ;;  %v3105_v22 = vld [vmem:[%s8026_s6 + $0x98] sm:$0xff]  ;;  %v3103_v42 = vld [vmem:[%s8026_s6 + $0x88] sm:$0xff]  ;;  %v3669_v46 = vld [vmem:[%s8028_s8] sm:$0xff] }
 0x24d   : > { %4246 = vmatpush1.bf16.msk.msra.mxu0 %vm6570_vm11, %v4245_v18  ;;  %v4251_v44 = vpack.c.bf16 %v2016_v38, %v2015_v24  ;;  %v4893_v10 = vunpack.i.h.bf16 %v6947_v59  ;;  %v4892_v27 = vunpack.i.l.bf16 %v6947_v59  ;;  %v4933_v18 = vunpack.i.h.bf16 %v4931_v5  ;;  %v7121_v55 = vpop.permute.xlu0 %4920  ;;  %1766 = vmatprep.mubr.bf16.mxu1 %v5075_v49  ;;  %v5078_v53 = vld [vmem:[%s8023_s3 + $0x1d4] ss:$8 sps:$4 sm:$0xff]  }
 0x24e   : > { %4352 = vmatpush1.bf16.msk.msra.mxu1 %vm6657_vm14, %v4351_v50  ;;  %v4932_v43 = vunpack.i.l.bf16 %v4931_v5  ;;  %v4897_v11 = vunpack.i.l.bf16 %v6842_v61  ;;  %v7129_v50 = vsel %vm2488_vm6, %v4883_v19, %v4888_v36  ;;  %v7133_v59 = vsel %vm2488_vm6, %v4888_v36, %v4883_v19  ;;  %4249 = vmatprep.subr.msk.bf16.mxu0 %vm6540_vm9, %v4248_v35  ;;  %v3104_v61 = vld [vmem:[%s8026_s6 + $0x90] sm:$0xff] }
 0x24f   : > { %4355 = vmatprep.subr.msk.bf16.mxu1 %vm6623_vm13, %v4354_v52  ;;  %v7137_v20 = vsel %vm2488_vm6, %v4882_v13, %v4887_v40  ;;  %v2520_v52 = vsel %vm2488_vm6, %v4838_v54, %v4933_v18  ;;  %v2552_v34 = vsel %vm2488_vm6, %v4933_v18, %v4838_v54  ;;  %v7158_v36 = vpop.permute.xlu1 %4935  ;;  %v4903_v2 = vunpack.i.h.bf16 %v7023_v7 }
 0x250   : > { %v2519_v39 = vsel %vm2488_vm6, %v4837_v57, %v4932_v43  ;;  %v2551_v8 = vsel %vm2488_vm6, %v4932_v43, %v4837_v57  ;;  %v7168_v57 = vsel %vm2488_vm6, %v4887_v40, %v4882_v13  ;;  %v4263_v40 = vpack.c.bf16 %v7079_v6, %v7083_v16  ;;  %3210 = vperm.xlu0 %4517, %v3104_v61   ;;  %v3102_v6 = vld [vmem:[%s8026_s6 + $0x80] sm:$0xff] }
 0x251   : > { %4252 = vmatpush2.bf16.msk.msra.mxu0 %vm6570_vm11, %v4251_v44  ;;  %v4360_v54 = vpack.c.bf16 %v2520_v52, %v2519_v39  ;;  %v4363_v48 = vpack.c.bf16 %v2552_v34, %v2551_v8  ;;  %v1978_v19 = vsel %vm1952_vm5, %v4893_v10, %v4898_v15  ;;  %v1977_v13 = vsel %vm1952_vm5, %v4892_v27, %v4897_v11  ;;  %v7188_v12 = vpop.permute.xlu0 %4940  ;;  %v3671_v34 = vld [vmem:[%s8028_s8 + $0x10] sm:$0xff] }
 0x252   : > { %4358 = vmatpush1.bf16.msk.msra.mxu1 %vm6657_vm14, %v4357_v9  ;;  %4255 = vmatprep.subr.msk.bf16.mxu0 %vm6540_vm9, %v4254_v21  ;;  %v4902_v60 = vunpack.i.l.bf16 %v7023_v7  ;;  %v4372_v9 = vpack.c.bf16 %v7129_v50, %v7137_v20  ;;  %v4908_v0 = vunpack.i.h.bf16 %v6916_v32  ;;  %v4913_v31 = vunpack.i.h.bf16 %v7075_v3  ;;  %v3670_v50 = vld [vmem:[%s8028_s8 + $0x8] sm:$0xff] }
 0x253   : > { %v4912_v21 = vunpack.i.l.bf16 %v7075_v3  ;;  %3215 = vperm.xlu1 %4518, %v3105_v22   ;;  %v4375_v7 = vpack.c.bf16 %v7133_v59, %v7168_v57  ;;  %v4907_v16 = vunpack.i.l.bf16 %v6916_v32  ;;  %v7203_v51 = vsel %vm1952_vm5, %v4898_v15, %v4893_v10  ;;  %1767 = vmatmul.mubr.bf16.gmra.mxu1 %v5077_v26  ;;  %v7211_v3 = vpop.permute.xlu1 %4945 }
 0x254   : > { %v7207_v14 = vsel %vm1952_vm5, %v4897_v11, %v4892_v27  ;;  %4361 = vmatprep.subr.msk.bf16.mxu1 %vm6623_vm13, %v4360_v54  ;;  %v4266_v24 = vpack.c.bf16 %v1978_v19, %v1977_v13  ;;  %v4918_v32 = vunpack.i.h.bf16 %v6982_v37  ;;  %v4917_v38 = vunpack.i.l.bf16 %v6982_v37  ;;  %3200 = vperm.xlu0 %4517, %v3102_v6  }
 0x255   : > { %v7220_v5 = vsel %vm2488_vm6, %v4903_v2, %v4908_v0  ;;  %4258 = vmatpush2.bf16.msk.msra.mxu0 %vm6570_vm11, %v4257_v33  ;;  %v7234_v37 = vsel %vm2488_vm6, %v4908_v0, %v4903_v2  ;;  %v7238_v15 = vsel %vm2488_vm6, %v4902_v60, %v4907_v16  ;;  %v7242_v23 = vsel %vm2488_vm6, %v4907_v16, %v4902_v60  ;;  %v7249_v62 = vpop.permute.xlu0 %4950 }
 0x256   : > { %4364 = vmatpush2.bf16.msk.msra.mxu1 %vm6657_vm14, %v4363_v48  ;;  %4261 = vmatprep.subr.msk.bf16.mxu0 %vm6540_vm9, %v4260_v28  ;;  %v1976_v33 = vsel %vm1952_vm5, %v4913_v31, %v4918_v32  ;;  %v1975_v35 = vsel %vm1952_vm5, %v4912_v21, %v4917_v38  ;;  %v4938_v44 = vunpack.i.h.bf16 %v7158_v36  ;;  %v4937_v10 = vunpack.i.l.bf16 %v7158_v36  ;;  %v5081_v48 = vld [vmem:[%s8023_s3 + $0x1e4] ss:$8 sps:$4 sm:$0xff]  }
 0x257   : > { %4367 = vmatprep.subr.msk.bf16.mxu1 %vm6623_vm13, %v4366_v41  ;;  %v7267_v17 = vsel %vm1952_vm5, %v4918_v32, %v4913_v31  ;;  %v7271_v28 = vsel %vm1952_vm5, %v4917_v38, %v4912_v21  ;;  %v4948_v27 = vunpack.i.h.bf16 %v7211_v3  ;;  %v4947_v18 = vunpack.i.l.bf16 %v7211_v3  ;;  %3205 = vperm.xlu1 %4518, %v3103_v42   ;;  %v4956_v58 = vpop.permute.xlu1 %4955  ;;  %v5083_v32 = vld [vmem:[%s8023_s3 + $0x1e0] ss:$8 sps:$4 sm:$0xff]  }
 0x258   : > { %1776 = vmatprep.mubr.bf16.mxu1 %v5078_v53  ;;  %v4269_v41 = vpack.c.bf16 %v7203_v51, %v7207_v14  ;;  %v4378_v43 = vpack.c.bf16 %v7220_v5, %v7238_v15  ;;  %v4923_v49 = vunpack.i.h.bf16 %v7121_v55  ;;  %v4922_v11 = vunpack.i.l.bf16 %v7121_v55  ;;  %3677 = vperm.xlu0 %4517, %v3669_v46   ;;  %v3673_v51 = vld [vmem:[%s8028_s8 + $0x20] sm:$0xff]  ;;  %v3674_v15 = vld [vmem:[%s8028_s8 + $0x28] sm:$0xff] }
 0x259   : > { %4264 = vmatpush2.bf16.msk.msra.mxu0 %vm6570_vm11, %v4263_v40  ;;  %v4381_v20 = vpack.c.bf16 %v7234_v37, %v7242_v23  ;;  %v4272_v61 = vpack.c.bf16 %v1976_v33, %v1975_v35  ;;  %v4943_v39 = vunpack.i.h.bf16 %v7188_v12  ;;  %v4942_v55 = vunpack.i.l.bf16 %v7188_v12  ;;  %v4961_v63 = vpop.permute.xlu0 %4960  ;;  %v3672_v12 = vld [vmem:[%s8028_s8 + $0x18] sm:$0xff] }
 0x25a   : > { %4370 = vmatpush2.bf16.msk.msra.mxu1 %vm6657_vm14, %v4369_v47  ;;  %4267 = vmatprep.subr.msk.bf16.mxu0 %vm6540_vm9, %v4266_v24  ;;  %v4275_v56 = vpack.c.bf16 %v7267_v17, %v7271_v28  ;;  %v2511_v47 = vsel %vm2488_vm6, %v4922_v11, %v4937_v10  ;;  %v2512_v52 = vsel %vm2488_vm6, %v4923_v49, %v4938_v44  ;;  %v4957_v8 = vunpack.i.l.bf16 %v4956_v58 }
 0x25b   : > { %4373 = vmatprep.subr.msk.bf16.mxu1 %vm6623_vm13, %v4372_v9  ;;  %v7313_v36 = vsel %vm2488_vm6, %v4937_v10, %v4922_v11  ;;  %v1973_v22 = vsel %vm1952_vm5, %v4942_v55, %v4947_v18  ;;  %v1974_v26 = vsel %vm1952_vm5, %v4943_v39, %v4948_v27  ;;  %v4958_v2 = vunpack.i.h.bf16 %v4956_v58  ;;  %3682 = vperm.xlu1 %4518, %v3670_v50   ;;  %v4966_v54 = vpop.permute.xlu1 %4965 }
 0x25c   : > { %1777 = vmatmul.mubr.bf16.gmra.mxu1 %v5080_v29  ;;  %v2544_v40 = vsel %vm2488_vm6, %v4938_v44, %v4923_v49  ;;  %v4952_v19 = vunpack.i.l.bf16 %v7249_v62  ;;  %v4968_v13 = vunpack.i.h.bf16 %v4966_v54  ;;  %v4967_v60 = vunpack.i.l.bf16 %v4966_v54  ;;  %3687 = vperm.xlu0 %4517, %v3671_v34  }
 0x25d   : > { %4270 = vmatpush2.bf16.msk.msra.mxu0 %vm6570_vm11, %v4269_v41  ;;  %v4384_v9 = vpack.c.bf16 %v2512_v52, %v2511_v47  ;;  %v2005_v0 = vsel %vm1952_vm5, %v4947_v18, %v4942_v55  ;;  %v2006_v31 = vsel %vm1952_vm5, %v4948_v27, %v4943_v39  ;;  %v4953_v21 = vunpack.i.h.bf16 %v7249_v62  ;;  %v4971_v59 = vpop.permute.xlu0 %4970  ;;  %1786 = vmatprep.mubr.bf16.mxu1 %v5081_v48  ;;  %v5084_v27 = vld [vmem:[%s8023_s3 + $0x1f4] ss:$8 sps:$4 sm:$0xff]  }
 0x25e   : > { %4376 = vmatpush2.bf16.msk.msra.mxu1 %vm6657_vm14, %v4375_v7  ;;  %4273 = vmatprep.subr.msk.bf16.mxu0 %vm6540_vm9, %v4272_v61  ;;  %v4278_v57 = vpack.c.bf16 %v1974_v26, %v1973_v22  ;;  %v2509_v6 = vsel %vm2488_vm6, %v4952_v19, %v4957_v8  ;;  %v4963_v7 = vunpack.i.h.bf16 %v4961_v63  ;;  %v4962_v16 = vunpack.i.l.bf16 %v4961_v63  ;;  %v5086_v26 = vld [vmem:[%s8023_s3 + $0x1f0] ss:$8 sps:$4 sm:$0xff]  }
 0x25f   : > { %4379 = vmatprep.subr.msk.bf16.mxu1 %vm6623_vm13, %v4378_v43  ;;  %v2510_v14 = vsel %vm2488_vm6, %v4953_v21, %v4958_v2  ;;  %v2541_v3 = vsel %vm2488_vm6, %v4957_v8, %v4952_v19  ;;  %v2542_v53 = vsel %vm2488_vm6, %v4958_v2, %v4953_v21  ;;  %3692 = vperm.xlu1 %4518, %v3672_v12   ;;  %v4976_v24 = vpop.permute.xlu1 %4975  ;;  %v4973_v33 = vunpack.i.h.bf16 %v4971_v59 }
 0x260   : > { %v1971_v38 = vsel %vm1952_vm5, %v4962_v16, %v4967_v60  ;;  %v1972_v5 = vsel %vm1952_vm5, %v4963_v7, %v4968_v13  ;;  %v4978_v42 = vunpack.i.h.bf16 %v4976_v24  ;;  %v4977_v37 = vunpack.i.l.bf16 %v4976_v24  ;;  %3697 = vperm.xlu0 %4517, %v3673_v51   ;;  %v5104_v51 = vld [vmem:[%s8023_s3 + $0x20] ss:$8 sps:$4 sm:$0xff]   ;;  %v5110_v24 = vld [vmem:[%s8023_s3 + $0x30] ss:$8 sps:$4 sm:$0xff]  }
 0x261   : > { %4276 = vmatpush2.bf16.msk.msra.mxu0 %vm6570_vm11, %v4275_v56  ;;  %v4387_v23 = vpack.c.bf16 %v2544_v40, %v7313_v36  ;;  %v4281_v62 = vpack.c.bf16 %v2006_v31, %v2005_v0  ;;  %v4972_v35 = vunpack.i.l.bf16 %v4971_v59  ;;  %v4981_v44 = vpop.permute.xlu0 %4980  ;;  %v4390_v10 = vpack.c.bf16 %v2510_v14, %v2509_v6  ;;  %v5093_v59 = vld [vmem:[%s8023_s3 + $0x94] ss:$8 sps:$4 sm:$0xff]   ;;  %v5102_v6 = vld [vmem:[%s8023_s3 + $0x24] ss:$8 sps:$4 sm:$0xff]  }
 0x262   : > { %4382 = vmatpush2.bf16.msk.msra.mxu1 %vm6657_vm14, %v4381_v20  ;;  %4279 = vmatprep.subr.msk.bf16.mxu0 %vm6540_vm9, %v4278_v57  ;;  %v4393_v46 = vpack.c.bf16 %v2542_v53, %v2541_v3  ;;  %v2003_v17 = vsel %vm1952_vm5, %v4967_v60, %v4962_v16  ;;  %v2004_v28 = vsel %vm1952_vm5, %v4968_v13, %v4963_v7  ;;  %v4983_v43 = vunpack.i.h.bf16 %v4981_v44  ;;  %v5092_v13 = vld [vmem:[%s8023_s3 + $0x4] ss:$8 sps:$4 sm:$0xff]   ;;  %v5101_v7 = vld [vmem:[%s8023_s3 + $0xa0] ss:$8 sps:$4 sm:$0xff]   ;;  %v5105_v16 = vld [vmem:[%s8023_s3 + $0xb4] ss:$8 sps:$4 sm:$0xff]  }
 0x263   : > { %4385 = vmatprep.subr.msk.bf16.mxu1 %vm6623_vm13, %v4384_v9  ;;  %v4284_v18 = vpack.c.bf16 %v1972_v5, %v1971_v38  ;;  %v2507_v58 = vsel %vm2488_vm6, %v4972_v35, %v4977_v37  ;;  %v2508_v29 = vsel %vm2488_vm6, %v4973_v33, %v4978_v42  ;;  %3702 = vperm.xlu1 %4518, %v3674_v15   ;;  %v4986_v41 = vpop.permute.xlu1 %4985  ;;  %v4982_v49 = vunpack.i.l.bf16 %v4981_v44  ;;  %v5099_v57 = vld [vmem:[%s8023_s3 + $0xa4] ss:$8 sps:$4 sm:$0xff]   ;;  %v5108_v14 = vld [vmem:[%s8023_s3 + $0x34] ss:$8 sps:$4 sm:$0xff]   ;;  %v5107_v3 = vld [vmem:[%s8023_s3 + $0xb0] ss:$8 sps:$4 sm:$0xff]  }
 0x264   : > { %1787 = vmatmul.mubr.bf16.gmra.mxu1 %v5083_v32  ;;  %v4988_v11 = vunpack.i.h.bf16 %v4986_v41  ;;  %v4987_v50 = vunpack.i.l.bf16 %v4986_v41  ;;  %v4287_v20 = vpack.c.bf16 %v2004_v28, %v2003_v17  ;;  %v2539_v61 = vsel %vm2488_vm6, %v4977_v37, %v4972_v35  ;;  %v5111_v53 = vld [vmem:[%s8023_s3 + $0xc4] ss:$8 sps:$4 sm:$0xff]   ;;  %v5113_v38 = vld [vmem:[%s8023_s3 + $0xc0] ss:$8 sps:$4 sm:$0xff]   ;;  %v5117_v5 = vld [vmem:[%s8023_s3 + $0xd4] ss:$8 sps:$4 sm:$0xff]  }
 0x265   : > { %4282 = vmatpush2.bf16.msk.msra.mxu0 %vm6570_vm11, %v4281_v62  ;;  %v2540_v39 = vsel %vm2488_vm6, %v4978_v42, %v4973_v33  ;;  %v4991_v55 = vpop.permute.xlu0 %4990  ;;  %1796 = vmatprep.mubr.bf16.mxu1 %v5084_v27  ;;  %v4396_v8 = vpack.c.bf16 %v2508_v29, %v2507_v58  ;;  %v5116_v32 = vld [vmem:[%s8023_s3 + $0x44] ss:$8 sps:$4 sm:$0xff]   ;;  %v5114_v42 = vld [vmem:[%s8023_s3 + $0x40] ss:$8 sps:$4 sm:$0xff]   ;;  %v5122_v37 = vld [vmem:[%s8023_s3 + $0x54] ss:$8 sps:$4 sm:$0xff]  }
 0x266   : > { %4388 = vmatpush2.bf16.msk.msra.mxu1 %vm6657_vm14, %v4387_v23  ;;  %4285 = vmatprep.subr.msk.bf16.mxu0 %vm6540_vm9, %v4284_v18  ;;  %v1969_v63 = vsel %vm1952_vm5, %v4982_v49, %v4987_v50  ;;  %v1970_v56 = vsel %vm1952_vm5, %v4983_v43, %v4988_v11  ;;  %v2001_v47 = vsel %vm1952_vm5, %v4987_v50, %v4982_v49  ;;  %v4993_v2 = vunpack.i.h.bf16 %v4991_v55  ;;  %v5119_v15 = vld [vmem:[%s8023_s3 + $0xd0] ss:$8 sps:$4 sm:$0xff]   ;;  %v5123_v23 = vld [vmem:[%s8023_s3 + $0xe4] ss:$8 sps:$4 sm:$0xff]   ;;  %v5125_v35 = vld [vmem:[%s8023_s3 + $0xe0] ss:$8 sps:$4 sm:$0xff]  }
 0x267   : > { %4391 = vmatprep.subr.msk.bf16.mxu1 %vm6623_vm13, %v4390_v10  ;;  %v2002_v52 = vsel %vm1952_vm5, %v4988_v11, %v4983_v43  ;;  %v4290_v34 = vpack.c.bf16 %v1970_v56, %v1969_v63  ;;  %v4996_v22 = vpop.permute.xlu1 %4995  ;;  %v4992_v54 = vunpack.i.l.bf16 %v4991_v55  ;;  %v4399_v19 = vpack.c.bf16 %v2540_v39, %v2539_v61  ;;  %v5120_v62 = vld [vmem:[%s8023_s3 + $0x50] ss:$8 sps:$4 sm:$0xff]   ;;  %v5128_v33 = vld [vmem:[%s8023_s3 + $0x64] ss:$8 sps:$4 sm:$0xff]   ;;  %v5129_v44 = vld [vmem:[%s8023_s3 + $0xf4] ss:$8 sps:$4 sm:$0xff]  }
 0x268   : > { %v4293_v36 = vpack.c.bf16 %v2002_v52, %v2001_v47  ;;  %v4998_v48 = vunpack.i.h.bf16 %v4996_v22  ;;  %v4997_v40 = vunpack.i.l.bf16 %v4996_v22  ;;  %v5126_v10 = vld [vmem:[%s8023_s3 + $0x60] ss:$8 sps:$4 sm:$0xff]   ;;  %v5131_v17 = vld [vmem:[%s8023_s3 + $0xf0] ss:$8 sps:$4 sm:$0xff]   ;;  %v8157_v27 = vmov 0  }
 0x269   : > { %4288 = vmatpush2.bf16.msk.msra.mxu0 %vm6570_vm11, %v4287_v20  ;;  %v5132_v28 = vld [vmem:[%s8023_s3 + $0x70] ss:$8 sps:$4 sm:$0xff]  }
 0x26a   : > { %4394 = vmatpush2.bf16.msk.msra.mxu1 %vm6657_vm14, %v4393_v46  ;;  %4291 = vmatprep.subr.msk.bf16.mxu0 %vm6540_vm9, %v4290_v34  ;;  %v2505_v60 = vsel %vm2488_vm6, %v4992_v54, %v4997_v40  ;;  %v2506_v12 = vsel %vm2488_vm6, %v4993_v2, %v4998_v48  ;;  %v2537_v9 = vsel %vm2488_vm6, %v4997_v40, %v4992_v54  ;;  %v5134_v46 = vld [vmem:[%s8023_s3 + $0x74] ss:$8 sps:$4 sm:$0xff]  }
 0x26b   : > { %4397 = vmatprep.subr.msk.bf16.mxu1 %vm6623_vm13, %v4396_v8  ;;  %v2538_v0 = vsel %vm2488_vm6, %v4998_v48, %v4993_v2  ;;  %v4402_v31 = vpack.c.bf16 %v2506_v12, %v2505_v60 }
 0x26c   : > { %1797 = vmatmul.mubr.bf16.gmra.mxu1 %v5086_v26  ;;  %v4405_v21 = vpack.c.bf16 %v2538_v0, %v2537_v9 }
 0x26d   : > { %4294 = vmatpush2.bf16.msk.msra.mxu0 %vm6570_vm11, %v4293_v36  ;;  %2765 = vmatprep.mubr.bf16.mxu1 %v5092_v13 }
 0x26e   : > { %4400 = vmatpush2.bf16.msk.msra.mxu1 %vm6657_vm14, %v4399_v19 }
 0x26f   : > { %4403 = vmatprep.subr.msk.bf16.mxu1 %vm6623_vm13, %v4402_v31 }
 0x270   : > { %2230 = vmatmul.mubr.bf16.vlgmr.msra.gmra.mxu0 %v5087_v1 }
 0x271   : > { %2239 = vmatprep.mubr.bf16.mxu0 %v5093_v59 }
 0x272   : > { %4406 = vmatpush2.bf16.msk.msra.mxu1 %vm6657_vm14, %v4405_v21 }
 0x275   : > { %2766 = vmatmul.mubr.bf16.vlgmr.msra.gmra.mxu1 %v5090_v30 }
 0x276   : > { %2775 = vmatprep.mubr.bf16.mxu1 %v5096_v4 }
 0x278   : > { %2240 = vmatmul.mubr.bf16.gmra.mxu0 %v5095_v45 }
 0x279   : > { %2249 = vmatprep.mubr.bf16.mxu0 %v5099_v57 }
 0x27d   : > { %2776 = vmatmul.mubr.bf16.gmra.mxu1 %v5098_v25 }
 0x27e   : > { %2785 = vmatprep.mubr.bf16.mxu1 %v5102_v6 }
 0x280   : > { %2250 = vmatmul.mubr.bf16.gmra.mxu0 %v5101_v7 }
 0x281   : > { %2259 = vmatprep.mubr.bf16.mxu0 %v5105_v16 }
 0x285   : > { %2786 = vmatmul.mubr.bf16.gmra.mxu1 %v5104_v51 }
 0x286   : > { %2795 = vmatprep.mubr.bf16.mxu1 %v5108_v14 }
 0x288   : > { %2260 = vmatmul.mubr.bf16.gmra.mxu0 %v5107_v3 }
 0x289   : > { %2269 = vmatprep.mubr.bf16.mxu0 %v5111_v53 }
 0x28d   : > { %2796 = vmatmul.mubr.bf16.gmra.mxu1 %v5110_v24 }
 0x28e   : > { %2805 = vmatprep.mubr.bf16.mxu1 %v5116_v32 }
 0x290   : > { %2270 = vmatmul.mubr.bf16.gmra.mxu0 %v5113_v38 }
 0x291   : > { %2279 = vmatprep.mubr.bf16.mxu0 %v5117_v5 }
 0x295   : > { %2806 = vmatmul.mubr.bf16.gmra.mxu1 %v5114_v42 }
 0x296   : > { %2815 = vmatprep.mubr.bf16.mxu1 %v5122_v37 }
 0x298   : > { %2280 = vmatmul.mubr.bf16.gmra.mxu0 %v5119_v15 }
 0x299   : > { %2289 = vmatprep.mubr.bf16.mxu0 %v5123_v23 }
 0x29d   : > { %2816 = vmatmul.mubr.bf16.gmra.mxu1 %v5120_v62 }
 0x29e   : > { %2825 = vmatprep.mubr.bf16.mxu1 %v5128_v33 }
 0x2a0   : > { %2290 = vmatmul.mubr.bf16.gmra.mxu0 %v5125_v35 }
 0x2a1   : > { %2299 = vmatprep.mubr.bf16.mxu0 %v5129_v44  ;;  %v7580_v44 = vpop.permute.xlu0 %2966 }
 0x2a2   : > { %8165 = vst [vmem:[#allocation17_spill] sm:$0xff] %v7580_v44 }
 0x2a5   : > { %2826 = vmatmul.mubr.bf16.gmra.mxu1 %v5126_v10 }
 0x2a6   : > { %2835 = vmatprep.mubr.bf16.mxu1 %v5134_v46 }
 0x2a8   : > { %2300 = vmatmul.mubr.bf16.gmra.mxu0 %v5131_v17  ;;  %v7584_v17 = vpop.permute.xlu1 %2971 }
 0x2a9   : > { %3406 = vmatprep.mubr.bf16.mxu0 %v8157_v27  ;;  %8166 = vst [vmem:[#allocation12_spill] sm:$0xff] %v7584_v17 }
 0x2ad   : > { %2836 = vmatmul.mubr.bf16.gmra.mxu1 %v5132_v28 }
 0x2ae   : > { %v1535_v18 = vpop.f32.mrf.mxu1 }
 0x2b0   : > { %v1537_v58 = vpop.f32.mrf.mxu1 }
 0x2b2   : > { %v1539_v29 = vpop.f32.mrf.mxu1 }
 0x2b4   : > { %v1541_v41 = vpop.f32.mrf.mxu1 }
 0x2b6   : > { %v1545_v43 = vpop.f32.mrf.mxu1 }
 0x2b8   : > { %v1547_v49 = vpop.f32.mrf.mxu1 }
 0x2ba   : > { %v1549_v11 = vpop.f32.mrf.mxu1 }
 0x2bc   : > { %v1551_v50 = vpop.f32.mrf.mxu1 }
 0x2be   : > { %v1555_v20 = vpop.f32.mrf.mxu1 }
 0x2c0   : > { %v1557_v61 = vpop.f32.mrf.mxu1 }
 0x2c2   : > { %v1559_v39 = vpop.f32.mrf.mxu1 }
 0x2c4   : > { %v1561_v55 = vpop.f32.mrf.mxu1 }
 0x2c6   : > { %v1565_v63 = vpop.f32.mrf.mxu1 }
 0x2c8   : > { %v1567_v56 = vpop.f32.mrf.mxu1 }
 0x2ca   : > { %v1569_v47 = vpop.f32.mrf.mxu1 }
 0x2cc   : > { %v1571_v52 = vpop.f32.mrf.mxu1 }
 0x2ce   : > { %v7526_v8 = vpop.f32.mrf.mxu1 }
 0x2d0   : > { %v7528_v34 = vpop.f32.mrf.mxu1 }
 0x2d2   : > { %v7530_v36 = vpop.f32.mrf.mxu1 }
 0x2d4   : > { %v7532_v22 = vpop.f32.mrf.mxu1 }
 0x2d6   : > { %v7534_v26 = vpop.f32.mrf.mxu1 }
 0x2d8   : > { %v7536_v2 = vpop.f32.mrf.mxu1 }
 0x2da   : > { %v7538_v54 = vpop.f32.mrf.mxu1 }
 0x2dc   : > { %v7540_v48 = vpop.f32.mrf.mxu1 }
 0x2de   : > { %v7542_v40 = vpop.f32.mrf.mxu1 }
 0x2e0   : > { %v7544_v19 = vpop.f32.mrf.mxu1 }
 0x2e1   : > { %8158 = vst [vmem:[#allocation6_spill] sm:$0xff] %v7544_v19 }
 0x2e2   : > { %v7546_v13 = vpop.f32.mrf.mxu1 }
 0x2e3   : > { %8159 = vst [vmem:[#allocation7_spill] sm:$0xff] %v7546_v13 }
 0x2e4   : > { %v7548_v60 = vpop.f32.mrf.mxu1 }
 0x2e5   : > { %8160 = vst [vmem:[#allocation2_spill] sm:$0xff] %v7548_v60 }
 0x2e6   : > { %v7550_v12 = vpop.f32.mrf.mxu1 }
 0x2e7   : > { %8161 = vst [vmem:[#allocation3_spill] sm:$0xff] %v7550_v12 }
 0x2e8   : > { %v7552_v9 = vpop.f32.mrf.mxu1 }
 0x2e9   : > { %8162 = vst [vmem:[#allocation20_spill] sm:$0xff] %v7552_v9 }
 0x2ea   : > { %v7554_v0 = vpop.f32.mrf.mxu1 }
 0x2eb   : > { %8163 = vst [vmem:[#allocation21_spill] sm:$0xff] %v7554_v0 }
 0x2ec   : > { %v7556_v31 = vpop.f32.mrf.mxu1 }
 0x2ed   : > { %8164 = vst [vmem:[#allocation16_spill] sm:$0xff] %v7556_v31 }
 0x2f1   : > { %v1728_v1 = vpop.f32.mrf.mxu1 }
 0x2f2   : > { %v1729_v21 = vadd.f32 %v1728_v1, %v1535_v18 }
 0x2f3   : > { %v1730_v59 = vpop.f32.mrf.mxu1 }
 0x2f4   : > { %v1731_v30 = vadd.f32 %v1730_v59, %v1537_v58 }
 0x2f5   : > { %v1732_v4 = vpop.f32.mrf.mxu1 }
 0x2f6   : > { %v7558_v45 = vadd.f32 %v1732_v4, %v1539_v29 }
 0x2f7   : > { %v1734_v57 = vpop.f32.mrf.mxu1 }
 0x2f8   : > { %v7560_v25 = vadd.f32 %v1734_v57, %v1541_v41  ;;  %v7590_v41 = vpop.permute.xlu0 %2956 }
 0x2f9   : > { %8167 = vst [vmem:[#allocation13_spill] sm:$0xff] %v7590_v41 }
 0x2fa   : > { %v1738_v6 = vpop.f32.mrf.mxu1 }
 0x2fb   : > { %v7562_v7 = vadd.f32 %v1738_v6, %v1545_v43 }
 0x2fc   : > { %v1740_v16 = vpop.f32.mrf.mxu1 }
 0x2fd   : > { %v7564_v51 = vadd.f32 %v1740_v16, %v1547_v49  ;;  %v7594_v49 = vpop.permute.xlu1 %2961 }
 0x2fe   : > { %v1742_v14 = vpop.f32.mrf.mxu1  ;;  %8168 = vst [vmem:[#allocation8_spill] sm:$0xff] %v7594_v49 }
 0x2ff   : > { %v7566_v3 = vadd.f32 %v1742_v14, %v1549_v11 }
 0x300   : > { %v1744_v53 = vpop.f32.mrf.mxu1 }
 0x301   : > { %v7568_v24 = vadd.f32 %v1744_v53, %v1551_v50 }
 0x303   : > { %v1748_v32 = vpop.f32.mrf.mxu1 }
 0x304   : > { %v7570_v38 = vadd.f32 %v1748_v32, %v1555_v20  ;;  %v7600_v20 = vpop.permute.xlu0 %2946 }
 0x305   : > { %v1750_v5 = vpop.f32.mrf.mxu1  ;;  %8169 = vst [vmem:[#allocation9_spill] sm:$0xff] %v7600_v20 }
 0x306   : > { %v7572_v42 = vadd.f32 %v1750_v5, %v1557_v61 }
 0x307   : > { %v1752_v37 = vpop.f32.mrf.mxu1 }
 0x308   : > { %v7574_v15 = vadd.f32 %v1752_v37, %v1559_v39  ;;  %v7604_v39 = vpop.permute.xlu1 %2951 }
 0x309   : > { %v1754_v23 = vpop.f32.mrf.mxu1  ;;  %8170 = vst [vmem:[#allocation4_spill] sm:$0xff] %v7604_v39 }
 0x30a   : > { %v7576_v62 = vadd.f32 %v1754_v23, %v1561_v55 }
 0x30b   : > { %v1758_v33 = vpop.f32.mrf.mxu1 }
 0x30c   : > { %v7578_v35 = vadd.f32 %v1758_v33, %v1565_v63 }
 0x30d   : > { %v1760_v10 = vpop.f32.mrf.mxu1 }
 0x30e   : > { %v7582_v46 = vadd.f32 %v1760_v10, %v1567_v56  ;;  %v7610_v56 = vpop.permute.xlu0 %2936 }
 0x30f   : > { %v1762_v28 = vpop.f32.mrf.mxu1 }
 0x310   : > { %v7586_v18 = vadd.f32 %v1762_v28, %v1569_v47 }
 0x311   : > { %v1764_v58 = vpop.f32.mrf.mxu1 }
 0x312   : > { %v7588_v29 = vadd.f32 %v1764_v58, %v1571_v52  ;;  %v7614_v52 = vpop.permute.xlu1 %2941  ;;  %v7620_v4 = vpop.permute.xlu0 %2926 }
 0x313   : > { %v7592_v43 = vpop.f32.mrf.mxu1 }
 0x315   : > { %v7596_v11 = vpop.f32.mrf.mxu1 }
 0x316   : > { %v7624_v6 = vpop.permute.xlu1 %2931  ;;  %v7630_v53 = vpop.permute.xlu0 %2916 }
 0x317   : > { %v7598_v50 = vpop.f32.mrf.mxu1 }
 0x319   : > { %v7602_v61 = vpop.f32.mrf.mxu1 }
 0x31a   : > { %v7634_v5 = vpop.permute.xlu1 %2921  ;;  %v2907_v10 = vpop.permute.xlu0 %2906 }
 0x31c   : > { %v7606_v55 = vpop.f32.mrf.mxu1 }
 0x31e   : > { %v7608_v63 = vpop.f32.mrf.mxu1  ;;  %v2912_v17 = vpop.permute.xlu1 %2911 }
 0x31f   : > { %v2897_v41 = vpop.permute.xlu0 %2896 }
 0x320   : > { %v7612_v47 = vpop.f32.mrf.mxu1 }
 0x322   : > { %v7616_v1 = vpop.f32.mrf.mxu1 }
 0x324   : > { %v7618_v59 = vpop.f32.mrf.mxu1 }
 0x326   : > { %v7622_v57 = vpop.f32.mrf.mxu1 }
 0x327   : > { %8171 = vst [vmem:[#allocation5_spill] sm:$0xff] %v7622_v57 }
 0x328   : > { %v7626_v16 = vpop.f32.mrf.mxu1 }
 0x329   : > { %8172 = vst [vmem:[#allocation22_spill] sm:$0xff] %v7626_v16 }
 0x32a   : > { %v7628_v14 = vpop.f32.mrf.mxu1 }
 0x32b   : > { %8173 = vst [vmem:[#allocation15_spill] sm:$0xff] %v7628_v14 }
 0x32c   : > { %v7632_v32 = vpop.f32.mrf.mxu1 }
 0x32d   : > { %8174 = vst [vmem:[#allocation10_spill] sm:$0xff] %v7632_v32 }
 0x32e   : > { %v7636_v37 = vpop.f32.mrf.mxu1 }
 0x32f   : > { %8175 = vst [vmem:[#allocation19_spill] sm:$0xff] %v7636_v37 }
 0x330   : > { %v7638_v23 = vpop.f32.mrf.mxu1  ;;  %v2231_v33 = vpop.f32.mrf.mxu0 }
 0x331   : > { %8176 = vst [vmem:[#allocation14_spill] sm:$0xff] %v7638_v23  ;;  %v2310_v28 = vadd.f32 %v2231_v33, %v1729_v21  ;;  %v2902_v21 = vpop.permute.xlu1 %2901 }
 0x332   : > { %v7640_v58 = vpop.f32.mrf.mxu1  ;;  %v2233_v27 = vpop.f32.mrf.mxu0 }
 0x333   : > { %8177 = vst [vmem:[#allocation18_spill] sm:$0xff] %v7640_v58  ;;  %v2311_v44 = vadd.f32 %v2233_v27, %v1731_v30 }
 0x334   : > { %v2235_v31 = vpop.f32.mrf.mxu0 }
 0x335   : > { %v2767_v0 = vpop.f32.mrf.mxu1  ;;  %v2312_v9 = vadd.f32 %v2235_v31, %v7558_v45 }
 0x336   : > { %v2846_v12 = vadd.f32 %v2767_v0, %v2310_v28  ;;  %v2237_v32 = vpop.f32.mrf.mxu0 }
 0x337   : > { %v2769_v49 = vpop.f32.mrf.mxu1  ;;  %v2313_v37 = vadd.f32 %v2237_v32, %v7560_v25 }
 0x338   : > { %v2847_v14 = vadd.f32 %v2769_v49, %v2311_v44  ;;  %v2974_v23 = vadd.f32 %v2897_v41, %v2846_v12  ;;  %v2241_v60 = vpop.f32.mrf.mxu0 }
 0x339   : > { %v2771_v16 = vpop.f32.mrf.mxu1  ;;  %v2314_v33 = vadd.f32 %v2241_v60, %v7562_v7 }
 0x33a   : > { %v2848_v58 = vadd.f32 %v2771_v16, %v2312_v9  ;;  %v2243_v13 = vpop.f32.mrf.mxu0  ;;  %v2975_v30 = vadd.f32 %v2897_v41, %v2847_v14  ;;  %v3006_v45 = vmax.f32 %v2974_v23, 0.0 }
 0x33b   : > { %v2773_v27 = vpop.f32.mrf.mxu1  ;;  %v2315_v31 = vadd.f32 %v2243_v13, %v7564_v51 }
 0x33c   : > { %v2976_v57 = vadd.f32 %v2902_v21, %v2848_v58  ;;  %v2849_v0 = vadd.f32 %v2773_v27, %v2313_v37  ;;  %v2245_v28 = vpop.f32.mrf.mxu0  ;;  %v3007_v20 = vmax.f32 %v2975_v30, 0.0 }
 0x33d   : > { %v2777_v19 = vpop.f32.mrf.mxu1  ;;  %v2316_v12 = vadd.f32 %v2245_v28, %v7566_v3 }
 0x33e   : > { %v3008_v39 = vmax.f32 %v2976_v57, 0.0  ;;  %v2977_v25 = vadd.f32 %v2902_v21, %v2849_v0  ;;  %v2850_v44 = vadd.f32 %v2777_v19, %v2314_v33  ;;  %v2247_v49 = vpop.f32.mrf.mxu0 }
 0x33f   : > { %v2779_v32 = vpop.f32.mrf.mxu1  ;;  %v2317_v7 = vadd.f32 %v2247_v49, %v7568_v24 }
 0x340   : > { %v7647_v60 = vpack.c.bf16 %v3008_v39, %v3006_v45  ;;  %v3009_v9 = vmax.f32 %v2977_v25, 0.0  ;;  %v2851_v41 = vadd.f32 %v2779_v32, %v2315_v31  ;;  %v2251_v16 = vpop.f32.mrf.mxu0  ;;  %v2978_v51 = vadd.f32 %v2907_v10, %v2850_v44 }
 0x341   : > { %v2781_v13 = vpop.f32.mrf.mxu1  ;;  %v2318_v14 = vadd.f32 %v2251_v16, %v7570_v38 }
 0x342   : > { %v2852_v37 = vadd.f32 %v2781_v13, %v2316_v12  ;;  %v7651_v57 = vpack.c.bf16 %v3009_v9, %v3007_v20  ;;  %v2253_v23 = vpop.f32.mrf.mxu0  ;;  %v2979_v19 = vadd.f32 %v2907_v10, %v2851_v41  ;;  %v3010_v27 = vmax.f32 %v2978_v51, 0.0 }
 0x343   : > { %v2783_v3 = vpop.f32.mrf.mxu1  ;;  %v2319_v31 = vadd.f32 %v2253_v23, %v7572_v42 }
 0x344   : > { %v2980_v58 = vadd.f32 %v2912_v17, %v2852_v37  ;;  %v2853_v21 = vadd.f32 %v2783_v3, %v2317_v7  ;;  %v2255_v33 = vpop.f32.mrf.mxu0  ;;  %v3011_v25 = vmax.f32 %v2979_v19, 0.0 }
 0x345   : > { %v2787_v39 = vpop.f32.mrf.mxu1  ;;  %v2320_v12 = vadd.f32 %v2255_v33, %v7574_v15 }
 0x346   : > { %v3012_v30 = vmax.f32 %v2980_v58, 0.0  ;;  %v2981_v0 = vadd.f32 %v2912_v17, %v2853_v21  ;;  %v2854_v24 = vadd.f32 %v2787_v39, %v2318_v14  ;;  %v2257_v45 = vpop.f32.mrf.mxu0 }
 0x347   : > { %v2789_v28 = vpop.f32.mrf.mxu1  ;;  %v2321_v9 = vadd.f32 %v2257_v45, %v7576_v62 }
 0x348   : > { %v7654_v38 = vpack.c.bf16 %v3012_v30, %v3010_v27  ;;  %v3013_v20 = vmax.f32 %v2981_v0, 0.0  ;;  %v2855_v44 = vadd.f32 %v2789_v28, %v2319_v31  ;;  %v2261_v10 = vpop.f32.mrf.mxu0  ;;  %v2982_v32 = vadd.f32 %v7630_v53, %v2854_v24 }
 0x349   : > { %v2791_v49 = vpop.f32.mrf.mxu1  ;;  %v2322_v13 = vadd.f32 %v2261_v10, %v7578_v35  ;;  %v1769_v30 = vadd.f32 %v7592_v43, %v7526_v8  ;;  %v1771_v8 = vadd.f32 %v7596_v11, %v7528_v34  ;;  %v1773_v43 = vadd.f32 %v7598_v50, %v7530_v36 }
 0x34a   : > { %v2856_v7 = vadd.f32 %v2791_v49, %v2320_v12  ;;  %v7659_v17 = vpack.c.bf16 %v3013_v20, %v3011_v25  ;;  %v2263_v41 = vpop.f32.mrf.mxu0  ;;  %v2983_v16 = vadd.f32 %v7630_v53, %v2855_v44  ;;  %v3014_v23 = vmax.f32 %v2982_v32, 0.0 }
 0x34b   : > { %v2793_v42 = vpop.f32.mrf.mxu1  ;;  %v2323_v62 = vadd.f32 %v2263_v41, %v7582_v46  ;;  %v1779_v36 = vadd.f32 %v7606_v55, %v7534_v26  ;;  %v1781_v26 = vadd.f32 %v7608_v63, %v7536_v2  ;;  %v1783_v55 = vadd.f32 %v7612_v47, %v7538_v54 }
 0x34c   : > { %v2984_v51 = vadd.f32 %v7634_v5, %v2856_v7  ;;  %v2857_v14 = vadd.f32 %v2793_v42, %v2321_v9  ;;  %v2265_v15 = vpop.f32.mrf.mxu0  ;;  %v3015_v39 = vmax.f32 %v2983_v16, 0.0  ;;  %v1789_v54 = vadd.f32 %v7618_v59, %v7542_v40  ;;  %v8182_v59 = vld [vmem:[#allocation7_spill] sm:$0xff] }
 0x34d   : > { %v2797_v37 = vpop.f32.mrf.mxu1  ;;  %v2324_v35 = vadd.f32 %v2265_v15, %v7586_v18 }
 0x34e   : > { %v3016_v3 = vmax.f32 %v2984_v51, 0.0  ;;  %v2985_v19 = vadd.f32 %v7634_v5, %v2857_v14  ;;  %v2858_v58 = vadd.f32 %v2797_v37, %v2322_v13  ;;  %v2267_v21 = vpop.f32.mrf.mxu0 }
 0x34f   : > { %v2799_v33 = vpop.f32.mrf.mxu1  ;;  %v2325_v5 = vadd.f32 %v2267_v21, %v7588_v29 }
 0x350   : > { %v7666_v27 = vpack.c.bf16 %v3016_v3, %v3014_v23  ;;  %v3017_v53 = vmax.f32 %v2985_v19, 0.0  ;;  %v2859_v0 = vadd.f32 %v2799_v33, %v2323_v62  ;;  %v2271_v24 = vpop.f32.mrf.mxu0  ;;  %v2986_v45 = vadd.f32 %v7620_v4, %v2858_v58 }
 0x351   : > { %v2801_v31 = vpop.f32.mrf.mxu1  ;;  %v2326_v44 = vadd.f32 %v2271_v24, %v1769_v30 }
 0x352   : > { %v2860_v28 = vadd.f32 %v2801_v31, %v2324_v35  ;;  %v7673_v46 = vpack.c.bf16 %v3017_v53, %v3015_v39  ;;  %v2273_v25 = vpop.f32.mrf.mxu0  ;;  %v2987_v12 = vadd.f32 %v7620_v4, %v2859_v0  ;;  %v3018_v29 = vmax.f32 %v2986_v45, 0.0 }
 0x353   : > { %v2803_v20 = vpop.f32.mrf.mxu1  ;;  %v1775_v4 = vadd.f32 %v7602_v61, %v7532_v22  ;;  %v2327_v42 = vadd.f32 %v2273_v25, %v1771_v8 }
 0x354   : > { %v2988_v18 = vadd.f32 %v7624_v6, %v2860_v28  ;;  %v2861_v10 = vadd.f32 %v2803_v20, %v2325_v5  ;;  %v2275_v49 = vpop.f32.mrf.mxu0  ;;  %v3019_v51 = vmax.f32 %v2987_v12, 0.0 }
 0x355   : > { %v2807_v32 = vpop.f32.mrf.mxu1  ;;  %v2328_v11 = vadd.f32 %v2275_v49, %v1773_v43 }
 0x356   : > { %v3020_v9 = vmax.f32 %v2988_v18, 0.0  ;;  %v2989_v7 = vadd.f32 %v7624_v6, %v2861_v10  ;;  %v2862_v41 = vadd.f32 %v2807_v32, %v2326_v44  ;;  %v2277_v16 = vpop.f32.mrf.mxu0  ;;  %v8178_v44 = vld [vmem:[#allocation9_spill] sm:$0xff]  ;;  %v8179_v32 = vld [vmem:[#allocation4_spill] sm:$0xff] }
 0x357   : > { %v2809_v13 = vpop.f32.mrf.mxu1  ;;  %v2329_v23 = vadd.f32 %v2277_v16, %v1775_v4  ;;  %v8183_v4 = vld [vmem:[#allocation22_spill] sm:$0xff] }
 0x358   : > { %v7684_v14 = vpack.c.bf16 %v3020_v9, %v3018_v29  ;;  %v3021_v34 = vmax.f32 %v2989_v7, 0.0  ;;  %v2863_v50 = vadd.f32 %v2809_v13, %v2327_v42  ;;  %v2281_v15 = vpop.f32.mrf.mxu0  ;;  %v2990_v6 = vadd.f32 %v7610_v56, %v2862_v41  ;;  %v8180_v7 = vld [vmem:[#allocation6_spill] sm:$0xff]  ;;  %v8181_v41 = vld [vmem:[#allocation5_spill] sm:$0xff] }
 0x359   : > { %v2811_v37 = vpop.f32.mrf.mxu1  ;;  %v2330_v62 = vadd.f32 %v2281_v15, %v1779_v36  ;;  %v1791_v40 = vadd.f32 %v8181_v41, %v8180_v7  ;;  %v1793_v42 = vadd.f32 %v8183_v4, %v8182_v59  ;;  %v8185_v15 = vld [vmem:[#allocation15_spill] sm:$0xff] }
 0x35a   : > { %v2864_v3 = vadd.f32 %v2811_v37, %v2328_v11  ;;  %v7689_v19 = vpack.c.bf16 %v3021_v34, %v3019_v51  ;;  %v2283_v22 = vpop.f32.mrf.mxu0  ;;  %v2991_v58 = vadd.f32 %v7610_v56, %v2863_v50  ;;  %v3022_v35 = vmax.f32 %v2990_v6, 0.0  ;;  %v8184_v50 = vld [vmem:[#allocation2_spill] sm:$0xff] }
 0x35b   : > { %v2813_v61 = vpop.f32.mrf.mxu1  ;;  %v1785_v56 = vadd.f32 %v7616_v1, %v7540_v48  ;;  %v2331_v31 = vadd.f32 %v2283_v22, %v1781_v26  ;;  %v1795_v37 = vadd.f32 %v8185_v15, %v8184_v50 }
 0x35c   : > { %v2992_v21 = vadd.f32 %v7614_v52, %v2864_v3  ;;  %v2865_v33 = vadd.f32 %v2813_v61, %v2329_v23  ;;  %v2285_v39 = vpop.f32.mrf.mxu0  ;;  %v3023_v28 = vmax.f32 %v2991_v58, 0.0 }
 0x35d   : > { %v2817_v53 = vpop.f32.mrf.mxu1  ;;  %v2332_v63 = vadd.f32 %v2285_v39, %v1783_v55  ;;  %v8186_v55 = vld [vmem:[#allocation13_spill] sm:$0xff] }
 0x35e   : > { %v3024_v30 = vmax.f32 %v2992_v21, 0.0  ;;  %v2993_v0 = vadd.f32 %v7614_v52, %v2865_v33  ;;  %v2866_v24 = vadd.f32 %v2817_v53, %v2330_v62  ;;  %v2287_v45 = vpop.f32.mrf.mxu0 }
 0x35f   : > { %v2819_v5 = vpop.f32.mrf.mxu1  ;;  %v2333_v18 = vadd.f32 %v2287_v45, %v1785_v56 }
 0x360   : > { %v7700_v25 = vpack.c.bf16 %v3024_v30, %v3022_v35  ;;  %v3025_v2 = vmax.f32 %v2993_v0, 0.0  ;;  %v2867_v47 = vadd.f32 %v2819_v5, %v2331_v31  ;;  %v2291_v20 = vpop.f32.mrf.mxu0  ;;  %v2994_v52 = vadd.f32 %v8178_v44, %v2866_v24  ;;  %v8187_v31 = vld [vmem:[#allocation8_spill] sm:$0xff] }
 0x361   : > { %v2821_v12 = vpop.f32.mrf.mxu1  ;;  %v2334_v49 = vadd.f32 %v2291_v20, %v1789_v54  ;;  %v8190_v54 = vld [vmem:[#allocation20_spill] sm:$0xff] }
 0x362   : > { %v2868_v10 = vadd.f32 %v2821_v12, %v2332_v63  ;;  %v7705_v8 = vpack.c.bf16 %v3025_v2, %v3023_v28  ;;  %v2293_v48 = vpop.f32.mrf.mxu0  ;;  %v2995_v43 = vadd.f32 %v8178_v44, %v2867_v47  ;;  %v3026_v51 = vmax.f32 %v2994_v52, 0.0  ;;  %v8188_v28 = vld [vmem:[#allocation3_spill] sm:$0xff]  ;;  %v8189_v2 = vld [vmem:[#allocation10_spill] sm:$0xff]  ;;  %v8192_v52 = vld [vmem:[#allocation21_spill] sm:$0xff] }
 0x363   : > { %v2823_v1 = vpop.f32.mrf.mxu1  ;;  %v2335_v6 = vadd.f32 %v2293_v48, %v1791_v40  ;;  %v1799_v63 = vadd.f32 %v8189_v2, %v8188_v28  ;;  %v8191_v47 = vld [vmem:[#allocation19_spill] sm:$0xff] }
 0x364   : > { %v2996_v29 = vadd.f32 %v8179_v32, %v2868_v10  ;;  %v2869_v9 = vadd.f32 %v2823_v1, %v2333_v18  ;;  %v2295_v16 = vpop.f32.mrf.mxu0  ;;  %v3027_v22 = vmax.f32 %v2995_v43, 0.0  ;;  %v1801_v20 = vadd.f32 %v8191_v47, %v8190_v54  ;;  %v8193_v18 = vld [vmem:[#allocation14_spill] sm:$0xff] }
 0x365   : > { %v2827_v13 = vpop.f32.mrf.mxu1  ;;  %v2336_v62 = vadd.f32 %v2295_v16, %v1793_v42  ;;  %v1803_v10 = vadd.f32 %v8193_v18, %v8192_v52 }
 0x366   : > { %v3028_v34 = vmax.f32 %v2996_v29, 0.0  ;;  %v2997_v11 = vadd.f32 %v8179_v32, %v2869_v9  ;;  %v2870_v36 = vadd.f32 %v2827_v13, %v2334_v49  ;;  %v2297_v23 = vpop.f32.mrf.mxu0  ;;  %v8194_v49 = vld [vmem:[#allocation16_spill] sm:$0xff]  ;;  %v8195_v32 = vld [vmem:[#allocation18_spill] sm:$0xff] }
 0x367   : > { %v2829_v3 = vpop.f32.mrf.mxu1  ;;  %v2337_v53 = vadd.f32 %v2297_v23, %v1795_v37  ;;  %v1805_v29 = vadd.f32 %v8195_v32, %v8194_v49  ;;  %v8196_v37 = vld [vmem:[#allocation17_spill] sm:$0xff]  ;;  %v8197_v23 = vld [vmem:[#allocation12_spill] sm:$0xff] }
 0x368   : > { %v3048_v61 = vpack.c.bf16 %v3028_v34, %v3026_v51  ;;  %v3029_v58 = vmax.f32 %v2997_v11, 0.0  ;;  %v2871_v21 = vadd.f32 %v2829_v3, %v2335_v6  ;;  %v2301_v33 = vpop.f32.mrf.mxu0  ;;  %v2998_v39 = vadd.f32 %v8186_v55, %v2870_v36 }
 0x369   : > { %v2831_v26 = vpop.f32.mrf.mxu1  ;;  %v2338_v9 = vadd.f32 %v2301_v33, %v1799_v63 }
 0x36a   : > { %v2872_v35 = vadd.f32 %v2831_v26, %v2336_v62  ;;  %v3049_v30 = vpack.c.bf16 %v3029_v58, %v3027_v22  ;;  %v2303_v0 = vpop.f32.mrf.mxu0  ;;  %v2999_v56 = vadd.f32 %v8186_v55, %v2871_v21  ;;  %v3030_v48 = vmax.f32 %v2998_v39, 0.0 }
 0x36b   : > { %v2833_v24 = vpop.f32.mrf.mxu1  ;;  %v2339_v7 = vadd.f32 %v2303_v0, %v1801_v20  ;;  %v5147_v0 = vld [vmem:[%s8025_s5 + $0x60] sm:$0xff]  }
 0x36c   : > { %v3000_v45 = vadd.f32 %v8187_v31, %v2872_v35  ;;  %v2873_v5 = vadd.f32 %v2833_v24, %v2337_v53  ;;  %v2305_v12 = vpop.f32.mrf.mxu0  ;;  %v3031_v59 = vmax.f32 %v2999_v56, 0.0  ;;  %v5145_v35 = vld [vmem:[%s8025_s5 + $0x50] sm:$0xff]   ;;  %v5148_v24 = vld [vmem:[%s8025_s5 + $0x68] sm:$0xff]  }
 0x36d   : > { %v2837_v44 = vpop.f32.mrf.mxu1  ;;  %v2340_v16 = vadd.f32 %v2305_v12, %v1803_v10  ;;  %v5149_v56 = vld [vmem:[%s8025_s5 + $0x70] sm:$0xff]  }
 0x36e   : > { %v3032_v1 = vmax.f32 %v3000_v45, 0.0  ;;  %v3001_v43 = vadd.f32 %v8187_v31, %v2873_v5  ;;  %v2307_v41 = vpop.f32.mrf.mxu0  ;;  %v2874_v13 = vadd.f32 %v2837_v44, %v2338_v9  ;;  %v5150_v31 = vld [vmem:[%s8025_s5 + $0x78] sm:$0xff]   ;;  %v7805_v45 = vpop.permute.xlu0 %3190 }
 0x36f   : > { %v2839_v40 = vpop.f32.mrf.mxu1  ;;  %v2341_v11 = vadd.f32 %v2307_v41, %v1805_v29  ;;  %v7807_v5 = vpop.permute.xlu1 %3195 }
 0x370   : > { %v3050_v4 = vpack.c.bf16 %v3032_v1, %v3030_v48  ;;  %v3033_v42 = vmax.f32 %v3001_v43, 0.0  ;;  %v2875_v51 = vadd.f32 %v2839_v40, %v2339_v7  ;;  %v3002_v58 = vadd.f32 %v8196_v37, %v2874_v13 }
 0x371   : > { %v2841_v34 = vpop.f32.mrf.mxu1 }
 0x372   : > { %v2876_v36 = vadd.f32 %v2841_v34, %v2340_v16  ;;  %v3051_v50 = vpack.c.bf16 %v3033_v42, %v3031_v59  ;;  %v3003_v6 = vadd.f32 %v8196_v37, %v2875_v51  ;;  %v3034_v55 = vmax.f32 %v3002_v58, 0.0  ;;  %v7809_v28 = vpop.permute.xlu0 %3180 }
 0x373   : > { %v2843_v15 = vpop.f32.mrf.mxu1  ;;  %v7811_v2 = vpop.permute.xlu1 %3185 }
 0x374   : > { %v3004_v3 = vadd.f32 %v8197_v23, %v2876_v36  ;;  %v2877_v22 = vadd.f32 %v2843_v15, %v2341_v11  ;;  %v3035_v33 = vmax.f32 %v3003_v6, 0.0 }
 0x376   : > { %v3005_v62 = vadd.f32 %v8197_v23, %v2877_v22  ;;  %v3036_v21 = vmax.f32 %v3004_v3, 0.0  ;;  %v7813_v63 = vpop.permute.xlu0 %3170 }
 0x377   : > { %v7815_v54 = vpop.permute.xlu1 %3175 }
 0x378   : > { %v3037_v26 = vmax.f32 %v3005_v62, 0.0  ;;  %v3052_v53 = vpack.c.bf16 %v3036_v21, %v3034_v55 }
 0x37a   : > { %v3053_v39 = vpack.c.bf16 %v3037_v26, %v3035_v33  ;;  %v7817_v47 = vpop.permute.xlu0 %3160 }
 0x37b   : > { %v7819_v20 = vpop.permute.xlu1 %3165 }
 0x37c   : > { %3374 = vmatprep.subr.bf16.mxu0 %v3053_v39 }
 0x37d   : > { %3375 = vmatpush1.bf16.msra.mxu0 %v3052_v53 }
 0x37e   : > { %3376 = vmatprep.subr.bf16.mxu0 %v3051_v50  ;;  %v7821_v12 = vpop.permute.xlu0 %3150 }
 0x37f   : > { %v7823_v44 = vpop.permute.xlu1 %3155 }
 0x381   : > { %3377 = vmatpush1.bf16.msra.mxu0 %v3050_v4 }
 0x382   : > { %3378 = vmatprep.subr.bf16.mxu0 %v3049_v30  ;;  %v5146_v30 = vld [vmem:[%s8025_s5 + $0x58] sm:$0xff]   ;;  %v7825_v52 = vpop.permute.xlu0 %3140 }
 0x383   : > { %v7827_v18 = vpop.permute.xlu1 %3145 }
 0x385   : > { %3379 = vmatpush1.bf16.msra.mxu0 %v3048_v61  ;;  %v5144_v61 = vld [vmem:[%s8025_s5 + $0x48] sm:$0xff]  }
 0x386   : > { %3380 = vmatprep.subr.bf16.mxu0 %v7705_v8  ;;  %v5135_v8 = vld [vmem:[%s8025_s5] sm:$0xff]   ;;  %v3131_v10 = vpop.permute.xlu0 %3130 }
 0x387   : > { %v3136_v48 = vpop.permute.xlu1 %3135 }
 0x389   : > { %3381 = vmatpush1.bf16.msra.mxu0 %v7700_v25  ;;  %v5143_v25 = vld [vmem:[%s8025_s5 + $0x40] sm:$0xff]  }
 0x38a   : > { %3382 = vmatprep.subr.bf16.mxu0 %v7689_v19  ;;  %v8198_v19 = vmov 0   ;;  %v3121_v43 = vpop.permute.xlu0 %3120 }
 0x38b   : > { %v3126_v29 = vpop.permute.xlu1 %3125 }
 0x38d   : > { %3383 = vmatpush1.bf16.msra.mxu0 %v7684_v14  ;;  %v5142_v14 = vld [vmem:[%s8025_s5 + $0x38] sm:$0xff]  }
 0x38e   : > { %3384 = vmatprep.subr.bf16.mxu0 %v7673_v46  ;;  %v5136_v46 = vld [vmem:[%s8025_s5 + $0x8] sm:$0xff]  }
 0x391   : > { %3385 = vmatpush1.bf16.msra.mxu0 %v7666_v27  ;;  %v5141_v27 = vld [vmem:[%s8025_s5 + $0x30] sm:$0xff]  }
 0x392   : > { %3386 = vmatprep.subr.bf16.mxu0 %v7659_v17  ;;  %v5140_v17 = vld [vmem:[%s8025_s5 + $0x28] sm:$0xff]  }
 0x395   : > { %3387 = vmatpush1.bf16.msra.mxu0 %v7654_v38  ;;  %v5139_v38 = vld [vmem:[%s8025_s5 + $0x20] sm:$0xff]  }
 0x396   : > { %3388 = vmatprep.subr.bf16.mxu0 %v7651_v57  ;;  %v5137_v57 = vld [vmem:[%s8025_s5 + $0x10] sm:$0xff]  }
 0x399   : > { %3389 = vmatpush1.bf16.msra.mxu0 %v7647_v60  ;;  %v5138_v60 = vld [vmem:[%s8025_s5 + $0x18] sm:$0xff]  }
 0x39c   : > { %3407 = vmatmul.mubr.bf16.vlgmr.msra.gmra.mxu0 %v5135_v8 }
 0x39d   : > { %3416 = vmatprep.mubr.bf16.mxu0 %v8198_v19 }
 0x3a4   : > { %3417 = vmatmul.mubr.bf16.gmra.mxu0 %v5136_v46 }
 0x3a5   : > { %3426 = vmatprep.mubr.bf16.mxu0 %v8198_v19 }
 0x3ac   : > { %3427 = vmatmul.mubr.bf16.gmra.mxu0 %v5137_v57  ;;  %v7849_v57 = vpop.permute.xlu1 %3275 }
 0x3ad   : > { %3436 = vmatprep.mubr.bf16.mxu0 %v8198_v19 }
 0x3b4   : > { %3437 = vmatmul.mubr.bf16.gmra.mxu0 %v5138_v60 }
 0x3b5   : > { %3446 = vmatprep.mubr.bf16.mxu0 %v8198_v19 }
 0x3bc   : > { %3447 = vmatmul.mubr.bf16.gmra.mxu0 %v5139_v38 }
 0x3bd   : > { %3456 = vmatprep.mubr.bf16.mxu0 %v8198_v19 }
 0x3c4   : > { %3457 = vmatmul.mubr.bf16.gmra.mxu0 %v5140_v17 }
 0x3c5   : > { %3466 = vmatprep.mubr.bf16.mxu0 %v8198_v19 }
 0x3cc   : > { %3467 = vmatmul.mubr.bf16.gmra.mxu0 %v5141_v27 }
 0x3cd   : > { %3476 = vmatprep.mubr.bf16.mxu0 %v8198_v19 }
 0x3d4   : > { %3477 = vmatmul.mubr.bf16.gmra.mxu0 %v5142_v14  ;;  %v7859_v14 = vpop.permute.xlu1 %3265 }
 0x3d5   : > { %3486 = vmatprep.mubr.bf16.mxu0 %v8198_v19 }
 0x3dc   : > { %3487 = vmatmul.mubr.bf16.gmra.mxu0 %v5143_v25 }
 0x3dd   : > { %3496 = vmatprep.mubr.bf16.mxu0 %v8198_v19 }
 0x3e4   : > { %3497 = vmatmul.mubr.bf16.gmra.mxu0 %v5144_v61 }
 0x3e5   : > { %3506 = vmatprep.mubr.bf16.mxu0 %v8198_v19 }
 0x3ec   : > { %3507 = vmatmul.mubr.bf16.gmra.mxu0 %v5145_v35  ;;  %v5153_v35 = vld [vmem:[%s8027_s7 + $0x4] ss:$8 sps:$4 sm:$0xff]  }
 0x3ed   : > { %3516 = vmatprep.mubr.bf16.mxu0 %v8198_v19 }
 0x3f4   : > { %3517 = vmatmul.mubr.bf16.gmra.mxu0 %v5146_v30  ;;  %v5156_v30 = vld [vmem:[%s8027_s7 + $0x24] ss:$8 sps:$4 sm:$0xff]  }
 0x3f5   : > { %3526 = vmatprep.mubr.bf16.mxu0 %v8198_v19  ;;  %3787 = vmatprep.mubr.bf16.mxu1 %v5156_v30 }
 0x3fc   : > { %3527 = vmatmul.mubr.bf16.gmra.mxu0 %v5147_v0 }
 0x3fd   : > { %3536 = vmatprep.mubr.bf16.mxu0 %v8198_v19 }
 0x404   : > { %3537 = vmatmul.mubr.bf16.gmra.mxu0 %v5148_v24 }
 0x405   : > { %3546 = vmatprep.mubr.bf16.mxu0 %v8198_v19 }
 0x40c   : > { %3547 = vmatmul.mubr.bf16.gmra.mxu0 %v5149_v56  ;;  %v7875_v56 = vpop.permute.xlu1 %3255 }
 0x40d   : > { %3556 = vmatprep.mubr.bf16.mxu0 %v8198_v19  ;;  %v7845_v19 = vpop.permute.xlu0 %3270 }
 0x411   : > { %v7855_v17 = vpop.permute.xlu0 %3260 }
 0x414   : > { %3557 = vmatmul.mubr.bf16.gmra.mxu0 %v5150_v31 }
 0x415   : > { %v7871_v0 = vpop.permute.xlu0 %3250  ;;  %3767 = vmatprep.mubr.bf16.mxu0 %v5153_v35 }
 0x45c   : > { %v3408_v1 = vpop.f32.mrf.mxu0 }
 0x45d   : > { %v3409_v32 = vadd.f32 %v3408_v1, %v3121_v43 }
 0x45e   : > { %v3410_v49 = vpop.f32.mrf.mxu0 }
 0x45f   : > { %v3411_v7 = vadd.f32 %v3410_v49, %v3121_v43  ;;  %v3567_v59 = vmax.f32 %v3409_v32, 0.0  ;;  %v7879_v43 = vpop.permute.xlu1 %3245 }
 0x460   : > { %v3412_v9 = vpop.f32.mrf.mxu0  ;;  %8200 = vst [vmem:[#allocation9_spill] sm:$0xff] %v7879_v43 }
 0x461   : > { %v3413_v41 = vadd.f32 %v3412_v9, %v3126_v29  ;;  %v3568_v13 = vmax.f32 %v3411_v7, 0.0 }
 0x462   : > { %v3414_v40 = vpop.f32.mrf.mxu0 }
 0x463   : > { %v3569_v4 = vmax.f32 %v3413_v41, 0.0  ;;  %v3415_v42 = vadd.f32 %v3414_v40, %v3126_v29  ;;  %v7883_v7 = vpop.permute.xlu1 %3235 }
 0x464   : > { %v3418_v16 = vpop.f32.mrf.mxu0  ;;  %8202 = vst [vmem:[#allocation6_spill] sm:$0xff] %v7883_v7 }
 0x465   : > { %v7829_v51 = vpack.c.bf16 %v3569_v4, %v3567_v59  ;;  %v3570_v34 = vmax.f32 %v3415_v42, 0.0  ;;  %v3419_v50 = vadd.f32 %v3418_v16, %v3131_v10 }
 0x466   : > { %v3420_v11 = vpop.f32.mrf.mxu0 }
 0x467   : > { %v7831_v36 = vpack.c.bf16 %v3570_v34, %v3568_v13  ;;  %v3421_v37 = vadd.f32 %v3420_v11, %v3131_v10  ;;  %v3571_v3 = vmax.f32 %v3419_v50, 0.0  ;;  %v7887_v42 = vpop.permute.xlu1 %3225 }
 0x468   : > { %v3422_v15 = vpop.f32.mrf.mxu0  ;;  %8204 = vst [vmem:[#allocation7_spill] sm:$0xff] %v7887_v42 }
 0x469   : > { %v3423_v6 = vadd.f32 %v3422_v15, %v3136_v48  ;;  %v3572_v21 = vmax.f32 %v3421_v37, 0.0 }
 0x46a   : > { %v3424_v23 = vpop.f32.mrf.mxu0 }
 0x46b   : > { %v3573_v22 = vmax.f32 %v3423_v6, 0.0  ;;  %v3425_v58 = vadd.f32 %v3424_v23, %v3136_v48  ;;  %v7877_v48 = vpop.permute.xlu0 %3240  ;;  %v7894_v6 = vpop.permute.xlu1 %3215 }
 0x46c   : > { %v7833_v62 = vpop.f32.mrf.mxu0  ;;  %8199 = vst [vmem:[#allocation11_spill] sm:$0xff] %v7877_v48 }
 0x46d   : > { %v7835_v33 = vpack.c.bf16 %v3573_v22, %v3571_v3  ;;  %v3574_v26 = vmax.f32 %v3425_v58, 0.0 }
 0x46e   : > { %v7837_v55 = vpop.f32.mrf.mxu0 }
 0x46f   : > { %v7839_v39 = vpack.c.bf16 %v3574_v26, %v3572_v21  ;;  %v7881_v29 = vpop.permute.xlu0 %3230 }
 0x470   : > { %v7841_v53 = vpop.f32.mrf.mxu0  ;;  %8201 = vst [vmem:[#allocation4_spill] sm:$0xff] %v7881_v29 }
 0x472   : > { %v7843_v8 = vpop.f32.mrf.mxu0 }
 0x473   : > { %v7885_v59 = vpop.permute.xlu0 %3220 }
 0x474   : > { %v7847_v46 = vpop.f32.mrf.mxu0  ;;  %8203 = vst [vmem:[#allocation5_spill] sm:$0xff] %v7885_v59 }
 0x476   : > { %v7851_v60 = vpop.f32.mrf.mxu0 }
 0x477   : > { %v7889_v34 = vpop.permute.xlu0 %3210 }
 0x478   : > { %v7853_v38 = vpop.f32.mrf.mxu0 }
 0x47a   : > { %v7857_v27 = vpop.f32.mrf.mxu0 }
 0x47b   : > { %v3201_v42 = vpop.permute.xlu0 %3200 }
 0x47c   : > { %v7861_v25 = vpop.f32.mrf.mxu0 }
 0x47e   : > { %v7863_v61 = vpop.f32.mrf.mxu0 }
 0x480   : > { %v7873_v24 = vpop.f32.mrf.mxu0 }
 0x482   : > { %v3454_v31 = vpop.f32.mrf.mxu0 }
 0x484   : > { %v3458_v10 = vpop.f32.mrf.mxu0 }
 0x486   : > { %v3460_v1 = vpop.f32.mrf.mxu0 }
 0x488   : > { %v3462_v49 = vpop.f32.mrf.mxu0 }
 0x48a   : > { %v3464_v32 = vpop.f32.mrf.mxu0 }
 0x48b   : > { %v3465_v30 = vadd.f32 %v3464_v32, %v7815_v54 }
 0x48c   : > { %v3468_v9 = vpop.f32.mrf.mxu0 }
 0x48e   : > { %v3470_v41 = vpop.f32.mrf.mxu0 }
 0x48f   : > { %v3471_v22 = vadd.f32 %v3470_v41, %v7809_v28 }
 0x490   : > { %v3472_v40 = vpop.f32.mrf.mxu0 }
 0x491   : > { %v3473_v21 = vadd.f32 %v3472_v40, %v7811_v2  ;;  %v3463_v40 = vadd.f32 %v3462_v49, %v7815_v54 }
 0x492   : > { %v3474_v4 = vpop.f32.mrf.mxu0 }
 0x493   : > { %v3475_v50 = vadd.f32 %v3474_v4, %v7811_v2  ;;  %v3455_v2 = vadd.f32 %v3454_v31, %v7819_v20 }
 0x494   : > { %v3478_v16 = vpop.f32.mrf.mxu0 }
 0x495   : > { %v3479_v23 = vadd.f32 %v3478_v16, %v7805_v45  ;;  %v3594_v4 = vmax.f32 %v3475_v50, 0.0  ;;  %v3592_v16 = vmax.f32 %v3471_v22, 0.0 }
 0x496   : > { %v3480_v13 = vpop.f32.mrf.mxu0 }
 0x497   : > { %v3481_v15 = vadd.f32 %v3480_v13, %v7805_v45  ;;  %v3595_v29 = vmax.f32 %v3479_v23, 0.0  ;;  %v3461_v45 = vadd.f32 %v3460_v1, %v7813_v63  ;;  %v3451_v1 = vadd.f32 %v7863_v61, %v7817_v47 }
 0x498   : > { %v3482_v11 = vpop.f32.mrf.mxu0 }
 0x499   : > { %v3483_v37 = vadd.f32 %v3482_v11, %v7807_v5  ;;  %v3596_v59 = vmax.f32 %v3481_v15, 0.0  ;;  %v3469_v11 = vadd.f32 %v3468_v9, %v7809_v28  ;;  %v3590_v15 = vmax.f32 %v3465_v30, 0.0 }
 0x49a   : > { %v3484_v3 = vpop.f32.mrf.mxu0  ;;  %v3445_v28 = vadd.f32 %v7857_v27, %v7823_v44  ;;  %v3459_v9 = vadd.f32 %v3458_v10, %v7813_v63  ;;  %v3588_v54 = vmax.f32 %v3461_v45, 0.0  ;;  %v3589_v27 = vmax.f32 %v3463_v40, 0.0 }
 0x49b   : > { %v3485_v58 = vadd.f32 %v3484_v3, %v7807_v5  ;;  %v3597_v26 = vmax.f32 %v3483_v37, 0.0  ;;  %v3206_v5 = vpop.permute.xlu1 %3205  ;;  %v3593_v37 = vmax.f32 %v3473_v21, 0.0  ;;  %v3644_v3 = vpack.c.bf16 %v3594_v4, %v3592_v16 }
 0x49c   : > { %v3488_v35 = vpop.f32.mrf.mxu0  ;;  %v3591_v31 = vmax.f32 %v3469_v11, 0.0  ;;  %v3642_v61 = vpack.c.bf16 %v3590_v15, %v3588_v54  ;;  %v3441_v30 = vadd.f32 %v7851_v60, %v7821_v12  ;;  %v3582_v16 = vmax.f32 %v3445_v28, 0.0 }
 0x49d   : > { %v3598_v13 = vmax.f32 %v3485_v58, 0.0  ;;  %v3489_v48 = vadd.f32 %v3488_v35, %v3201_v42  ;;  %v3645_v32 = vpack.c.bf16 %v3597_v26, %v3595_v29  ;;  %v3449_v35 = vadd.f32 %v7861_v25, %v7817_v47 }
 0x49e   : > { %v3490_v7 = vpop.f32.mrf.mxu0  ;;  %v3643_v22 = vpack.c.bf16 %v3593_v37, %v3591_v31  ;;  %v3443_v47 = vadd.f32 %v7853_v38, %v7823_v44  ;;  %v3439_v40 = vadd.f32 %v7847_v46, %v7821_v12  ;;  %v3580_v44 = vmax.f32 %v3441_v30, 0.0 }
 0x49f   : > { %v3646_v41 = vpack.c.bf16 %v3598_v13, %v3596_v59  ;;  %v3491_v58 = vadd.f32 %v3490_v7, %v3201_v42  ;;  %v3599_v49 = vmax.f32 %v3489_v48, 0.0  ;;  %v3453_v7 = vadd.f32 %v7873_v24, %v7819_v20 }
 0x4a0   : > { %v3492_v50 = vpop.f32.mrf.mxu0  ;;  %v3586_v42 = vmax.f32 %v3455_v2, 0.0  ;;  %v3587_v48 = vmax.f32 %v3459_v9, 0.0  ;;  %v3584_v20 = vmax.f32 %v3451_v1, 0.0  ;;  %v3435_v13 = vadd.f32 %v7843_v8, %v7827_v18 }
 0x4a1   : > { %v3493_v43 = vadd.f32 %v3492_v50, %v3206_v5  ;;  %3735 = vmatprep.subr.bf16.mxu0 %v3646_v41  ;;  %4472 = vmatprep.subr.bf16.mxu1 %v3646_v41  ;;  %v3600_v26 = vmax.f32 %v3491_v58, 0.0  ;;  %v3585_v25 = vmax.f32 %v3453_v7, 0.0  ;;  %v3431_v2 = vadd.f32 %v7837_v55, %v7825_v52 }
 0x4a2   : > { %v3494_v59 = vpop.f32.mrf.mxu0  ;;  %3736 = vmatpush1.bf16.msra.mxu0 %v3645_v32  ;;  %4488 = vmatpush1.bf16.msra.mxu1 %v3645_v32  ;;  %v3641_v11 = vpack.c.bf16 %v3589_v27, %v3587_v48  ;;  %v3640_v41 = vpack.c.bf16 %v3586_v42, %v3584_v20  ;;  %v3583_v37 = vmax.f32 %v3449_v35, 0.0  ;;  %v3578_v15 = vmax.f32 %v3435_v13, 0.0 }
 0x4a3   : > { %v3601_v29 = vmax.f32 %v3493_v43, 0.0  ;;  %v3495_v23 = vadd.f32 %v3494_v59, %v3206_v5  ;;  %3737 = vmatprep.subr.bf16.mxu0 %v3644_v3  ;;  %4473 = vmatprep.subr.bf16.mxu1 %v3644_v3  ;;  %v3581_v3 = vmax.f32 %v3443_v47, 0.0  ;;  %v3638_v12 = vpack.c.bf16 %v3582_v16, %v3580_v44 }
 0x4a4   : > { %v3498_v21 = vpop.f32.mrf.mxu0  ;;  %v3639_v55 = vpack.c.bf16 %v3585_v25, %v3583_v37  ;;  %v3429_v9 = vadd.f32 %v7833_v62, %v7825_v52  ;;  %v3579_v31 = vmax.f32 %v3439_v40, 0.0  ;;  %v3576_v59 = vmax.f32 %v3431_v2, 0.0 }
 0x4a5   : > { %v7912_v63 = vpack.c.bf16 %v3601_v29, %v3599_v49  ;;  %v3602_v10 = vmax.f32 %v3495_v23, 0.0  ;;  %v3499_v4 = vadd.f32 %v3498_v21, %v7889_v34 }
 0x4a6   : > { %v3500_v43 = vpop.f32.mrf.mxu0  ;;  %3738 = vmatpush1.bf16.msra.mxu0 %v3643_v22  ;;  %4489 = vmatpush1.bf16.msra.mxu1 %v3643_v22  ;;  %v3637_v54 = vpack.c.bf16 %v3581_v3, %v3579_v31  ;;  %v3636_v29 = vpack.c.bf16 %v3578_v15, %v3576_v59  ;;  %v3575_v23 = vmax.f32 %v3429_v9, 0.0 }
 0x4a7   : > { %v7918_v24 = vpack.c.bf16 %v3602_v10, %v3600_v26  ;;  %3739 = vmatprep.subr.bf16.mxu0 %v3642_v61  ;;  %4474 = vmatprep.subr.bf16.mxu1 %v3642_v61  ;;  %v3501_v60 = vadd.f32 %v3500_v43, %v7889_v34  ;;  %v3603_v38 = vmax.f32 %v3499_v4, 0.0  ;;  %v3433_v34 = vadd.f32 %v7841_v53, %v7827_v18 }
 0x4a8   : > { %v3502_v45 = vpop.f32.mrf.mxu0 }
 0x4a9   : > { %v3503_v5 = vadd.f32 %v3502_v45, %v7894_v6  ;;  %v3604_v46 = vmax.f32 %v3501_v60, 0.0  ;;  %v3577_v53 = vmax.f32 %v3433_v34, 0.0 }
 0x4aa   : > { %v3504_v8 = vpop.f32.mrf.mxu0  ;;  %3740 = vmatpush1.bf16.msra.mxu0 %v3641_v11  ;;  %4490 = vmatpush1.bf16.msra.mxu1 %v3641_v11 }
 0x4ab   : > { %v3605_v32 = vmax.f32 %v3503_v5, 0.0  ;;  %v3505_v50 = vadd.f32 %v3504_v8, %v7894_v6  ;;  %3741 = vmatprep.subr.bf16.mxu0 %v3640_v41  ;;  %4475 = vmatprep.subr.bf16.mxu1 %v3640_v41  ;;  %v3635_v52 = vpack.c.bf16 %v3577_v53, %v3575_v23 }
 0x4ac   : > { %v7934_v58 = vpop.f32.mrf.mxu0 }
 0x4ad   : > { %v7936_v28 = vpack.c.bf16 %v3605_v32, %v3603_v38  ;;  %v3606_v1 = vmax.f32 %v3505_v50, 0.0 }
 0x4ae   : > { %v7940_v6 = vpop.f32.mrf.mxu0  ;;  %3742 = vmatpush1.bf16.msra.mxu0 %v3639_v55  ;;  %4491 = vmatpush1.bf16.msra.mxu1 %v3639_v55 }
 0x4af   : > { %v7942_v18 = vpack.c.bf16 %v3606_v1, %v3604_v46  ;;  %3743 = vmatprep.subr.bf16.mxu0 %v3638_v12  ;;  %4476 = vmatprep.subr.bf16.mxu1 %v3638_v12 }
 0x4b0   : > { %v7944_v49 = vpop.f32.mrf.mxu0 }
 0x4b2   : > { %v7946_v7 = vpop.f32.mrf.mxu0  ;;  %3744 = vmatpush1.bf16.msra.mxu0 %v3637_v54  ;;  %4492 = vmatpush1.bf16.msra.mxu1 %v3637_v54 }
 0x4b3   : > { %3745 = vmatprep.subr.bf16.mxu0 %v3636_v29  ;;  %4477 = vmatprep.subr.bf16.mxu1 %v3636_v29  ;;  %v8207_v29 = vld [vmem:[#allocation6_spill] sm:$0xff] }
 0x4b4   : > { %v7948_v62 = vpop.f32.mrf.mxu0 }
 0x4b6   : > { %v7950_v42 = vpop.f32.mrf.mxu0  ;;  %3746 = vmatpush1.bf16.msra.mxu0 %v3635_v52  ;;  %4493 = vmatpush1.bf16.msra.mxu1 %v3635_v52 }
 0x4b7   : > { %3747 = vmatprep.subr.bf16.mxu0 %v7839_v39  ;;  %4478 = vmatprep.subr.bf16.mxu1 %v7839_v39 }
 0x4b8   : > { %v7954_v27 = vpop.f32.mrf.mxu0 }
 0x4ba   : > { %v3524_v22 = vpop.f32.mrf.mxu0  ;;  %3748 = vmatpush1.bf16.msra.mxu0 %v7835_v33  ;;  %4494 = vmatpush1.bf16.msra.mxu1 %v7835_v33 }
 0x4bb   : > { %3749 = vmatprep.subr.bf16.mxu0 %v7831_v36  ;;  %4479 = vmatprep.subr.bf16.mxu1 %v7831_v36  ;;  %v3525_v23 = vadd.f32 %v3524_v22, %v8207_v29 }
 0x4bc   : > { %v3528_v21 = vpop.f32.mrf.mxu0 }
 0x4be   : > { %v3530_v61 = vpop.f32.mrf.mxu0  ;;  %3750 = vmatpush1.bf16.msra.mxu0 %v7829_v51  ;;  %4495 = vmatpush1.bf16.msra.mxu1 %v7829_v51 }
 0x4c0   : > { %v3532_v26 = vpop.f32.mrf.mxu0 }
 0x4c2   : > { %v3534_v10 = vpop.f32.mrf.mxu0 }
 0x4c4   : > { %v3538_v39 = vpop.f32.mrf.mxu0 }
 0x4c5   : > { %v3539_v1 = vadd.f32 %v3538_v39, %v7871_v0 }
 0x4c6   : > { %v3540_v35 = vpop.f32.mrf.mxu0 }
 0x4c7   : > { %v3541_v50 = vadd.f32 %v3540_v35, %v7871_v0  ;;  %v8208_v0 = vld [vmem:[#allocation4_spill] sm:$0xff] }
 0x4c8   : > { %v3542_v48 = vpop.f32.mrf.mxu0  ;;  %v3521_v39 = vadd.f32 %v7950_v42, %v8208_v0  ;;  %v8210_v42 = vld [vmem:[#allocation5_spill] sm:$0xff] }
 0x4c9   : > { %v3543_v15 = vadd.f32 %v3542_v48, %v7875_v56  ;;  %v3620_v59 = vmax.f32 %v3541_v50, 0.0  ;;  %v3619_v48 = vmax.f32 %v3539_v1, 0.0 }
 0x4ca   : > { %v3544_v43 = vpop.f32.mrf.mxu0 }
 0x4cb   : > { %v3545_v40 = vadd.f32 %v3544_v43, %v7875_v56  ;;  %v3621_v53 = vmax.f32 %v3543_v15, 0.0 }
 0x4cc   : > { %v3548_v30 = vpop.f32.mrf.mxu0 }
 0x4cd   : > { %v3549_v38 = vadd.f32 %v3548_v30, %v7855_v17  ;;  %v3657_v30 = vpack.c.bf16 %v3621_v53, %v3619_v48 }
 0x4ce   : > { %v3550_v20 = vpop.f32.mrf.mxu0 }
 0x4cf   : > { %v3551_v41 = vadd.f32 %v3550_v20, %v7855_v17  ;;  %v3623_v9 = vmax.f32 %v3549_v38, 0.0  ;;  %v8206_v17 = vld [vmem:[#allocation11_spill] sm:$0xff] }
 0x4d0   : > { %v3552_v4 = vpop.f32.mrf.mxu0  ;;  %v3531_v31 = vadd.f32 %v3530_v61, %v8206_v17  ;;  %v3529_v35 = vadd.f32 %v3528_v21, %v8206_v17  ;;  %v8209_v20 = vld [vmem:[#allocation7_spill] sm:$0xff]  ;;  %v3519_v21 = vadd.f32 %v7948_v62, %v8208_v0 }
 0x4d1   : > { %v3553_v5 = vadd.f32 %v3552_v4, %v7859_v14  ;;  %v3624_v34 = vmax.f32 %v3551_v41, 0.0  ;;  %v3515_v22 = vadd.f32 %v7946_v7, %v8209_v20  ;;  %v3614_v4 = vmax.f32 %v3525_v23, 0.0 }
 0x4d2   : > { %v3554_v33 = vpop.f32.mrf.mxu0  ;;  %v3616_v61 = vmax.f32 %v3531_v31, 0.0  ;;  %v3611_v62 = vmax.f32 %v3519_v21, 0.0 }
 0x4d3   : > { %v3555_v36 = vadd.f32 %v3554_v33, %v7859_v14  ;;  %v3625_v3 = vmax.f32 %v3553_v5, 0.0  ;;  %v3622_v14 = vmax.f32 %v3545_v40, 0.0  ;;  %v3610_v7 = vmax.f32 %v3515_v22, 0.0  ;;  %v3683_v40 = vpop.permute.xlu1 %3682 }
 0x4d4   : > { %v3558_v13 = vpop.f32.mrf.mxu0 }
 0x4d5   : > { %v3559_v51 = vadd.f32 %v3558_v13, %v7845_v19  ;;  %v3626_v37 = vmax.f32 %v3555_v36, 0.0  ;;  %v3659_v54 = vpack.c.bf16 %v3625_v3, %v3623_v9  ;;  %v3615_v13 = vmax.f32 %v3529_v35, 0.0 }
 0x4d6   : > { %v3560_v47 = vpop.f32.mrf.mxu0 }
 0x4d7   : > { %v3561_v11 = vadd.f32 %v3560_v47, %v7845_v19  ;;  %v3627_v32 = vmax.f32 %v3559_v51, 0.0  ;;  %v3660_v46 = vpack.c.bf16 %v3626_v37, %v3624_v34  ;;  %v3511_v47 = vadd.f32 %v7940_v6, %v8210_v42 }
 0x4d8   : > { %v3562_v25 = vpop.f32.mrf.mxu0  ;;  %v3509_v51 = vadd.f32 %v7934_v58, %v8210_v42  ;;  %v5151_v58 = vld [vmem:[%s8027_s7] ss:$8 sps:$4 sm:$0xff]  }
 0x4d9   : > { %v3563_v45 = vadd.f32 %v3562_v25, %v7849_v57  ;;  %v3628_v8 = vmax.f32 %v3561_v11, 0.0  ;;  %v3612_v25 = vmax.f32 %v3521_v39, 0.0 }
 0x4da   : > { %v3564_v16 = vpop.f32.mrf.mxu0  ;;  %v3607_v5 = vmax.f32 %v3509_v51, 0.0 }
 0x4db   : > { %v3565_v60 = vadd.f32 %v3564_v16, %v7849_v57  ;;  %v3629_v2 = vmax.f32 %v3563_v45, 0.0  ;;  %v8205_v57 = vld [vmem:[#allocation9_spill] sm:$0xff]  ;;  %v3654_v45 = vpack.c.bf16 %v3614_v4, %v3612_v25  ;;  %v3608_v16 = vmax.f32 %v3511_v47, 0.0 }
 0x4dc   : > { %v3535_v12 = vadd.f32 %v3534_v10, %v8205_v57  ;;  %v3533_v56 = vadd.f32 %v3532_v26, %v8205_v57  ;;  %v3658_v10 = vpack.c.bf16 %v3622_v14, %v3620_v59  ;;  %v3523_v26 = vadd.f32 %v7954_v27, %v8207_v29 }
 0x4dd   : > { %v3630_v44 = vmax.f32 %v3565_v60, 0.0  ;;  %v3661_v55 = vpack.c.bf16 %v3629_v2, %v3627_v32  ;;  %v3513_v27 = vadd.f32 %v7944_v49, %v8209_v20  ;;  %v3652_v60 = vpack.c.bf16 %v3610_v7, %v3608_v16  ;;  %v5154_v2 = vld [vmem:[%s8027_s7 + $0x20] ss:$8 sps:$4 sm:$0xff]  }
 0x4de   : > { %v3618_v52 = vmax.f32 %v3535_v12, 0.0  ;;  %v3617_v43 = vmax.f32 %v3533_v56, 0.0  ;;  %v3613_v36 = vmax.f32 %v3523_v26, 0.0 }
 0x4df   : > { %v3662_v19 = vpack.c.bf16 %v3630_v44, %v3628_v8  ;;  %v3609_v6 = vmax.f32 %v3513_v27, 0.0  ;;  %v3693_v8 = vpop.permute.xlu1 %3692 }
 0x4e0   : > { %v3656_v33 = vpack.c.bf16 %v3618_v52, %v3616_v61  ;;  %v3655_v11 = vpack.c.bf16 %v3617_v43, %v3615_v13  ;;  %v3653_v41 = vpack.c.bf16 %v3613_v36, %v3611_v62 }
 0x4e1   : > { %3751 = vmatprep.subr.bf16.mxu0 %v3662_v19  ;;  %4480 = vmatprep.subr.bf16.mxu1 %v3662_v19  ;;  %v3651_v49 = vpack.c.bf16 %v3609_v6, %v3607_v5 }
 0x4e2   : > { %3752 = vmatpush2.bf16.msra.mxu0 %v3661_v55  ;;  %4496 = vmatpush2.bf16.msra.mxu1 %v3661_v55 }
 0x4e3   : > { %3753 = vmatprep.subr.bf16.mxu0 %v3660_v46  ;;  %4481 = vmatprep.subr.bf16.mxu1 %v3660_v46  ;;  %v3703_v46 = vpop.permute.xlu1 %3702 }
 0x4e6   : > { %3754 = vmatpush2.bf16.msra.mxu0 %v3659_v54  ;;  %4497 = vmatpush2.bf16.msra.mxu1 %v3659_v54 }
 0x4e7   : > { %3755 = vmatprep.subr.bf16.mxu0 %v3658_v10  ;;  %4482 = vmatprep.subr.bf16.mxu1 %v3658_v10 }
 0x4ea   : > { %3756 = vmatpush2.bf16.msra.mxu0 %v3657_v30  ;;  %4498 = vmatpush2.bf16.msra.mxu1 %v3657_v30 }
 0x4eb   : > { %3757 = vmatprep.subr.bf16.mxu0 %v3656_v33  ;;  %4483 = vmatprep.subr.bf16.mxu1 %v3656_v33 }
 0x4ee   : > { %3758 = vmatpush2.bf16.msra.mxu0 %v3655_v11  ;;  %4499 = vmatpush2.bf16.msra.mxu1 %v3655_v11 }
 0x4ef   : > { %3759 = vmatprep.subr.bf16.mxu0 %v3654_v45  ;;  %4484 = vmatprep.subr.bf16.mxu1 %v3654_v45 }
 0x4f2   : > { %3760 = vmatpush2.bf16.msra.mxu0 %v3653_v41  ;;  %4500 = vmatpush2.bf16.msra.mxu1 %v3653_v41 }
 0x4f3   : > { %3761 = vmatprep.subr.bf16.mxu0 %v3652_v60  ;;  %4485 = vmatprep.subr.bf16.mxu1 %v3652_v60 }
 0x4f6   : > { %3762 = vmatpush2.bf16.msra.mxu0 %v3651_v49  ;;  %4501 = vmatpush2.bf16.msra.mxu1 %v3651_v49 }
 0x4f7   : > { %3763 = vmatprep.subr.bf16.mxu0 %v7942_v18  ;;  %4486 = vmatprep.subr.bf16.mxu1 %v7942_v18  ;;  %v3678_v18 = vpop.permute.xlu0 %3677 }
 0x4fa   : > { %3764 = vmatpush2.bf16.msra.mxu0 %v7936_v28  ;;  %4502 = vmatpush2.bf16.msra.mxu1 %v7936_v28  ;;  %v5159_v28 = vld [vmem:[%s8027_s7 + $0x14] ss:$8 sps:$4 sm:$0xff]  }
 0x4fb   : > { %3765 = vmatprep.subr.bf16.mxu0 %v7918_v24  ;;  %4487 = vmatprep.subr.bf16.mxu1 %v7918_v24  ;;  %v5157_v24 = vld [vmem:[%s8027_s7 + $0x10] ss:$8 sps:$4 sm:$0xff]   ;;  %v3688_v37 = vpop.permute.xlu0 %3687 }
 0x4fe   : > { %3766 = vmatpush2.bf16.msra.mxu0 %v7912_v63  ;;  %4503 = vmatpush2.bf16.msra.mxu1 %v7912_v63 }
 0x4ff   : > { %v3698_v44 = vpop.permute.xlu0 %3697 }
 0x501   : > { %3768 = vmatmul.mubr.bf16.vlgmr.msra.gmra.mxu0 %v5151_v58  ;;  %3788 = vmatmul.mubr.bf16.vlgmr.msra.gmra.mxu1 %v5154_v2 }
 0x502   : > { %3777 = vmatprep.mubr.bf16.mxu0 %v5159_v28 }
 0x509   : > { %3778 = vmatmul.mubr.bf16.gmra.mxu0 %v5157_v24 }
 0x5c1   : > { %v3769_v38 = vpop.f32.mrf.mxu0  ;;  %v3789_v32 = vpop.f32.mrf.mxu1 }
 0x5c2   : > { %v3770_v63 = vadd.f32 %v3769_v38, %v3678_v18  ;;  %v3790_v50 = vadd.f32 %v3789_v32, %v3698_v44 }
 0x5c3   : > { %v3771_v34 = vpop.f32.mrf.mxu0  ;;  %v3791_v19 = vpop.f32.mrf.mxu1 }
 0x5c4   : > { %v4429_v15 = vmul.f32 -1.442695, %v3770_v63  ;;  %v4437_v3 = vmul.f32 -1.442695, %v3790_v50  ;;  %v3772_v55 = vadd.f32 %v3771_v34, %v3678_v18  ;;  %v3792_v57 = vadd.f32 %v3791_v19, %v3698_v44 }
 0x5c5   : > { %v3773_v12 = vpop.f32.mrf.mxu0  ;;  %v3793_v14 = vpop.f32.mrf.mxu1 }
 0x5c6   : > { %5160 = vpow2.f32 %v4429_v15  ;;  %v4430_v1 = vmul.f32 -1.442695, %v3772_v55  ;;  %v4438_v9 = vmul.f32 -1.442695, %v3792_v57  ;;  %v3774_v17 = vadd.f32 %v3773_v12, %v3683_v40 }
 0x5c7   : > { %5162 = vpow2.f32 %v4437_v3  ;;  %v3794_v31 = vadd.f32 %v3793_v14, %v3703_v46  ;;  %v3775_v59 = vpop.f32.mrf.mxu0  ;;  %v3795_v56 = vpop.f32.mrf.mxu1 }
 0x5c8   : > { %5164 = vpow2.f32 %v4430_v1  ;;  %v4431_v53 = vmul.f32 -1.442695, %v3774_v17  ;;  %v3776_v54 = vadd.f32 %v3775_v59, %v3683_v40  ;;  %v3796_v29 = vadd.f32 %v3795_v56, %v3703_v46 }
 0x5c9   : > { %5166 = vpow2.f32 %v4438_v9  ;;  %v4439_v23 = vmul.f32 -1.442695, %v3794_v31  ;;  %v3779_v52 = vpop.f32.mrf.mxu0 }
 0x5ca   : > { %5168 = vpow2.f32 %v4431_v53  ;;  %v4432_v10 = vmul.f32 -1.442695, %v3776_v54  ;;  %v4440_v35 = vmul.f32 -1.442695, %v3796_v29  ;;  %v3780_v48 = vadd.f32 %v3779_v52, %v3688_v37 }
 0x5cb   : > { %5170 = vpow2.f32 %v4439_v23  ;;  %v3781_v0 = vpop.f32.mrf.mxu0 }
 0x5cc   : > { %5172 = vpow2.f32 %v4432_v10  ;;  %v4433_v39 = vmul.f32 -1.442695, %v3780_v48  ;;  %v3782_v61 = vadd.f32 %v3781_v0, %v3688_v37 }
 0x5cd   : > { %5174 = vpow2.f32 %v4440_v35  ;;  %v3783_v26 = vpop.f32.mrf.mxu0 }
 0x5ce   : > { %5176 = vpow2.f32 %v4433_v39  ;;  %v4434_v43 = vmul.f32 -1.442695, %v3782_v61  ;;  %v3784_v30 = vadd.f32 %v3783_v26, %v3693_v8 }
 0x5cf   : > { %v3785_v20 = vpop.f32.mrf.mxu0 }
 0x5d0   : > { %5178 = vpow2.f32 %v4434_v43  ;;  %v4435_v22 = vmul.f32 -1.442695, %v3784_v30  ;;  %v3786_v4 = vadd.f32 %v3785_v20, %v3693_v8 }
 0x5d2   : > { %5180 = vpow2.f32 %v4435_v22  ;;  %v4436_v33 = vmul.f32 -1.442695, %v3786_v4 }
 0x5d3   : > { %v5161_v21 = vpop.eup %5160 }
 0x5d4   : > { %v5163_v13 = vpop.eup %5162  ;;  %v3834_v42 = vadd.f32 1.0, %v5161_v21  ;;  %5182 = vpow2.f32 %v4436_v33 }
 0x5d5   : > { %v5165_v47 = vpop.eup %5164  ;;  %v3842_v25 = vadd.f32 1.0, %v5163_v13 }
 0x5d6   : > { %v5167_v27 = vpop.eup %5166  ;;  %5184 = vrcp.f32 %v3834_v42  ;;  %v3835_v36 = vadd.f32 1.0, %v5165_v47 }
 0x5d7   : > { %v5169_v11 = vpop.eup %5168  ;;  %5186 = vrcp.f32 %v3842_v25  ;;  %v3843_v7 = vadd.f32 1.0, %v5167_v27 }
 0x5d8   : > { %v5171_v45 = vpop.eup %5170  ;;  %5188 = vrcp.f32 %v3835_v36  ;;  %v3836_v51 = vadd.f32 1.0, %v5169_v11 }
 0x5d9   : > { %v5173_v62 = vpop.eup %5172  ;;  %5190 = vrcp.f32 %v3843_v7  ;;  %v3844_v16 = vadd.f32 1.0, %v5171_v45 }
 0x5da   : > { %v5175_v6 = vpop.eup %5174  ;;  %5192 = vrcp.f32 %v3836_v51  ;;  %v3837_v41 = vadd.f32 1.0, %v5173_v62 }
 0x5db   : > { %v5177_v60 = vpop.eup %5176  ;;  %5194 = vrcp.f32 %v3844_v16  ;;  %v3845_v5 = vadd.f32 1.0, %v5175_v6 }
 0x5dc   : > { %5196 = vrcp.f32 %v3837_v41  ;;  %v3838_v49 = vadd.f32 1.0, %v5177_v60 }
 0x5dd   : > { %v5179_v58 = vpop.eup %5178  ;;  %5198 = vrcp.f32 %v3845_v5 }
 0x5de   : > { %v3839_v2 = vadd.f32 1.0, %v5179_v58  ;;  %5200 = vrcp.f32 %v3838_v49 }
 0x5df   : > { %v5181_v28 = vpop.eup %5180 }
 0x5e0   : > { %5202 = vrcp.f32 %v3839_v2  ;;  %v3840_v24 = vadd.f32 1.0, %v5181_v28 }
 0x5e1   : > { %v5183_v18 = vpop.eup %5182 }
 0x5e2   : > { %v3841_v40 = vadd.f32 1.0, %v5183_v18  ;;  %5204 = vrcp.f32 %v3840_v24 }
 0x5e3   : > { %v5185_v37 = vpop.eup %5184 }
 0x5e4   : > { %v5187_v8 = vpop.eup %5186  ;;  %5206 = vrcp.f32 %v3841_v40 }
 0x5e5   : > { %v5189_v44 = vpop.eup %5188 }
 0x5e6   : > { %v5191_v38 = vpop.eup %5190  ;;  %v4450_v32 = vpack.c.bf16 %v5189_v44, %v5185_v37 }
 0x5e7   : > { %v5193_v63 = vpop.eup %5192  ;;  %v4454_v50 = vpack.c.bf16 %v5191_v38, %v5187_v8 }
 0x5e8   : > { %v5195_v34 = vpop.eup %5194  ;;  %3906 = vst [vmem:[%s332_s17] sm:$0xff] %v4450_v32 }
 0x5e9   : > { %v5197_v19 = vpop.eup %5196  ;;  %3910 = vst [vmem:[%s332_s17 + $0x20] sm:$0xff] %v4454_v50 }
 0x5ea   : > { %v5199_v15 = vpop.eup %5198  ;;  %v4451_v3 = vpack.c.bf16 %v5197_v19, %v5193_v63 }
 0x5eb   : > { %v4455_v55 = vpack.c.bf16 %v5199_v15, %v5195_v34  ;;  %v5201_v57 = vpop.eup %5200 }
 0x5ec   : > { %3907 = vst [vmem:[%s332_s17 + $0x8] sm:$0xff] %v4451_v3 }
 0x5ed   : > { %v5203_v12 = vpop.eup %5202  ;;  %3911 = vst [vmem:[%s332_s17 + $0x28] sm:$0xff] %v4455_v55 }
 0x5ee   : > { %v4452_v14 = vpack.c.bf16 %v5203_v12, %v5201_v57 }
 0x5ef   : > { %v5205_v46 = vpop.eup %5204 }
 0x5f0   : > { %3908 = vst [vmem:[%s332_s17 + $0x10] sm:$0xff] %v4452_v14 }
 0x5f1   : > { %v5207_v1 = vpop.eup %5206 }
 0x5f2   : > { %v4453_v9 = vpack.c.bf16 %v5207_v1, %v5205_v46 }
 0x5f4   : > { %3909 = vst [vmem:[%s332_s17 + $0x18] sm:$0xff] %v4453_v9 }
 0x5f5 PF: > { %s19_s30 = sadd.s32 1, %s5214_s30  }
 0x5f6   : > { %p16_p4 = scmp.ge.s32.totalorder %s19_s30, 4  }
 0x5f8   :  { %18 = sbr.rel (!%p16_p4) target bundleno = 1 (0x1), region = 89 }

</bundles_post_ra>
